<compile_context>
chip_gen: v7x
topology: tpu7x:2x2x1
jax: 0.10.0
libtpu: 0.0.40
codegen_flags: <defaults>
</compile_context>

<pallas_src>
import jax
import jax.numpy as jnp
from jax import lax
from jax.experimental import pallas as pl
from jax.experimental.pallas import tpu as pltpu


def _sigmoid(x):
    # Exact sigmoid via a single tanh EUP op (replaces exp + approx reciprocal; also
    # avoids exp overflow for the unclamped delta head).
    return 0.5 * (1.0 + jnp.tanh(0.5 * x))


def _make_chemp_layer_kernel(B, L, N, H, R):
    """One CHEMP layer per grid step; p / GRU hidden states carried in VMEM scratch."""
    NB = N * B
    NW = 2 + 4 * R   # stacked-weight refs: w_cat, b_cat, R * (w_ih, w_hh, b_ih, b_hh)

    def kernel(symcat_ref, z_ref, jd_ref, jdsq_ref, jdsadd_ref, jdsmin_ref,
               jbcat_ref, p0_ref, h0_ref, sv_ref, *rest):
        wrefs = rest[:NW]
        p_out_ref, h_out_ref, p_scr, h_scr = rest[NW:]
        f32 = jnp.float32
        it = pl.program_id(0)

        # Seed the carried state from the model inputs on the first layer.
        @pl.when(it == 0)
        def _():
            p_scr[...] = p0_ref[...]
            h_scr[...] = h0_ref[...]

        sv = sv_ref[0, 0]
        sym_cat = symcat_ref[...]        # [L, 2]  = [symbols | symbols^2]
        jd = jd_ref[...]                 # [NB, 1]
        jd_sq = jdsq_ref[...]            # [NB, 1]  jd^2          (hoisted to wrapper)
        jd_sadd = jdsadd_ref[...]        # [NB, L]  jd*(sym+sym0) (hoisted to wrapper)
        jd_smin = jdsmin_ref[...]        # [NB, L]  jd*(sym-sym0) (hoisted to wrapper)
        z_f = z_ref[...]                 # [NB, 1]
        jb_cat = jbcat_ref[...]          # [2*NB, NB] = [jblock ; jblock^2]

        # This grid step's layer weights (leading ITER axis selected by the BlockSpec).
        w_cat = wrefs[0][0]              # [H, L+1]  (w_likelihood.T | w_delta.T)
        b_cat = wrefs[1][0]              # [1, L+1]
        gru_w = []
        for r in range(R):
            g = 2 + 4 * r
            gru_w.append((wrefs[g][0],        # w_ih.T : [in_r, 3H]
                          wrefs[g + 1][0],    # w_hh.T : [H, 3H]
                          wrefs[g + 2][0],    # b_ih   : [1, 3H]
                          wrefs[g + 3][0]))   # b_hh   : [1, 3H]

        p = p_scr[...]                   # [NB, L]
        hs = [h_scr[r] for r in range(R)]

        # ---- message passing / likelihood: two fused MXU matmuls, flat layout ----
        ev = jnp.dot(p, sym_cat, preferred_element_type=f32)            # [NB, 2] = [E, E2]
        e_f = ev[:, 0:1]
        var_sel = (lax.broadcasted_iota(jnp.int32, (1, 2), 1) == 1).astype(f32)
        ev_cat = ev - (e_f * e_f) * var_sel                              # [NB, 2] = [E, Var]
        var_f = ev_cat[:, 1:2]
        mm = jnp.dot(jb_cat, ev_cat, preferred_element_type=f32)        # [2*NB, 2]
        mu_f = mm[:NB, 0:1] - e_f * jd                                   # sum_k J*E - E*Jd
        ss_f = mm[NB:, 1:2] + sv - var_f * jd_sq                         # sum_k J^2*Var + sv - Var*Jd^2
        lik = (2.0 * (z_f - mu_f) - jd_sadd) * jd_smin / (2.0 * ss_f)    # [NB, L]
        lik = jnp.minimum(lik, 88.0)

        # ---- stacked GRU: input projections off the serial chain, recurrence fully
        #      unrolled and kept in vector registers (no scratch round trips) ----
        # TODO(synk): hold w_hh in MXU weight registers across the N timesteps via
        # pltpu.matmul_push_rhs / matmul_acc_lhs instead of re-staging it per step.
        xs = None
        for r in range(R):
            w_ih_t, w_hh_t, b_ih, b_hh = gru_w[r]
            if r == 0:
                gi_all = jnp.dot(lik, w_ih_t, preferred_element_type=f32) + b_ih  # [NB, 3H]
                gis = [gi_all[t * B:(t + 1) * B, :] for t in range(N)]
            else:
                gis = [jnp.dot(xs[t], w_ih_t, preferred_element_type=f32) + b_ih
                       for t in range(N)]
            h = hs[r]
            outs = []
            for t in range(N):                                           # N small & static
                gi = gis[t]                                              # [B, 3H]
                gh = jnp.dot(h, w_hh_t, preferred_element_type=f32) + b_hh
                rz = _sigmoid(gi[:, :2 * H] + gh[:, :2 * H])             # fused r|z gates
                r_g = rz[:, :H]
                z_g = rz[:, H:]
                n_g = jnp.tanh(gi[:, 2 * H:] + r_g * gh[:, 2 * H:])
                h = (1.0 - z_g) * n_g + z_g * h
                outs.append(h)                                           # stays in vregs
            hs[r] = h
            xs = outs

        # ---- output head + convex combination with p_pre (per timestep) ----
        for t in range(N):
            proj = jnp.dot(xs[t], w_cat, preferred_element_type=f32) + b_cat   # [B, L+1]
            lt = jnp.minimum(proj[:, :L], 88.0)
            ex = jnp.exp(lt - jnp.max(lt, axis=-1, keepdims=True))
            p_tilde = ex / jnp.sum(ex, axis=-1, keepdims=True)           # exact softmax
            d = _sigmoid(proj[:, L:L + 1])                               # [B, 1] delta
            p_prev_t = p_scr[t * B:(t + 1) * B, :]                       # not yet overwritten
            p_scr[t * B:(t + 1) * B, :] = p_tilde * (1.0 - d) + p_prev_t * d

        for r in range(R):
            h_scr[r] = hs[r]

        # Write the model outputs only once, on the last layer.
        @pl.when(it == pl.num_programs(0) - 1)
        def _():
            p_out_ref[...] = p_scr[...]
            h_out_ref[...] = h_scr[...]

    return kernel


def chemp_model_apply(layer_params_list, z, J, p0, h0, sigma_square_v, dims):
    """CHEMPModel.forward.  z:[B,N], J:[B,N,N], p0:[B,L,N], h0:[R,B,H] -> (p:[B,L,N], h:[R,B,H])."""
    B, L, N, H, R = dims
    ITER = len(layer_params_list)
    NB = N * B
    f32 = jnp.float32

    # ---- one-time wrapper-side preprocessing (pure XLA, outside the kernel) ----
    sym = jnp.linspace(1.0 - L, L - 1.0, L, dtype=f32)                    # symbols [L]
    sym_cat = jnp.stack([sym, sym * sym], axis=1)                         # [L, 2]
    z_flat = z.T.reshape(NB, 1).astype(f32)                               # [NB, 1]
    jd = jnp.diagonal(J, axis1=1, axis2=2).astype(f32)                    # [B, N]
    jd_flat = jd.T.reshape(NB, 1)                                         # [NB, 1]
    jd_sq = jd_flat * jd_flat
    jd_sadd = jd_flat * (sym + sym[0])[None, :]                           # [NB, L]
    jd_smin = jd_flat * (sym - sym[0])[None, :]                           # [NB, L]
    # Block-diagonal embedding of J (and J^2): jblock[n*B+b, k*B+c] = J[b,n,k]*(b==c),
    # so both message-passing contractions become one [2NB,NB]x[NB,2] matmul.
    jblock = jnp.einsum('bnk,bc->nbkc', J.astype(f32),
                        jnp.eye(B, dtype=f32)).reshape(NB, NB)
    jb_cat = jnp.concatenate([jblock, jblock * jblock], axis=0)           # [2*NB, NB]
    # TODO(synk): for large N*B switch to a per-batch [N,N] formulation (grid over b,
    # second v7x TensorCore) and/or cast jb_cat + weights to bf16 with f32 accumulation.
    p_flat = jnp.transpose(p0, (2, 0, 1)).reshape(NB, L).astype(f32)      # [NB, L]
    h0f = h0.astype(f32)                                                  # [R, B, H]
    sv = jnp.asarray(sigma_square_v, f32).reshape(1, 1)

    # ---- per-layer weights stacked along a leading ITER axis (one ref per kind) ----
    w_cat_s = jnp.stack([jnp.concatenate([prm["w_lik"].T, prm["w_del"].T], axis=1)
                         for prm in layer_params_list])                   # [ITER, H, L+1]
    b_cat_s = jnp.stack([jnp.concatenate([prm["b_lik"], prm["b_del"]]).reshape(1, L + 1)
                         for prm in layer_params_list])                   # [ITER, 1, L+1]
    gru_stacked = []
    for r in range(R):
        gru_stacked += [
            jnp.stack([prm["gru"][r][0].T for prm in layer_params_list]),           # [ITER, in_r, 3H]
            jnp.stack([prm["gru"][r][1].T for prm in layer_params_list]),           # [ITER, H, 3H]
            jnp.stack([prm["gru"][r][2].reshape(1, 3 * H) for prm in layer_params_list]),
            jnp.stack([prm["gru"][r][3].reshape(1, 3 * H) for prm in layer_params_list]),
        ]
    weight_args = [w_cat_s, b_cat_s] + gru_stacked

    def _const_spec(a):
        if a.ndim == 2:
            return pl.BlockSpec(a.shape, lambda it: (0, 0))
        return pl.BlockSpec(a.shape, lambda it: (0, 0, 0))

    def _layer_spec(a):
        return pl.BlockSpec((1,) + a.shape[1:], lambda it: (it, 0, 0))

    sv_spec = pl.BlockSpec((1, 1), lambda it: (0, 0),
                           memory_space=pltpu.MemorySpace.SMEM)

    in_specs = ([_const_spec(sym_cat), _const_spec(z_flat), _const_spec(jd_flat),
                 _const_spec(jd_sq), _const_spec(jd_sadd), _const_spec(jd_smin),
                 _const_spec(jb_cat), _const_spec(p_flat), _const_spec(h0f), sv_spec]
                + [_layer_spec(w) for w in weight_args])

    out_specs = (pl.BlockSpec((NB, L), lambda it: (0, 0)),
                 pl.BlockSpec((R, B, H), lambda it: (0, 0, 0)))

    grid_spec = pltpu.PrefetchScalarGridSpec(
        num_scalar_prefetch=0,
        grid=(ITER,),
        in_specs=in_specs,
        out_specs=out_specs,
        scratch_shapes=[pltpu.VMEM((NB, L), f32),      # p carried across layers
                        pltpu.VMEM((R, B, H), f32)])   # GRU hidden states carried

    p_out, h_out = pl.pallas_call(
        _make_chemp_layer_kernel(B, L, N, H, R),
        out_shape=(jax.ShapeDtypeStruct((NB, L), f32),
                   jax.ShapeDtypeStruct((R, B, H), f32)),
        grid_spec=grid_spec,
        compiler_params=pltpu.CompilerParams(
            dimension_semantics=("arbitrary",),
            vmem_limit_bytes=48 * 1024 * 1024),
    )(sym_cat, z_flat, jd_flat, jd_sq, jd_sadd, jd_smin, jb_cat, p_flat, h0f, sv,
      *weight_args)

    p = jnp.transpose(p_out.reshape(N, B, L), (1, 2, 0))                  # back to [B, L, N]
    return p, h_out


def init_layer_params(key, L, H, R):
    """Deterministic synthetic init matching CHEMPLayer.__init__ parameter shapes."""
    ks = jax.random.split(key, 2 + R)
    w_lik = jax.random.normal(ks[0], (L, H), jnp.float32)     # nn.Parameter(randn)
    b_lik = jnp.zeros((L,), jnp.float32)
    w_del = jax.random.normal(ks[1], (1, H), jnp.float32)
    b_del = jnp.zeros((1,), jnp.float32)
    scale = 1.0 / float(H) ** 0.5
    gru = []
    for r in range(R):
        in_r = L if r == 0 else H
        k0, k1, k2, k3 = jax.random.split(ks[2 + r], 4)
        w_ih = jax.random.uniform(k0, (3 * H, in_r), jnp.float32, -scale, scale)
        w_hh = jax.random.uniform(k1, (3 * H, H), jnp.float32, -scale, scale)
        b_ih = jax.random.uniform(k2, (3 * H,), jnp.float32, -scale, scale)
        b_hh = jax.random.uniform(k3, (3 * H,), jnp.float32, -scale, scale)
        gru.append((w_ih, w_hh, b_ih, b_hh))
    return dict(w_lik=w_lik, b_lik=b_lik, w_del=w_del, b_del=b_del, gru=gru)


if __name__ == "__main__":
    # small shapes consistent with the module: length=4, input_size(2tx)=8,
    # iterations=2, hidden_size=16, rnn_layers=2, batch=2
    B, L, N, H, R = 2, 4, 8, 16, 2
    ITERATIONS = 2
    dims = (B, L, N, H, R)

    key = jax.random.PRNGKey(0)
    k_z, k_j, k_p, *layer_keys = jax.random.split(key, 3 + ITERATIONS)

    z = jax.random.normal(k_z, (B, N), jnp.float32)
    J = jax.random.normal(k_j, (B, N, N), jnp.float32)
    p0 = jax.nn.softmax(jax.random.normal(k_p, (B, L, N), jnp.float32), axis=1)
    h0 = jnp.zeros((R, B, H), jnp.float32)
    sigma_square_v = 0.5

    layer_params = [init_layer_params(k, L, H, R) for k in layer_keys]

    p, h = chemp_model_apply(layer_params, z, J, p0, h0, sigma_square_v, dims)
    jax.block_until_ready((p, h))
    assert p.shape == (B, L, N) and h.shape == (R, B, H)
    assert bool(jnp.all(jnp.isfinite(p))) and bool(jnp.all(jnp.isfinite(h)))
    # p is a convex combination of softmaxes, so it must stay normalized over L.
    assert bool(jnp.allclose(jnp.sum(p, axis=1), 1.0, atol=5e-3))
    print("KERNEL_OK")
</pallas_src>

<mosaic_0001>
module attributes {stable_mosaic.version = 11 : i64} {
  func.func @kernel(%arg0: i32, %arg1: memref<4x2xf32, #tpu.memory_space<vmem>>, %arg2: memref<16x1xf32, #tpu.memory_space<vmem>>, %arg3: memref<16x1xf32, #tpu.memory_space<vmem>>, %arg4: memref<16x1xf32, #tpu.memory_space<vmem>>, %arg5: memref<16x4xf32, #tpu.memory_space<vmem>>, %arg6: memref<16x4xf32, #tpu.memory_space<vmem>>, %arg7: memref<32x16xf32, #tpu.memory_space<vmem>>, %arg8: memref<16x4xf32, #tpu.memory_space<vmem>>, %arg9: memref<2x2x16xf32, #tpu.memory_space<vmem>>, %arg10: memref<1x1xf32, #tpu.memory_space<smem>>, %arg11: memref<1x16x5xf32, #tpu.memory_space<vmem>>, %arg12: memref<1x1x5xf32, #tpu.memory_space<vmem>>, %arg13: memref<1x4x48xf32, #tpu.memory_space<vmem>>, %arg14: memref<1x16x48xf32, #tpu.memory_space<vmem>>, %arg15: memref<1x1x48xf32, #tpu.memory_space<vmem>>, %arg16: memref<1x1x48xf32, #tpu.memory_space<vmem>>, %arg17: memref<1x16x48xf32, #tpu.memory_space<vmem>>, %arg18: memref<1x16x48xf32, #tpu.memory_space<vmem>>, %arg19: memref<1x1x48xf32, #tpu.memory_space<vmem>>, %arg20: memref<1x1x48xf32, #tpu.memory_space<vmem>>, %arg21: memref<16x4xf32, #tpu.memory_space<vmem>>, %arg22: memref<2x2x16xf32, #tpu.memory_space<vmem>>, %arg23: memref<16x4xf32, #tpu.memory_space<vmem>>, %arg24: memref<2x2x16xf32, #tpu.memory_space<vmem>>) attributes {dimension_semantics = [#tpu.dimension_semantics<arbitrary>], iteration_bounds = array<i64: 2>, scalar_prefetch = 0 : i64, scratch_operands = 2 : i64, tpu.core_type = #tpu.core_type<tc>, window_params = [{pipeline_mode = #tpu.pipeline_mode<synchronous>, transform_indices = @transform_0, window_bounds = array<i64: 4, 2>}, {pipeline_mode = #tpu.pipeline_mode<synchronous>, transform_indices = @transform_1, window_bounds = array<i64: 16, 1>}, {pipeline_mode = #tpu.pipeline_mode<synchronous>, transform_indices = @transform_2, window_bounds = array<i64: 16, 1>}, {pipeline_mode = #tpu.pipeline_mode<synchronous>, transform_indices = @transform_3, window_bounds = array<i64: 16, 1>}, {pipeline_mode = #tpu.pipeline_mode<synchronous>, transform_indices = @transform_4, window_bounds = array<i64: 16, 4>}, {pipeline_mode = #tpu.pipeline_mode<synchronous>, transform_indices = @transform_5, window_bounds = array<i64: 16, 4>}, {pipeline_mode = #tpu.pipeline_mode<synchronous>, transform_indices = @transform_6, window_bounds = array<i64: 32, 16>}, {pipeline_mode = #tpu.pipeline_mode<synchronous>, transform_indices = @transform_7, window_bounds = array<i64: 16, 4>}, {pipeline_mode = #tpu.pipeline_mode<synchronous>, transform_indices = @transform_8, window_bounds = array<i64: 2, 2, 16>}, {transform_indices = @transform_9, window_bounds = array<i64: 1, 1>}, {transform_indices = @transform_10, window_bounds = array<i64: 1, 16, 5>}, {transform_indices = @transform_11, window_bounds = array<i64: 1, 1, 5>}, {transform_indices = @transform_12, window_bounds = array<i64: 1, 4, 48>}, {transform_indices = @transform_13, window_bounds = array<i64: 1, 16, 48>}, {transform_indices = @transform_14, window_bounds = array<i64: 1, 1, 48>}, {transform_indices = @transform_15, window_bounds = array<i64: 1, 1, 48>}, {transform_indices = @transform_16, window_bounds = array<i64: 1, 16, 48>}, {transform_indices = @transform_17, window_bounds = array<i64: 1, 16, 48>}, {transform_indices = @transform_18, window_bounds = array<i64: 1, 1, 48>}, {transform_indices = @transform_19, window_bounds = array<i64: 1, 1, 48>}, {pipeline_mode = #tpu.pipeline_mode<synchronous>, transform_indices = @transform_20, window_bounds = array<i64: 16, 4>}, {pipeline_mode = #tpu.pipeline_mode<synchronous>, transform_indices = @transform_21, window_bounds = array<i64: 2, 2, 16>}]} {
    %c0_i32 = arith.constant 0 : i32
    %0 = arith.cmpi eq, %arg0, %c0_i32 : i32
    %1 = arith.extui %0 : i1 to i32
    %c0_i32_0 = arith.constant 0 : i32
    %2 = arith.cmpi ne, %1, %c0_i32_0 : i32
    scf.if %2 {
      %c0_243 = arith.constant 0 : index
      %c0_244 = arith.constant 0 : index
      %770 = vector.load %arg8[%c0_243, %c0_244] : memref<16x4xf32, #tpu.memory_space<vmem>>, vector<16x4xf32>
      %c0_245 = arith.constant 0 : index
      %c0_246 = arith.constant 0 : index
      %771 = vector.load %arg23[%c0_245, %c0_246] : memref<16x4xf32, #tpu.memory_space<vmem>>, vector<16x4xf32>
      tpu.vector_store %arg23[%c0_245, %c0_246], %770 {strides = array<i32>} : memref<16x4xf32, #tpu.memory_space<vmem>>, vector<16x4xf32>,
      %c0_247 = arith.constant 0 : index
      %c0_248 = arith.constant 0 : index
      %c0_249 = arith.constant 0 : index
      %772 = vector.load %arg9[%c0_247, %c0_248, %c0_249] : memref<2x2x16xf32, #tpu.memory_space<vmem>>, vector<2x2x16xf32>
      %c0_250 = arith.constant 0 : index
      %c0_251 = arith.constant 0 : index
      %c0_252 = arith.constant 0 : index
      %773 = vector.load %arg24[%c0_250, %c0_251, %c0_252] : memref<2x2x16xf32, #tpu.memory_space<vmem>>, vector<2x2x16xf32>
      tpu.vector_store %arg24[%c0_250, %c0_251, %c0_252], %772 {strides = array<i32>} : memref<2x2x16xf32, #tpu.memory_space<vmem>>, vector<2x2x16xf32>,
    } else {
    }
    %c0 = arith.constant 0 : index
    %c0_1 = arith.constant 0 : index
    %3 = memref.load %arg10[%c0, %c0_1] : memref<1x1xf32, #tpu.memory_space<smem>>
    %c0_2 = arith.constant 0 : index
    %c0_3 = arith.constant 0 : index
    %4 = vector.load %arg1[%c0_2, %c0_3] : memref<4x2xf32, #tpu.memory_space<vmem>>, vector<4x2xf32>
    %c0_4 = arith.constant 0 : index
    %c0_5 = arith.constant 0 : index
    %5 = vector.load %arg3[%c0_4, %c0_5] : memref<16x1xf32, #tpu.memory_space<vmem>>, vector<16x1xf32>
    %c0_6 = arith.constant 0 : index
    %c0_7 = arith.constant 0 : index
    %6 = vector.load %arg4[%c0_6, %c0_7] : memref<16x1xf32, #tpu.memory_space<vmem>>, vector<16x1xf32>
    %c0_8 = arith.constant 0 : index
    %c0_9 = arith.constant 0 : index
    %7 = vector.load %arg5[%c0_8, %c0_9] : memref<16x4xf32, #tpu.memory_space<vmem>>, vector<16x4xf32>
    %c0_10 = arith.constant 0 : index
    %c0_11 = arith.constant 0 : index
    %8 = vector.load %arg6[%c0_10, %c0_11] : memref<16x4xf32, #tpu.memory_space<vmem>>, vector<16x4xf32>
    %c0_12 = arith.constant 0 : index
    %c0_13 = arith.constant 0 : index
    %9 = vector.load %arg2[%c0_12, %c0_13] : memref<16x1xf32, #tpu.memory_space<vmem>>, vector<16x1xf32>
    %c0_14 = arith.constant 0 : index
    %c0_15 = arith.constant 0 : index
    %10 = vector.load %arg7[%c0_14, %c0_15] : memref<32x16xf32, #tpu.memory_space<vmem>>, vector<32x16xf32>
    %c0_16 = arith.constant 0 : index
    %c0_17 = arith.constant 0 : index
    %c0_18 = arith.constant 0 : index
    %11 = vector.load %arg11[%c0_16, %c0_17, %c0_18] : memref<1x16x5xf32, #tpu.memory_space<vmem>>, vector<1x16x5xf32>
    %12 = vector.shape_cast %11 : vector<1x16x5xf32> to vector<16x5xf32>
    %c0_19 = arith.constant 0 : index
    %c0_20 = arith.constant 0 : index
    %c0_21 = arith.constant 0 : index
    %13 = vector.load %arg12[%c0_19, %c0_20, %c0_21] : memref<1x1x5xf32, #tpu.memory_space<vmem>>, vector<1x1x5xf32>
    %14 = vector.shape_cast %13 : vector<1x1x5xf32> to vector<1x5xf32>
    %c0_22 = arith.constant 0 : index
    %c0_23 = arith.constant 0 : index
    %c0_24 = arith.constant 0 : index
    %15 = vector.load %arg13[%c0_22, %c0_23, %c0_24] : memref<1x4x48xf32, #tpu.memory_space<vmem>>, vector<1x4x48xf32>
    %16 = vector.shape_cast %15 : vector<1x4x48xf32> to vector<4x48xf32>
    %c0_25 = arith.constant 0 : index
    %c0_26 = arith.constant 0 : index
    %c0_27 = arith.constant 0 : index
    %17 = vector.load %arg14[%c0_25, %c0_26, %c0_27] : memref<1x16x48xf32, #tpu.memory_space<vmem>>, vector<1x16x48xf32>
    %18 = vector.shape_cast %17 : vector<1x16x48xf32> to vector<16x48xf32>
    %c0_28 = arith.constant 0 : index
    %c0_29 = arith.constant 0 : index
    %c0_30 = arith.constant 0 : index
    %19 = vector.load %arg15[%c0_28, %c0_29, %c0_30] : memref<1x1x48xf32, #tpu.memory_space<vmem>>, vector<1x1x48xf32>
    %20 = vector.shape_cast %19 : vector<1x1x48xf32> to vector<1x48xf32>
    %c0_31 = arith.constant 0 : index
    %c0_32 = arith.constant 0 : index
    %c0_33 = arith.constant 0 : index
    %21 = vector.load %arg16[%c0_31, %c0_32, %c0_33] : memref<1x1x48xf32, #tpu.memory_space<vmem>>, vector<1x1x48xf32>
    %22 = vector.shape_cast %21 : vector<1x1x48xf32> to vector<1x48xf32>
    %c0_34 = arith.constant 0 : index
    %c0_35 = arith.constant 0 : index
    %c0_36 = arith.constant 0 : index
    %23 = vector.load %arg17[%c0_34, %c0_35, %c0_36] : memref<1x16x48xf32, #tpu.memory_space<vmem>>, vector<1x16x48xf32>
    %24 = vector.shape_cast %23 : vector<1x16x48xf32> to vector<16x48xf32>
    %c0_37 = arith.constant 0 : index
    %c0_38 = arith.constant 0 : index
    %c0_39 = arith.constant 0 : index
    %25 = vector.load %arg18[%c0_37, %c0_38, %c0_39] : memref<1x16x48xf32, #tpu.memory_space<vmem>>, vector<1x16x48xf32>
    %26 = vector.shape_cast %25 : vector<1x16x48xf32> to vector<16x48xf32>
    %c0_40 = arith.constant 0 : index
    %c0_41 = arith.constant 0 : index
    %c0_42 = arith.constant 0 : index
    %27 = vector.load %arg19[%c0_40, %c0_41, %c0_42] : memref<1x1x48xf32, #tpu.memory_space<vmem>>, vector<1x1x48xf32>
    %28 = vector.shape_cast %27 : vector<1x1x48xf32> to vector<1x48xf32>
    %c0_43 = arith.constant 0 : index
    %c0_44 = arith.constant 0 : index
    %c0_45 = arith.constant 0 : index
    %29 = vector.load %arg20[%c0_43, %c0_44, %c0_45] : memref<1x1x48xf32, #tpu.memory_space<vmem>>, vector<1x1x48xf32>
    %30 = vector.shape_cast %29 : vector<1x1x48xf32> to vector<1x48xf32>
    %c0_46 = arith.constant 0 : index
    %c0_47 = arith.constant 0 : index
    %31 = vector.load %arg23[%c0_46, %c0_47] : memref<16x4xf32, #tpu.memory_space<vmem>>, vector<16x4xf32>
    %c0_48 = arith.constant 0 : index
    %c0_49 = arith.constant 0 : index
    %c0_50 = arith.constant 0 : index
    %32 = vector.load %arg24[%c0_48, %c0_49, %c0_50] : memref<2x2x16xf32, #tpu.memory_space<vmem>>, vector<1x2x16xf32>
    %33 = vector.shape_cast %32 : vector<1x2x16xf32> to vector<2x16xf32>
    %c1 = arith.constant 1 : index
    %c0_51 = arith.constant 0 : index
    %c0_52 = arith.constant 0 : index
    %34 = vector.load %arg24[%c1, %c0_51, %c0_52] : memref<2x2x16xf32, #tpu.memory_space<vmem>>, vector<1x2x16xf32>
    %35 = vector.shape_cast %34 : vector<1x2x16xf32> to vector<2x16xf32>
    %cst = arith.constant dense<0.000000e+00> : vector<16x2xf32>
    %36 = tpu.matmul %31, %4, %cst {dimension_numbers = #tpu.dot_dimension_numbers<[1], [0], [0], [1], [0, 0, 1, 1], [], []>} : vector<16x4xf32>, vector<4x2xf32>, vector<16x2xf32> -> vector<16x2xf32>
    %37 = vector.extract_strided_slice %36 {offsets = [0, 0], sizes = [16, 1], strides = [1, 1]} : vector<16x2xf32> to vector<16x1xf32>
    %38 = tpu.iota {dimensions = array<i32: 1>} : vector<1x2xi32>
    %c1_i32 = arith.constant 1 : i32
    %39 = vector.broadcast %c1_i32 : i32 to vector<1x2xi32>
    %40 = arith.cmpi eq, %38, %39 : vector<1x2xi32>
    %41 = arith.extui %40 : vector<1x2xi1> to vector<1x2xi32>
    %42 = arith.sitofp %41 : vector<1x2xi32> to vector<1x2xf32>
    %43 = arith.mulf %37, %37 : vector<16x1xf32>
    %44 = vector.broadcast %43 : vector<16x1xf32> to vector<16x2xf32>
    %45 = vector.broadcast %42 : vector<1x2xf32> to vector<16x2xf32>
    %46 = arith.mulf %44, %45 : vector<16x2xf32>
    %47 = arith.subf %36, %46 : vector<16x2xf32>
    %48 = vector.extract_strided_slice %47 {offsets = [0, 1], sizes = [16, 1], strides = [1, 1]} : vector<16x2xf32> to vector<16x1xf32>
    %cst_53 = arith.constant dense<0.000000e+00> : vector<32x2xf32>
    %49 = tpu.matmul %10, %47, %cst_53 {dimension_numbers = #tpu.dot_dimension_numbers<[1], [0], [0], [1], [0, 0, 1, 1], [], []>} : vector<32x16xf32>, vector<16x2xf32>, vector<32x2xf32> -> vector<32x2xf32>
    %50 = vector.extract_strided_slice %49 {offsets = [0, 0], sizes = [16, 1], strides = [1, 1]} : vector<32x2xf32> to vector<16x1xf32>
    %51 = arith.mulf %37, %5 : vector<16x1xf32>
    %52 = arith.subf %50, %51 : vector<16x1xf32>
    %53 = vector.extract_strided_slice %49 {offsets = [16, 1], sizes = [16, 1], strides = [1, 1]} : vector<32x2xf32> to vector<16x1xf32>
    %54 = vector.broadcast %3 : f32 to vector<16x1xf32>
    %55 = arith.addf %53, %54 : vector<16x1xf32>
    %56 = arith.mulf %48, %6 : vector<16x1xf32>
    %57 = arith.subf %55, %56 : vector<16x1xf32>
    %58 = arith.subf %9, %52 : vector<16x1xf32>
    %cst_54 = arith.constant 2.000000e+00 : f32
    %59 = vector.broadcast %cst_54 : f32 to vector<16x1xf32>
    %60 = arith.mulf %59, %58 : vector<16x1xf32>
    %61 = vector.broadcast %60 : vector<16x1xf32> to vector<16x4xf32>
    %62 = arith.subf %61, %7 : vector<16x4xf32>
    %63 = arith.mulf %62, %8 : vector<16x4xf32>
    %cst_55 = arith.constant 2.000000e+00 : f32
    %64 = vector.broadcast %cst_55 : f32 to vector<16x1xf32>
    %65 = arith.mulf %64, %57 : vector<16x1xf32>
    %66 = vector.broadcast %65 : vector<16x1xf32> to vector<16x4xf32>
    %67 = arith.divf %63, %66 : vector<16x4xf32>
    %cst_56 = arith.constant 8.800000e+01 : f32
    %68 = vector.broadcast %cst_56 : f32 to vector<16x4xf32>
    %69 = arith.minimumf %67, %68 : vector<16x4xf32>
    %cst_57 = arith.constant dense<0.000000e+00> : vector<16x48xf32>
    %70 = tpu.matmul %69, %16, %cst_57 {dimension_numbers = #tpu.dot_dimension_numbers<[1], [0], [0], [1], [0, 0, 1, 1], [], []>} : vector<16x4xf32>, vector<4x48xf32>, vector<16x48xf32> -> vector<16x48xf32>
    %71 = vector.broadcast %20 : vector<1x48xf32> to vector<16x48xf32>
    %72 = arith.addf %70, %71 : vector<16x48xf32>
    %73 = vector.extract_strided_slice %72 {offsets = [0, 0], sizes = [2, 48], strides = [1, 1]} : vector<16x48xf32> to vector<2x48xf32>
    %74 = vector.extract_strided_slice %72 {offsets = [2, 0], sizes = [2, 48], strides = [1, 1]} : vector<16x48xf32> to vector<2x48xf32>
    %75 = vector.extract_strided_slice %72 {offsets = [4, 0], sizes = [2, 48], strides = [1, 1]} : vector<16x48xf32> to vector<2x48xf32>
    %76 = vector.extract_strided_slice %72 {offsets = [6, 0], sizes = [2, 48], strides = [1, 1]} : vector<16x48xf32> to vector<2x48xf32>
    %77 = vector.extract_strided_slice %72 {offsets = [8, 0], sizes = [2, 48], strides = [1, 1]} : vector<16x48xf32> to vector<2x48xf32>
    %78 = vector.extract_strided_slice %72 {offsets = [10, 0], sizes = [2, 48], strides = [1, 1]} : vector<16x48xf32> to vector<2x48xf32>
    %79 = vector.extract_strided_slice %72 {offsets = [12, 0], sizes = [2, 48], strides = [1, 1]} : vector<16x48xf32> to vector<2x48xf32>
    %80 = vector.extract_strided_slice %72 {offsets = [14, 0], sizes = [2, 48], strides = [1, 1]} : vector<16x48xf32> to vector<2x48xf32>
    %cst_58 = arith.constant dense<0.000000e+00> : vector<2x48xf32>
    %81 = tpu.matmul %33, %18, %cst_58 {dimension_numbers = #tpu.dot_dimension_numbers<[1], [0], [0], [1], [0, 0, 1, 1], [], []>} : vector<2x16xf32>, vector<16x48xf32>, vector<2x48xf32> -> vector<2x48xf32>
    %82 = vector.broadcast %22 : vector<1x48xf32> to vector<2x48xf32>
    %83 = arith.addf %81, %82 : vector<2x48xf32>
    %84 = vector.extract_strided_slice %73 {offsets = [0, 0], sizes = [2, 32], strides = [1, 1]} : vector<2x48xf32> to vector<2x32xf32>
    %85 = vector.extract_strided_slice %83 {offsets = [0, 0], sizes = [2, 32], strides = [1, 1]} : vector<2x48xf32> to vector<2x32xf32>
    %86 = arith.addf %84, %85 : vector<2x32xf32>
    %cst_59 = arith.constant 5.000000e-01 : f32
    %87 = vector.broadcast %cst_59 : f32 to vector<2x32xf32>
    %88 = arith.mulf %87, %86 : vector<2x32xf32>
    %89 = math.tanh %88 : vector<2x32xf32>
    %cst_60 = arith.constant 1.000000e+00 : f32
    %90 = vector.broadcast %cst_60 : f32 to vector<2x32xf32>
    %91 = arith.addf %90, %89 : vector<2x32xf32>
    %cst_61 = arith.constant 5.000000e-01 : f32
    %92 = vector.broadcast %cst_61 : f32 to vector<2x32xf32>
    %93 = arith.mulf %92, %91 : vector<2x32xf32>
    %94 = vector.extract_strided_slice %93 {offsets = [0, 0], sizes = [2, 16], strides = [1, 1]} : vector<2x32xf32> to vector<2x16xf32>
    %95 = vector.extract_strided_slice %93 {offsets = [0, 16], sizes = [2, 16], strides = [1, 1]} : vector<2x32xf32> to vector<2x16xf32>
    %96 = vector.extract_strided_slice %73 {offsets = [0, 32], sizes = [2, 16], strides = [1, 1]} : vector<2x48xf32> to vector<2x16xf32>
    %97 = vector.extract_strided_slice %83 {offsets = [0, 32], sizes = [2, 16], strides = [1, 1]} : vector<2x48xf32> to vector<2x16xf32>
    %98 = arith.mulf %94, %97 : vector<2x16xf32>
    %99 = arith.addf %96, %98 : vector<2x16xf32>
    %100 = math.tanh %99 : vector<2x16xf32>
    %cst_62 = arith.constant 1.000000e+00 : f32
    %101 = vector.broadcast %cst_62 : f32 to vector<2x16xf32>
    %102 = arith.subf %101, %95 : vector<2x16xf32>
    %103 = arith.mulf %102, %100 : vector<2x16xf32>
    %104 = arith.mulf %95, %33 : vector<2x16xf32>
    %105 = arith.addf %103, %104 : vector<2x16xf32>
    %cst_63 = arith.constant dense<0.000000e+00> : vector<2x48xf32>
    %106 = tpu.matmul %105, %18, %cst_63 {dimension_numbers = #tpu.dot_dimension_numbers<[1], [0], [0], [1], [0, 0, 1, 1], [], []>} : vector<2x16xf32>, vector<16x48xf32>, vector<2x48xf32> -> vector<2x48xf32>
    %107 = vector.broadcast %22 : vector<1x48xf32> to vector<2x48xf32>
    %108 = arith.addf %106, %107 : vector<2x48xf32>
    %109 = vector.extract_strided_slice %74 {offsets = [0, 0], sizes = [2, 32], strides = [1, 1]} : vector<2x48xf32> to vector<2x32xf32>
    %110 = vector.extract_strided_slice %108 {offsets = [0, 0], sizes = [2, 32], strides = [1, 1]} : vector<2x48xf32> to vector<2x32xf32>
    %111 = arith.addf %109, %110 : vector<2x32xf32>
    %cst_64 = arith.constant 5.000000e-01 : f32
    %112 = vector.broadcast %cst_64 : f32 to vector<2x32xf32>
    %113 = arith.mulf %112, %111 : vector<2x32xf32>
    %114 = math.tanh %113 : vector<2x32xf32>
    %cst_65 = arith.constant 1.000000e+00 : f32
    %115 = vector.broadcast %cst_65 : f32 to vector<2x32xf32>
    %116 = arith.addf %115, %114 : vector<2x32xf32>
    %cst_66 = arith.constant 5.000000e-01 : f32
    %117 = vector.broadcast %cst_66 : f32 to vector<2x32xf32>
    %118 = arith.mulf %117, %116 : vector<2x32xf32>
    %119 = vector.extract_strided_slice %118 {offsets = [0, 0], sizes = [2, 16], strides = [1, 1]} : vector<2x32xf32> to vector<2x16xf32>
    %120 = vector.extract_strided_slice %118 {offsets = [0, 16], sizes = [2, 16], strides = [1, 1]} : vector<2x32xf32> to vector<2x16xf32>
    %121 = vector.extract_strided_slice %74 {offsets = [0, 32], sizes = [2, 16], strides = [1, 1]} : vector<2x48xf32> to vector<2x16xf32>
    %122 = vector.extract_strided_slice %108 {offsets = [0, 32], sizes = [2, 16], strides = [1, 1]} : vector<2x48xf32> to vector<2x16xf32>
    %123 = arith.mulf %119, %122 : vector<2x16xf32>
    %124 = arith.addf %121, %123 : vector<2x16xf32>
    %125 = math.tanh %124 : vector<2x16xf32>
    %cst_67 = arith.constant 1.000000e+00 : f32
    %126 = vector.broadcast %cst_67 : f32 to vector<2x16xf32>
    %127 = arith.subf %126, %120 : vector<2x16xf32>
    %128 = arith.mulf %127, %125 : vector<2x16xf32>
    %129 = arith.mulf %120, %105 : vector<2x16xf32>
    %130 = arith.addf %128, %129 : vector<2x16xf32>
    %cst_68 = arith.constant dense<0.000000e+00> : vector<2x48xf32>
    %131 = tpu.matmul %130, %18, %cst_68 {dimension_numbers = #tpu.dot_dimension_numbers<[1], [0], [0], [1], [0, 0, 1, 1], [], []>} : vector<2x16xf32>, vector<16x48xf32>, vector<2x48xf32> -> vector<2x48xf32>
    %132 = vector.broadcast %22 : vector<1x48xf32> to vector<2x48xf32>
    %133 = arith.addf %131, %132 : vector<2x48xf32>
    %134 = vector.extract_strided_slice %75 {offsets = [0, 0], sizes = [2, 32], strides = [1, 1]} : vector<2x48xf32> to vector<2x32xf32>
    %135 = vector.extract_strided_slice %133 {offsets = [0, 0], sizes = [2, 32], strides = [1, 1]} : vector<2x48xf32> to vector<2x32xf32>
    %136 = arith.addf %134, %135 : vector<2x32xf32>
    %cst_69 = arith.constant 5.000000e-01 : f32
    %137 = vector.broadcast %cst_69 : f32 to vector<2x32xf32>
    %138 = arith.mulf %137, %136 : vector<2x32xf32>
    %139 = math.tanh %138 : vector<2x32xf32>
    %cst_70 = arith.constant 1.000000e+00 : f32
    %140 = vector.broadcast %cst_70 : f32 to vector<2x32xf32>
    %141 = arith.addf %140, %139 : vector<2x32xf32>
    %cst_71 = arith.constant 5.000000e-01 : f32
    %142 = vector.broadcast %cst_71 : f32 to vector<2x32xf32>
    %143 = arith.mulf %142, %141 : vector<2x32xf32>
    %144 = vector.extract_strided_slice %143 {offsets = [0, 0], sizes = [2, 16], strides = [1, 1]} : vector<2x32xf32> to vector<2x16xf32>
    %145 = vector.extract_strided_slice %143 {offsets = [0, 16], sizes = [2, 16], strides = [1, 1]} : vector<2x32xf32> to vector<2x16xf32>
    %146 = vector.extract_strided_slice %75 {offsets = [0, 32], sizes = [2, 16], strides = [1, 1]} : vector<2x48xf32> to vector<2x16xf32>
    %147 = vector.extract_strided_slice %133 {offsets = [0, 32], sizes = [2, 16], strides = [1, 1]} : vector<2x48xf32> to vector<2x16xf32>
    %148 = arith.mulf %144, %147 : vector<2x16xf32>
    %149 = arith.addf %146, %148 : vector<2x16xf32>
    %150 = math.tanh %149 : vector<2x16xf32>
    %cst_72 = arith.constant 1.000000e+00 : f32
    %151 = vector.broadcast %cst_72 : f32 to vector<2x16xf32>
    %152 = arith.subf %151, %145 : vector<2x16xf32>
    %153 = arith.mulf %152, %150 : vector<2x16xf32>
    %154 = arith.mulf %145, %130 : vector<2x16xf32>
    %155 = arith.addf %153, %154 : vector<2x16xf32>
    %cst_73 = arith.constant dense<0.000000e+00> : vector<2x48xf32>
    %156 = tpu.matmul %155, %18, %cst_73 {dimension_numbers = #tpu.dot_dimension_numbers<[1], [0], [0], [1], [0, 0, 1, 1], [], []>} : vector<2x16xf32>, vector<16x48xf32>, vector<2x48xf32> -> vector<2x48xf32>
    %157 = vector.broadcast %22 : vector<1x48xf32> to vector<2x48xf32>
    %158 = arith.addf %156, %157 : vector<2x48xf32>
    %159 = vector.extract_strided_slice %76 {offsets = [0, 0], sizes = [2, 32], strides = [1, 1]} : vector<2x48xf32> to vector<2x32xf32>
    %160 = vector.extract_strided_slice %158 {offsets = [0, 0], sizes = [2, 32], strides = [1, 1]} : vector<2x48xf32> to vector<2x32xf32>
    %161 = arith.addf %159, %160 : vector<2x32xf32>
    %cst_74 = arith.constant 5.000000e-01 : f32
    %162 = vector.broadcast %cst_74 : f32 to vector<2x32xf32>
    %163 = arith.mulf %162, %161 : vector<2x32xf32>
    %164 = math.tanh %163 : vector<2x32xf32>
    %cst_75 = arith.constant 1.000000e+00 : f32
    %165 = vector.broadcast %cst_75 : f32 to vector<2x32xf32>
    %166 = arith.addf %165, %164 : vector<2x32xf32>
    %cst_76 = arith.constant 5.000000e-01 : f32
    %167 = vector.broadcast %cst_76 : f32 to vector<2x32xf32>
    %168 = arith.mulf %167, %166 : vector<2x32xf32>
    %169 = vector.extract_strided_slice %168 {offsets = [0, 0], sizes = [2, 16], strides = [1, 1]} : vector<2x32xf32> to vector<2x16xf32>
    %170 = vector.extract_strided_slice %168 {offsets = [0, 16], sizes = [2, 16], strides = [1, 1]} : vector<2x32xf32> to vector<2x16xf32>
    %171 = vector.extract_strided_slice %76 {offsets = [0, 32], sizes = [2, 16], strides = [1, 1]} : vector<2x48xf32> to vector<2x16xf32>
    %172 = vector.extract_strided_slice %158 {offsets = [0, 32], sizes = [2, 16], strides = [1, 1]} : vector<2x48xf32> to vector<2x16xf32>
    %173 = arith.mulf %169, %172 : vector<2x16xf32>
    %174 = arith.addf %171, %173 : vector<2x16xf32>
    %175 = math.tanh %174 : vector<2x16xf32>
    %cst_77 = arith.constant 1.000000e+00 : f32
    %176 = vector.broadcast %cst_77 : f32 to vector<2x16xf32>
    %177 = arith.subf %176, %170 : vector<2x16xf32>
    %178 = arith.mulf %177, %175 : vector<2x16xf32>
    %179 = arith.mulf %170, %155 : vector<2x16xf32>
    %180 = arith.addf %178, %179 : vector<2x16xf32>
    %cst_78 = arith.constant dense<0.000000e+00> : vector<2x48xf32>
    %181 = tpu.matmul %180, %18, %cst_78 {dimension_numbers = #tpu.dot_dimension_numbers<[1], [0], [0], [1], [0, 0, 1, 1], [], []>} : vector<2x16xf32>, vector<16x48xf32>, vector<2x48xf32> -> vector<2x48xf32>
    %182 = vector.broadcast %22 : vector<1x48xf32> to vector<2x48xf32>
    %183 = arith.addf %181, %182 : vector<2x48xf32>
    %184 = vector.extract_strided_slice %77 {offsets = [0, 0], sizes = [2, 32], strides = [1, 1]} : vector<2x48xf32> to vector<2x32xf32>
    %185 = vector.extract_strided_slice %183 {offsets = [0, 0], sizes = [2, 32], strides = [1, 1]} : vector<2x48xf32> to vector<2x32xf32>
    %186 = arith.addf %184, %185 : vector<2x32xf32>
    %cst_79 = arith.constant 5.000000e-01 : f32
    %187 = vector.broadcast %cst_79 : f32 to vector<2x32xf32>
    %188 = arith.mulf %187, %186 : vector<2x32xf32>
    %189 = math.tanh %188 : vector<2x32xf32>
    %cst_80 = arith.constant 1.000000e+00 : f32
    %190 = vector.broadcast %cst_80 : f32 to vector<2x32xf32>
    %191 = arith.addf %190, %189 : vector<2x32xf32>
    %cst_81 = arith.constant 5.000000e-01 : f32
    %192 = vector.broadcast %cst_81 : f32 to vector<2x32xf32>
    %193 = arith.mulf %192, %191 : vector<2x32xf32>
    %194 = vector.extract_strided_slice %193 {offsets = [0, 0], sizes = [2, 16], strides = [1, 1]} : vector<2x32xf32> to vector<2x16xf32>
    %195 = vector.extract_strided_slice %193 {offsets = [0, 16], sizes = [2, 16], strides = [1, 1]} : vector<2x32xf32> to vector<2x16xf32>
    %196 = vector.extract_strided_slice %77 {offsets = [0, 32], sizes = [2, 16], strides = [1, 1]} : vector<2x48xf32> to vector<2x16xf32>
    %197 = vector.extract_strided_slice %183 {offsets = [0, 32], sizes = [2, 16], strides = [1, 1]} : vector<2x48xf32> to vector<2x16xf32>
    %198 = arith.mulf %194, %197 : vector<2x16xf32>
    %199 = arith.addf %196, %198 : vector<2x16xf32>
    %200 = math.tanh %199 : vector<2x16xf32>
    %cst_82 = arith.constant 1.000000e+00 : f32
    %201 = vector.broadcast %cst_82 : f32 to vector<2x16xf32>
    %202 = arith.subf %201, %195 : vector<2x16xf32>
    %203 = arith.mulf %202, %200 : vector<2x16xf32>
    %204 = arith.mulf %195, %180 : vector<2x16xf32>
    %205 = arith.addf %203, %204 : vector<2x16xf32>
    %cst_83 = arith.constant dense<0.000000e+00> : vector<2x48xf32>
    %206 = tpu.matmul %205, %18, %cst_83 {dimension_numbers = #tpu.dot_dimension_numbers<[1], [0], [0], [1], [0, 0, 1, 1], [], []>} : vector<2x16xf32>, vector<16x48xf32>, vector<2x48xf32> -> vector<2x48xf32>
    %207 = vector.broadcast %22 : vector<1x48xf32> to vector<2x48xf32>
    %208 = arith.addf %206, %207 : vector<2x48xf32>
    %209 = vector.extract_strided_slice %78 {offsets = [0, 0], sizes = [2, 32], strides = [1, 1]} : vector<2x48xf32> to vector<2x32xf32>
    %210 = vector.extract_strided_slice %208 {offsets = [0, 0], sizes = [2, 32], strides = [1, 1]} : vector<2x48xf32> to vector<2x32xf32>
    %211 = arith.addf %209, %210 : vector<2x32xf32>
    %cst_84 = arith.constant 5.000000e-01 : f32
    %212 = vector.broadcast %cst_84 : f32 to vector<2x32xf32>
    %213 = arith.mulf %212, %211 : vector<2x32xf32>
    %214 = math.tanh %213 : vector<2x32xf32>
    %cst_85 = arith.constant 1.000000e+00 : f32
    %215 = vector.broadcast %cst_85 : f32 to vector<2x32xf32>
    %216 = arith.addf %215, %214 : vector<2x32xf32>
    %cst_86 = arith.constant 5.000000e-01 : f32
    %217 = vector.broadcast %cst_86 : f32 to vector<2x32xf32>
    %218 = arith.mulf %217, %216 : vector<2x32xf32>
    %219 = vector.extract_strided_slice %218 {offsets = [0, 0], sizes = [2, 16], strides = [1, 1]} : vector<2x32xf32> to vector<2x16xf32>
    %220 = vector.extract_strided_slice %218 {offsets = [0, 16], sizes = [2, 16], strides = [1, 1]} : vector<2x32xf32> to vector<2x16xf32>
    %221 = vector.extract_strided_slice %78 {offsets = [0, 32], sizes = [2, 16], strides = [1, 1]} : vector<2x48xf32> to vector<2x16xf32>
    %222 = vector.extract_strided_slice %208 {offsets = [0, 32], sizes = [2, 16], strides = [1, 1]} : vector<2x48xf32> to vector<2x16xf32>
    %223 = arith.mulf %219, %222 : vector<2x16xf32>
    %224 = arith.addf %221, %223 : vector<2x16xf32>
    %225 = math.tanh %224 : vector<2x16xf32>
    %cst_87 = arith.constant 1.000000e+00 : f32
    %226 = vector.broadcast %cst_87 : f32 to vector<2x16xf32>
    %227 = arith.subf %226, %220 : vector<2x16xf32>
    %228 = arith.mulf %227, %225 : vector<2x16xf32>
    %229 = arith.mulf %220, %205 : vector<2x16xf32>
    %230 = arith.addf %228, %229 : vector<2x16xf32>
    %cst_88 = arith.constant dense<0.000000e+00> : vector<2x48xf32>
    %231 = tpu.matmul %230, %18, %cst_88 {dimension_numbers = #tpu.dot_dimension_numbers<[1], [0], [0], [1], [0, 0, 1, 1], [], []>} : vector<2x16xf32>, vector<16x48xf32>, vector<2x48xf32> -> vector<2x48xf32>
    %232 = vector.broadcast %22 : vector<1x48xf32> to vector<2x48xf32>
    %233 = arith.addf %231, %232 : vector<2x48xf32>
    %234 = vector.extract_strided_slice %79 {offsets = [0, 0], sizes = [2, 32], strides = [1, 1]} : vector<2x48xf32> to vector<2x32xf32>
    %235 = vector.extract_strided_slice %233 {offsets = [0, 0], sizes = [2, 32], strides = [1, 1]} : vector<2x48xf32> to vector<2x32xf32>
    %236 = arith.addf %234, %235 : vector<2x32xf32>
    %cst_89 = arith.constant 5.000000e-01 : f32
    %237 = vector.broadcast %cst_89 : f32 to vector<2x32xf32>
    %238 = arith.mulf %237, %236 : vector<2x32xf32>
    %239 = math.tanh %238 : vector<2x32xf32>
    %cst_90 = arith.constant 1.000000e+00 : f32
    %240 = vector.broadcast %cst_90 : f32 to vector<2x32xf32>
    %241 = arith.addf %240, %239 : vector<2x32xf32>
    %cst_91 = arith.constant 5.000000e-01 : f32
    %242 = vector.broadcast %cst_91 : f32 to vector<2x32xf32>
    %243 = arith.mulf %242, %241 : vector<2x32xf32>
    %244 = vector.extract_strided_slice %243 {offsets = [0, 0], sizes = [2, 16], strides = [1, 1]} : vector<2x32xf32> to vector<2x16xf32>
    %245 = vector.extract_strided_slice %243 {offsets = [0, 16], sizes = [2, 16], strides = [1, 1]} : vector<2x32xf32> to vector<2x16xf32>
    %246 = vector.extract_strided_slice %79 {offsets = [0, 32], sizes = [2, 16], strides = [1, 1]} : vector<2x48xf32> to vector<2x16xf32>
    %247 = vector.extract_strided_slice %233 {offsets = [0, 32], sizes = [2, 16], strides = [1, 1]} : vector<2x48xf32> to vector<2x16xf32>
    %248 = arith.mulf %244, %247 : vector<2x16xf32>
    %249 = arith.addf %246, %248 : vector<2x16xf32>
    %250 = math.tanh %249 : vector<2x16xf32>
    %cst_92 = arith.constant 1.000000e+00 : f32
    %251 = vector.broadcast %cst_92 : f32 to vector<2x16xf32>
    %252 = arith.subf %251, %245 : vector<2x16xf32>
    %253 = arith.mulf %252, %250 : vector<2x16xf32>
    %254 = arith.mulf %245, %230 : vector<2x16xf32>
    %255 = arith.addf %253, %254 : vector<2x16xf32>
    %cst_93 = arith.constant dense<0.000000e+00> : vector<2x48xf32>
    %256 = tpu.matmul %255, %18, %cst_93 {dimension_numbers = #tpu.dot_dimension_numbers<[1], [0], [0], [1], [0, 0, 1, 1], [], []>} : vector<2x16xf32>, vector<16x48xf32>, vector<2x48xf32> -> vector<2x48xf32>
    %257 = vector.broadcast %22 : vector<1x48xf32> to vector<2x48xf32>
    %258 = arith.addf %256, %257 : vector<2x48xf32>
    %259 = vector.extract_strided_slice %80 {offsets = [0, 0], sizes = [2, 32], strides = [1, 1]} : vector<2x48xf32> to vector<2x32xf32>
    %260 = vector.extract_strided_slice %258 {offsets = [0, 0], sizes = [2, 32], strides = [1, 1]} : vector<2x48xf32> to vector<2x32xf32>
    %261 = arith.addf %259, %260 : vector<2x32xf32>
    %cst_94 = arith.constant 5.000000e-01 : f32
    %262 = vector.broadcast %cst_94 : f32 to vector<2x32xf32>
    %263 = arith.mulf %262, %261 : vector<2x32xf32>
    %264 = math.tanh %263 : vector<2x32xf32>
    %cst_95 = arith.constant 1.000000e+00 : f32
    %265 = vector.broadcast %cst_95 : f32 to vector<2x32xf32>
    %266 = arith.addf %265, %264 : vector<2x32xf32>
    %cst_96 = arith.constant 5.000000e-01 : f32
    %267 = vector.broadcast %cst_96 : f32 to vector<2x32xf32>
    %268 = arith.mulf %267, %266 : vector<2x32xf32>
    %269 = vector.extract_strided_slice %268 {offsets = [0, 0], sizes = [2, 16], strides = [1, 1]} : vector<2x32xf32> to vector<2x16xf32>
    %270 = vector.extract_strided_slice %268 {offsets = [0, 16], sizes = [2, 16], strides = [1, 1]} : vector<2x32xf32> to vector<2x16xf32>
    %271 = vector.extract_strided_slice %80 {offsets = [0, 32], sizes = [2, 16], strides = [1, 1]} : vector<2x48xf32> to vector<2x16xf32>
    %272 = vector.extract_strided_slice %258 {offsets = [0, 32], sizes = [2, 16], strides = [1, 1]} : vector<2x48xf32> to vector<2x16xf32>
    %273 = arith.mulf %269, %272 : vector<2x16xf32>
    %274 = arith.addf %271, %273 : vector<2x16xf32>
    %275 = math.tanh %274 : vector<2x16xf32>
    %cst_97 = arith.constant 1.000000e+00 : f32
    %276 = vector.broadcast %cst_97 : f32 to vector<2x16xf32>
    %277 = arith.subf %276, %270 : vector<2x16xf32>
    %278 = arith.mulf %277, %275 : vector<2x16xf32>
    %279 = arith.mulf %270, %255 : vector<2x16xf32>
    %280 = arith.addf %278, %279 : vector<2x16xf32>
    %cst_98 = arith.constant dense<0.000000e+00> : vector<2x48xf32>
    %281 = tpu.matmul %105, %24, %cst_98 {dimension_numbers = #tpu.dot_dimension_numbers<[1], [0], [0], [1], [0, 0, 1, 1], [], []>} : vector<2x16xf32>, vector<16x48xf32>, vector<2x48xf32> -> vector<2x48xf32>
    %282 = vector.broadcast %28 : vector<1x48xf32> to vector<2x48xf32>
    %283 = arith.addf %281, %282 : vector<2x48xf32>
    %cst_99 = arith.constant dense<0.000000e+00> : vector<2x48xf32>
    %284 = tpu.matmul %130, %24, %cst_99 {dimension_numbers = #tpu.dot_dimension_numbers<[1], [0], [0], [1], [0, 0, 1, 1], [], []>} : vector<2x16xf32>, vector<16x48xf32>, vector<2x48xf32> -> vector<2x48xf32>
    %285 = vector.broadcast %28 : vector<1x48xf32> to vector<2x48xf32>
    %286 = arith.addf %284, %285 : vector<2x48xf32>
    %cst_100 = arith.constant dense<0.000000e+00> : vector<2x48xf32>
    %287 = tpu.matmul %155, %24, %cst_100 {dimension_numbers = #tpu.dot_dimension_numbers<[1], [0], [0], [1], [0, 0, 1, 1], [], []>} : vector<2x16xf32>, vector<16x48xf32>, vector<2x48xf32> -> vector<2x48xf32>
    %288 = vector.broadcast %28 : vector<1x48xf32> to vector<2x48xf32>
    %289 = arith.addf %287, %288 : vector<2x48xf32>
    %cst_101 = arith.constant dense<0.000000e+00> : vector<2x48xf32>
    %290 = tpu.matmul %180, %24, %cst_101 {dimension_numbers = #tpu.dot_dimension_numbers<[1], [0], [0], [1], [0, 0, 1, 1], [], []>} : vector<2x16xf32>, vector<16x48xf32>, vector<2x48xf32> -> vector<2x48xf32>
    %291 = vector.broadcast %28 : vector<1x48xf32> to vector<2x48xf32>
    %292 = arith.addf %290, %291 : vector<2x48xf32>
    %cst_102 = arith.constant dense<0.000000e+00> : vector<2x48xf32>
    %293 = tpu.matmul %205, %24, %cst_102 {dimension_numbers = #tpu.dot_dimension_numbers<[1], [0], [0], [1], [0, 0, 1, 1], [], []>} : vector<2x16xf32>, vector<16x48xf32>, vector<2x48xf32> -> vector<2x48xf32>
    %294 = vector.broadcast %28 : vector<1x48xf32> to vector<2x48xf32>
    %295 = arith.addf %293, %294 : vector<2x48xf32>
    %cst_103 = arith.constant dense<0.000000e+00> : vector<2x48xf32>
    %296 = tpu.matmul %230, %24, %cst_103 {dimension_numbers = #tpu.dot_dimension_numbers<[1], [0], [0], [1], [0, 0, 1, 1], [], []>} : vector<2x16xf32>, vector<16x48xf32>, vector<2x48xf32> -> vector<2x48xf32>
    %297 = vector.broadcast %28 : vector<1x48xf32> to vector<2x48xf32>
    %298 = arith.addf %296, %297 : vector<2x48xf32>
    %cst_104 = arith.constant dense<0.000000e+00> : vector<2x48xf32>
    %299 = tpu.matmul %255, %24, %cst_104 {dimension_numbers = #tpu.dot_dimension_numbers<[1], [0], [0], [1], [0, 0, 1, 1], [], []>} : vector<2x16xf32>, vector<16x48xf32>, vector<2x48xf32> -> vector<2x48xf32>
    %300 = vector.broadcast %28 : vector<1x48xf32> to vector<2x48xf32>
    %301 = arith.addf %299, %300 : vector<2x48xf32>
    %cst_105 = arith.constant dense<0.000000e+00> : vector<2x48xf32>
    %302 = tpu.matmul %280, %24, %cst_105 {dimension_numbers = #tpu.dot_dimension_numbers<[1], [0], [0], [1], [0, 0, 1, 1], [], []>} : vector<2x16xf32>, vector<16x48xf32>, vector<2x48xf32> -> vector<2x48xf32>
    %303 = vector.broadcast %28 : vector<1x48xf32> to vector<2x48xf32>
    %304 = arith.addf %302, %303 : vector<2x48xf32>
    %cst_106 = arith.constant dense<0.000000e+00> : vector<2x48xf32>
    %305 = tpu.matmul %35, %26, %cst_106 {dimension_numbers = #tpu.dot_dimension_numbers<[1], [0], [0], [1], [0, 0, 1, 1], [], []>} : vector<2x16xf32>, vector<16x48xf32>, vector<2x48xf32> -> vector<2x48xf32>
    %306 = vector.broadcast %30 : vector<1x48xf32> to vector<2x48xf32>
    %307 = arith.addf %305, %306 : vector<2x48xf32>
    %308 = vector.extract_strided_slice %283 {offsets = [0, 0], sizes = [2, 32], strides = [1, 1]} : vector<2x48xf32> to vector<2x32xf32>
    %309 = vector.extract_strided_slice %307 {offsets = [0, 0], sizes = [2, 32], strides = [1, 1]} : vector<2x48xf32> to vector<2x32xf32>
    %310 = arith.addf %308, %309 : vector<2x32xf32>
    %cst_107 = arith.constant 5.000000e-01 : f32
    %311 = vector.broadcast %cst_107 : f32 to vector<2x32xf32>
    %312 = arith.mulf %311, %310 : vector<2x32xf32>
    %313 = math.tanh %312 : vector<2x32xf32>
    %cst_108 = arith.constant 1.000000e+00 : f32
    %314 = vector.broadcast %cst_108 : f32 to vector<2x32xf32>
    %315 = arith.addf %314, %313 : vector<2x32xf32>
    %cst_109 = arith.constant 5.000000e-01 : f32
    %316 = vector.broadcast %cst_109 : f32 to vector<2x32xf32>
    %317 = arith.mulf %316, %315 : vector<2x32xf32>
    %318 = vector.extract_strided_slice %317 {offsets = [0, 0], sizes = [2, 16], strides = [1, 1]} : vector<2x32xf32> to vector<2x16xf32>
    %319 = vector.extract_strided_slice %317 {offsets = [0, 16], sizes = [2, 16], strides = [1, 1]} : vector<2x32xf32> to vector<2x16xf32>
    %320 = vector.extract_strided_slice %283 {offsets = [0, 32], sizes = [2, 16], strides = [1, 1]} : vector<2x48xf32> to vector<2x16xf32>
    %321 = vector.extract_strided_slice %307 {offsets = [0, 32], sizes = [2, 16], strides = [1, 1]} : vector<2x48xf32> to vector<2x16xf32>
    %322 = arith.mulf %318, %321 : vector<2x16xf32>
    %323 = arith.addf %320, %322 : vector<2x16xf32>
    %324 = math.tanh %323 : vector<2x16xf32>
    %cst_110 = arith.constant 1.000000e+00 : f32
    %325 = vector.broadcast %cst_110 : f32 to vector<2x16xf32>
    %326 = arith.subf %325, %319 : vector<2x16xf32>
    %327 = arith.mulf %326, %324 : vector<2x16xf32>
    %328 = arith.mulf %319, %35 : vector<2x16xf32>
    %329 = arith.addf %327, %328 : vector<2x16xf32>
    %cst_111 = arith.constant dense<0.000000e+00> : vector<2x48xf32>
    %330 = tpu.matmul %329, %26, %cst_111 {dimension_numbers = #tpu.dot_dimension_numbers<[1], [0], [0], [1], [0, 0, 1, 1], [], []>} : vector<2x16xf32>, vector<16x48xf32>, vector<2x48xf32> -> vector<2x48xf32>
    %331 = vector.broadcast %30 : vector<1x48xf32> to vector<2x48xf32>
    %332 = arith.addf %330, %331 : vector<2x48xf32>
    %333 = vector.extract_strided_slice %286 {offsets = [0, 0], sizes = [2, 32], strides = [1, 1]} : vector<2x48xf32> to vector<2x32xf32>
    %334 = vector.extract_strided_slice %332 {offsets = [0, 0], sizes = [2, 32], strides = [1, 1]} : vector<2x48xf32> to vector<2x32xf32>
    %335 = arith.addf %333, %334 : vector<2x32xf32>
    %cst_112 = arith.constant 5.000000e-01 : f32
    %336 = vector.broadcast %cst_112 : f32 to vector<2x32xf32>
    %337 = arith.mulf %336, %335 : vector<2x32xf32>
    %338 = math.tanh %337 : vector<2x32xf32>
    %cst_113 = arith.constant 1.000000e+00 : f32
    %339 = vector.broadcast %cst_113 : f32 to vector<2x32xf32>
    %340 = arith.addf %339, %338 : vector<2x32xf32>
    %cst_114 = arith.constant 5.000000e-01 : f32
    %341 = vector.broadcast %cst_114 : f32 to vector<2x32xf32>
    %342 = arith.mulf %341, %340 : vector<2x32xf32>
    %343 = vector.extract_strided_slice %342 {offsets = [0, 0], sizes = [2, 16], strides = [1, 1]} : vector<2x32xf32> to vector<2x16xf32>
    %344 = vector.extract_strided_slice %342 {offsets = [0, 16], sizes = [2, 16], strides = [1, 1]} : vector<2x32xf32> to vector<2x16xf32>
    %345 = vector.extract_strided_slice %286 {offsets = [0, 32], sizes = [2, 16], strides = [1, 1]} : vector<2x48xf32> to vector<2x16xf32>
    %346 = vector.extract_strided_slice %332 {offsets = [0, 32], sizes = [2, 16], strides = [1, 1]} : vector<2x48xf32> to vector<2x16xf32>
    %347 = arith.mulf %343, %346 : vector<2x16xf32>
    %348 = arith.addf %345, %347 : vector<2x16xf32>
    %349 = math.tanh %348 : vector<2x16xf32>
    %cst_115 = arith.constant 1.000000e+00 : f32
    %350 = vector.broadcast %cst_115 : f32 to vector<2x16xf32>
    %351 = arith.subf %350, %344 : vector<2x16xf32>
    %352 = arith.mulf %351, %349 : vector<2x16xf32>
    %353 = arith.mulf %344, %329 : vector<2x16xf32>
    %354 = arith.addf %352, %353 : vector<2x16xf32>
    %cst_116 = arith.constant dense<0.000000e+00> : vector<2x48xf32>
    %355 = tpu.matmul %354, %26, %cst_116 {dimension_numbers = #tpu.dot_dimension_numbers<[1], [0], [0], [1], [0, 0, 1, 1], [], []>} : vector<2x16xf32>, vector<16x48xf32>, vector<2x48xf32> -> vector<2x48xf32>
    %356 = vector.broadcast %30 : vector<1x48xf32> to vector<2x48xf32>
    %357 = arith.addf %355, %356 : vector<2x48xf32>
    %358 = vector.extract_strided_slice %289 {offsets = [0, 0], sizes = [2, 32], strides = [1, 1]} : vector<2x48xf32> to vector<2x32xf32>
    %359 = vector.extract_strided_slice %357 {offsets = [0, 0], sizes = [2, 32], strides = [1, 1]} : vector<2x48xf32> to vector<2x32xf32>
    %360 = arith.addf %358, %359 : vector<2x32xf32>
    %cst_117 = arith.constant 5.000000e-01 : f32
    %361 = vector.broadcast %cst_117 : f32 to vector<2x32xf32>
    %362 = arith.mulf %361, %360 : vector<2x32xf32>
    %363 = math.tanh %362 : vector<2x32xf32>
    %cst_118 = arith.constant 1.000000e+00 : f32
    %364 = vector.broadcast %cst_118 : f32 to vector<2x32xf32>
    %365 = arith.addf %364, %363 : vector<2x32xf32>
    %cst_119 = arith.constant 5.000000e-01 : f32
    %366 = vector.broadcast %cst_119 : f32 to vector<2x32xf32>
    %367 = arith.mulf %366, %365 : vector<2x32xf32>
    %368 = vector.extract_strided_slice %367 {offsets = [0, 0], sizes = [2, 16], strides = [1, 1]} : vector<2x32xf32> to vector<2x16xf32>
    %369 = vector.extract_strided_slice %367 {offsets = [0, 16], sizes = [2, 16], strides = [1, 1]} : vector<2x32xf32> to vector<2x16xf32>
    %370 = vector.extract_strided_slice %289 {offsets = [0, 32], sizes = [2, 16], strides = [1, 1]} : vector<2x48xf32> to vector<2x16xf32>
    %371 = vector.extract_strided_slice %357 {offsets = [0, 32], sizes = [2, 16], strides = [1, 1]} : vector<2x48xf32> to vector<2x16xf32>
    %372 = arith.mulf %368, %371 : vector<2x16xf32>
    %373 = arith.addf %370, %372 : vector<2x16xf32>
    %374 = math.tanh %373 : vector<2x16xf32>
    %cst_120 = arith.constant 1.000000e+00 : f32
    %375 = vector.broadcast %cst_120 : f32 to vector<2x16xf32>
    %376 = arith.subf %375, %369 : vector<2x16xf32>
    %377 = arith.mulf %376, %374 : vector<2x16xf32>
    %378 = arith.mulf %369, %354 : vector<2x16xf32>
    %379 = arith.addf %377, %378 : vector<2x16xf32>
    %cst_121 = arith.constant dense<0.000000e+00> : vector<2x48xf32>
    %380 = tpu.matmul %379, %26, %cst_121 {dimension_numbers = #tpu.dot_dimension_numbers<[1], [0], [0], [1], [0, 0, 1, 1], [], []>} : vector<2x16xf32>, vector<16x48xf32>, vector<2x48xf32> -> vector<2x48xf32>
    %381 = vector.broadcast %30 : vector<1x48xf32> to vector<2x48xf32>
    %382 = arith.addf %380, %381 : vector<2x48xf32>
    %383 = vector.extract_strided_slice %292 {offsets = [0, 0], sizes = [2, 32], strides = [1, 1]} : vector<2x48xf32> to vector<2x32xf32>
    %384 = vector.extract_strided_slice %382 {offsets = [0, 0], sizes = [2, 32], strides = [1, 1]} : vector<2x48xf32> to vector<2x32xf32>
    %385 = arith.addf %383, %384 : vector<2x32xf32>
    %cst_122 = arith.constant 5.000000e-01 : f32
    %386 = vector.broadcast %cst_122 : f32 to vector<2x32xf32>
    %387 = arith.mulf %386, %385 : vector<2x32xf32>
    %388 = math.tanh %387 : vector<2x32xf32>
    %cst_123 = arith.constant 1.000000e+00 : f32
    %389 = vector.broadcast %cst_123 : f32 to vector<2x32xf32>
    %390 = arith.addf %389, %388 : vector<2x32xf32>
    %cst_124 = arith.constant 5.000000e-01 : f32
    %391 = vector.broadcast %cst_124 : f32 to vector<2x32xf32>
    %392 = arith.mulf %391, %390 : vector<2x32xf32>
    %393 = vector.extract_strided_slice %392 {offsets = [0, 0], sizes = [2, 16], strides = [1, 1]} : vector<2x32xf32> to vector<2x16xf32>
    %394 = vector.extract_strided_slice %392 {offsets = [0, 16], sizes = [2, 16], strides = [1, 1]} : vector<2x32xf32> to vector<2x16xf32>
    %395 = vector.extract_strided_slice %292 {offsets = [0, 32], sizes = [2, 16], strides = [1, 1]} : vector<2x48xf32> to vector<2x16xf32>
    %396 = vector.extract_strided_slice %382 {offsets = [0, 32], sizes = [2, 16], strides = [1, 1]} : vector<2x48xf32> to vector<2x16xf32>
    %397 = arith.mulf %393, %396 : vector<2x16xf32>
    %398 = arith.addf %395, %397 : vector<2x16xf32>
    %399 = math.tanh %398 : vector<2x16xf32>
    %cst_125 = arith.constant 1.000000e+00 : f32
    %400 = vector.broadcast %cst_125 : f32 to vector<2x16xf32>
    %401 = arith.subf %400, %394 : vector<2x16xf32>
    %402 = arith.mulf %401, %399 : vector<2x16xf32>
    %403 = arith.mulf %394, %379 : vector<2x16xf32>
    %404 = arith.addf %402, %403 : vector<2x16xf32>
    %cst_126 = arith.constant dense<0.000000e+00> : vector<2x48xf32>
    %405 = tpu.matmul %404, %26, %cst_126 {dimension_numbers = #tpu.dot_dimension_numbers<[1], [0], [0], [1], [0, 0, 1, 1], [], []>} : vector<2x16xf32>, vector<16x48xf32>, vector<2x48xf32> -> vector<2x48xf32>
    %406 = vector.broadcast %30 : vector<1x48xf32> to vector<2x48xf32>
    %407 = arith.addf %405, %406 : vector<2x48xf32>
    %408 = vector.extract_strided_slice %295 {offsets = [0, 0], sizes = [2, 32], strides = [1, 1]} : vector<2x48xf32> to vector<2x32xf32>
    %409 = vector.extract_strided_slice %407 {offsets = [0, 0], sizes = [2, 32], strides = [1, 1]} : vector<2x48xf32> to vector<2x32xf32>
    %410 = arith.addf %408, %409 : vector<2x32xf32>
    %cst_127 = arith.constant 5.000000e-01 : f32
    %411 = vector.broadcast %cst_127 : f32 to vector<2x32xf32>
    %412 = arith.mulf %411, %410 : vector<2x32xf32>
    %413 = math.tanh %412 : vector<2x32xf32>
    %cst_128 = arith.constant 1.000000e+00 : f32
    %414 = vector.broadcast %cst_128 : f32 to vector<2x32xf32>
    %415 = arith.addf %414, %413 : vector<2x32xf32>
    %cst_129 = arith.constant 5.000000e-01 : f32
    %416 = vector.broadcast %cst_129 : f32 to vector<2x32xf32>
    %417 = arith.mulf %416, %415 : vector<2x32xf32>
    %418 = vector.extract_strided_slice %417 {offsets = [0, 0], sizes = [2, 16], strides = [1, 1]} : vector<2x32xf32> to vector<2x16xf32>
    %419 = vector.extract_strided_slice %417 {offsets = [0, 16], sizes = [2, 16], strides = [1, 1]} : vector<2x32xf32> to vector<2x16xf32>
    %420 = vector.extract_strided_slice %295 {offsets = [0, 32], sizes = [2, 16], strides = [1, 1]} : vector<2x48xf32> to vector<2x16xf32>
    %421 = vector.extract_strided_slice %407 {offsets = [0, 32], sizes = [2, 16], strides = [1, 1]} : vector<2x48xf32> to vector<2x16xf32>
    %422 = arith.mulf %418, %421 : vector<2x16xf32>
    %423 = arith.addf %420, %422 : vector<2x16xf32>
    %424 = math.tanh %423 : vector<2x16xf32>
    %cst_130 = arith.constant 1.000000e+00 : f32
    %425 = vector.broadcast %cst_130 : f32 to vector<2x16xf32>
    %426 = arith.subf %425, %419 : vector<2x16xf32>
    %427 = arith.mulf %426, %424 : vector<2x16xf32>
    %428 = arith.mulf %419, %404 : vector<2x16xf32>
    %429 = arith.addf %427, %428 : vector<2x16xf32>
    %cst_131 = arith.constant dense<0.000000e+00> : vector<2x48xf32>
    %430 = tpu.matmul %429, %26, %cst_131 {dimension_numbers = #tpu.dot_dimension_numbers<[1], [0], [0], [1], [0, 0, 1, 1], [], []>} : vector<2x16xf32>, vector<16x48xf32>, vector<2x48xf32> -> vector<2x48xf32>
    %431 = vector.broadcast %30 : vector<1x48xf32> to vector<2x48xf32>
    %432 = arith.addf %430, %431 : vector<2x48xf32>
    %433 = vector.extract_strided_slice %298 {offsets = [0, 0], sizes = [2, 32], strides = [1, 1]} : vector<2x48xf32> to vector<2x32xf32>
    %434 = vector.extract_strided_slice %432 {offsets = [0, 0], sizes = [2, 32], strides = [1, 1]} : vector<2x48xf32> to vector<2x32xf32>
    %435 = arith.addf %433, %434 : vector<2x32xf32>
    %cst_132 = arith.constant 5.000000e-01 : f32
    %436 = vector.broadcast %cst_132 : f32 to vector<2x32xf32>
    %437 = arith.mulf %436, %435 : vector<2x32xf32>
    %438 = math.tanh %437 : vector<2x32xf32>
    %cst_133 = arith.constant 1.000000e+00 : f32
    %439 = vector.broadcast %cst_133 : f32 to vector<2x32xf32>
    %440 = arith.addf %439, %438 : vector<2x32xf32>
    %cst_134 = arith.constant 5.000000e-01 : f32
    %441 = vector.broadcast %cst_134 : f32 to vector<2x32xf32>
    %442 = arith.mulf %441, %440 : vector<2x32xf32>
    %443 = vector.extract_strided_slice %442 {offsets = [0, 0], sizes = [2, 16], strides = [1, 1]} : vector<2x32xf32> to vector<2x16xf32>
    %444 = vector.extract_strided_slice %442 {offsets = [0, 16], sizes = [2, 16], strides = [1, 1]} : vector<2x32xf32> to vector<2x16xf32>
    %445 = vector.extract_strided_slice %298 {offsets = [0, 32], sizes = [2, 16], strides = [1, 1]} : vector<2x48xf32> to vector<2x16xf32>
    %446 = vector.extract_strided_slice %432 {offsets = [0, 32], sizes = [2, 16], strides = [1, 1]} : vector<2x48xf32> to vector<2x16xf32>
    %447 = arith.mulf %443, %446 : vector<2x16xf32>
    %448 = arith.addf %445, %447 : vector<2x16xf32>
    %449 = math.tanh %448 : vector<2x16xf32>
    %cst_135 = arith.constant 1.000000e+00 : f32
    %450 = vector.broadcast %cst_135 : f32 to vector<2x16xf32>
    %451 = arith.subf %450, %444 : vector<2x16xf32>
    %452 = arith.mulf %451, %449 : vector<2x16xf32>
    %453 = arith.mulf %444, %429 : vector<2x16xf32>
    %454 = arith.addf %452, %453 : vector<2x16xf32>
    %cst_136 = arith.constant dense<0.000000e+00> : vector<2x48xf32>
    %455 = tpu.matmul %454, %26, %cst_136 {dimension_numbers = #tpu.dot_dimension_numbers<[1], [0], [0], [1], [0, 0, 1, 1], [], []>} : vector<2x16xf32>, vector<16x48xf32>, vector<2x48xf32> -> vector<2x48xf32>
    %456 = vector.broadcast %30 : vector<1x48xf32> to vector<2x48xf32>
    %457 = arith.addf %455, %456 : vector<2x48xf32>
    %458 = vector.extract_strided_slice %301 {offsets = [0, 0], sizes = [2, 32], strides = [1, 1]} : vector<2x48xf32> to vector<2x32xf32>
    %459 = vector.extract_strided_slice %457 {offsets = [0, 0], sizes = [2, 32], strides = [1, 1]} : vector<2x48xf32> to vector<2x32xf32>
    %460 = arith.addf %458, %459 : vector<2x32xf32>
    %cst_137 = arith.constant 5.000000e-01 : f32
    %461 = vector.broadcast %cst_137 : f32 to vector<2x32xf32>
    %462 = arith.mulf %461, %460 : vector<2x32xf32>
    %463 = math.tanh %462 : vector<2x32xf32>
    %cst_138 = arith.constant 1.000000e+00 : f32
    %464 = vector.broadcast %cst_138 : f32 to vector<2x32xf32>
    %465 = arith.addf %464, %463 : vector<2x32xf32>
    %cst_139 = arith.constant 5.000000e-01 : f32
    %466 = vector.broadcast %cst_139 : f32 to vector<2x32xf32>
    %467 = arith.mulf %466, %465 : vector<2x32xf32>
    %468 = vector.extract_strided_slice %467 {offsets = [0, 0], sizes = [2, 16], strides = [1, 1]} : vector<2x32xf32> to vector<2x16xf32>
    %469 = vector.extract_strided_slice %467 {offsets = [0, 16], sizes = [2, 16], strides = [1, 1]} : vector<2x32xf32> to vector<2x16xf32>
    %470 = vector.extract_strided_slice %301 {offsets = [0, 32], sizes = [2, 16], strides = [1, 1]} : vector<2x48xf32> to vector<2x16xf32>
    %471 = vector.extract_strided_slice %457 {offsets = [0, 32], sizes = [2, 16], strides = [1, 1]} : vector<2x48xf32> to vector<2x16xf32>
    %472 = arith.mulf %468, %471 : vector<2x16xf32>
    %473 = arith.addf %470, %472 : vector<2x16xf32>
    %474 = math.tanh %473 : vector<2x16xf32>
    %cst_140 = arith.constant 1.000000e+00 : f32
    %475 = vector.broadcast %cst_140 : f32 to vector<2x16xf32>
    %476 = arith.subf %475, %469 : vector<2x16xf32>
    %477 = arith.mulf %476, %474 : vector<2x16xf32>
    %478 = arith.mulf %469, %454 : vector<2x16xf32>
    %479 = arith.addf %477, %478 : vector<2x16xf32>
    %cst_141 = arith.constant dense<0.000000e+00> : vector<2x48xf32>
    %480 = tpu.matmul %479, %26, %cst_141 {dimension_numbers = #tpu.dot_dimension_numbers<[1], [0], [0], [1], [0, 0, 1, 1], [], []>} : vector<2x16xf32>, vector<16x48xf32>, vector<2x48xf32> -> vector<2x48xf32>
    %481 = vector.broadcast %30 : vector<1x48xf32> to vector<2x48xf32>
    %482 = arith.addf %480, %481 : vector<2x48xf32>
    %483 = vector.extract_strided_slice %304 {offsets = [0, 0], sizes = [2, 32], strides = [1, 1]} : vector<2x48xf32> to vector<2x32xf32>
    %484 = vector.extract_strided_slice %482 {offsets = [0, 0], sizes = [2, 32], strides = [1, 1]} : vector<2x48xf32> to vector<2x32xf32>
    %485 = arith.addf %483, %484 : vector<2x32xf32>
    %cst_142 = arith.constant 5.000000e-01 : f32
    %486 = vector.broadcast %cst_142 : f32 to vector<2x32xf32>
    %487 = arith.mulf %486, %485 : vector<2x32xf32>
    %488 = math.tanh %487 : vector<2x32xf32>
    %cst_143 = arith.constant 1.000000e+00 : f32
    %489 = vector.broadcast %cst_143 : f32 to vector<2x32xf32>
    %490 = arith.addf %489, %488 : vector<2x32xf32>
    %cst_144 = arith.constant 5.000000e-01 : f32
    %491 = vector.broadcast %cst_144 : f32 to vector<2x32xf32>
    %492 = arith.mulf %491, %490 : vector<2x32xf32>
    %493 = vector.extract_strided_slice %492 {offsets = [0, 0], sizes = [2, 16], strides = [1, 1]} : vector<2x32xf32> to vector<2x16xf32>
    %494 = vector.extract_strided_slice %492 {offsets = [0, 16], sizes = [2, 16], strides = [1, 1]} : vector<2x32xf32> to vector<2x16xf32>
    %495 = vector.extract_strided_slice %304 {offsets = [0, 32], sizes = [2, 16], strides = [1, 1]} : vector<2x48xf32> to vector<2x16xf32>
    %496 = vector.extract_strided_slice %482 {offsets = [0, 32], sizes = [2, 16], strides = [1, 1]} : vector<2x48xf32> to vector<2x16xf32>
    %497 = arith.mulf %493, %496 : vector<2x16xf32>
    %498 = arith.addf %495, %497 : vector<2x16xf32>
    %499 = math.tanh %498 : vector<2x16xf32>
    %cst_145 = arith.constant 1.000000e+00 : f32
    %500 = vector.broadcast %cst_145 : f32 to vector<2x16xf32>
    %501 = arith.subf %500, %494 : vector<2x16xf32>
    %502 = arith.mulf %501, %499 : vector<2x16xf32>
    %503 = arith.mulf %494, %479 : vector<2x16xf32>
    %504 = arith.addf %502, %503 : vector<2x16xf32>
    %cst_146 = arith.constant dense<0.000000e+00> : vector<2x5xf32>
    %505 = tpu.matmul %329, %12, %cst_146 {dimension_numbers = #tpu.dot_dimension_numbers<[1], [0], [0], [1], [0, 0, 1, 1], [], []>} : vector<2x16xf32>, vector<16x5xf32>, vector<2x5xf32> -> vector<2x5xf32>
    %506 = vector.broadcast %14 : vector<1x5xf32> to vector<2x5xf32>
    %507 = arith.addf %505, %506 : vector<2x5xf32>
    %508 = vector.extract_strided_slice %507 {offsets = [0, 0], sizes = [2, 4], strides = [1, 1]} : vector<2x5xf32> to vector<2x4xf32>
    %cst_147 = arith.constant 8.800000e+01 : f32
    %509 = vector.broadcast %cst_147 : f32 to vector<2x4xf32>
    %510 = arith.minimumf %508, %509 : vector<2x4xf32>
    %cst_148 = arith.constant dense<0xFF800000> : vector<2xf32>
    %511 = vector.multi_reduction <maximumf>, %510, %cst_148 [1] : vector<2x4xf32> to vector<2xf32>
    %512 = vector.shape_cast %511 : vector<2xf32> to vector<2x1xf32>
    %513 = vector.broadcast %512 : vector<2x1xf32> to vector<2x4xf32>
    %514 = arith.subf %510, %513 : vector<2x4xf32>
    %515 = math.exp %514 : vector<2x4xf32>
    %cst_149 = arith.constant dense<0.000000e+00> : vector<2xf32>
    %516 = vector.multi_reduction <add>, %515, %cst_149 [1] : vector<2x4xf32> to vector<2xf32>
    %517 = vector.shape_cast %516 : vector<2xf32> to vector<2x1xf32>
    %518 = vector.broadcast %517 : vector<2x1xf32> to vector<2x4xf32>
    %519 = arith.divf %515, %518 : vector<2x4xf32>
    %520 = vector.extract_strided_slice %507 {offsets = [0, 4], sizes = [2, 1], strides = [1, 1]} : vector<2x5xf32> to vector<2x1xf32>
    %cst_150 = arith.constant 5.000000e-01 : f32
    %521 = vector.broadcast %cst_150 : f32 to vector<2x1xf32>
    %522 = arith.mulf %521, %520 : vector<2x1xf32>
    %523 = math.tanh %522 : vector<2x1xf32>
    %cst_151 = arith.constant 1.000000e+00 : f32
    %524 = vector.broadcast %cst_151 : f32 to vector<2x1xf32>
    %525 = arith.addf %524, %523 : vector<2x1xf32>
    %cst_152 = arith.constant 5.000000e-01 : f32
    %526 = vector.broadcast %cst_152 : f32 to vector<2x1xf32>
    %527 = arith.mulf %526, %525 : vector<2x1xf32>
    %c0_153 = arith.constant 0 : index
    %c0_154 = arith.constant 0 : index
    %528 = vector.load %arg23[%c0_153, %c0_154] : memref<16x4xf32, #tpu.memory_space<vmem>>, vector<2x4xf32>
    %cst_155 = arith.constant 1.000000e+00 : f32
    %529 = vector.broadcast %cst_155 : f32 to vector<2x1xf32>
    %530 = arith.subf %529, %527 : vector<2x1xf32>
    %531 = vector.broadcast %530 : vector<2x1xf32> to vector<2x4xf32>
    %532 = arith.mulf %519, %531 : vector<2x4xf32>
    %533 = vector.broadcast %527 : vector<2x1xf32> to vector<2x4xf32>
    %534 = arith.mulf %528, %533 : vector<2x4xf32>
    %535 = arith.addf %532, %534 : vector<2x4xf32>
    %c0_156 = arith.constant 0 : index
    %c0_157 = arith.constant 0 : index
    %536 = vector.load %arg23[%c0_156, %c0_157] : memref<16x4xf32, #tpu.memory_space<vmem>>, vector<2x4xf32>
    tpu.vector_store %arg23[%c0_156, %c0_157], %535 {strides = array<i32>} : memref<16x4xf32, #tpu.memory_space<vmem>>, vector<2x4xf32>,
    %cst_158 = arith.constant dense<0.000000e+00> : vector<2x5xf32>
    %537 = tpu.matmul %354, %12, %cst_158 {dimension_numbers = #tpu.dot_dimension_numbers<[1], [0], [0], [1], [0, 0, 1, 1], [], []>} : vector<2x16xf32>, vector<16x5xf32>, vector<2x5xf32> -> vector<2x5xf32>
    %538 = vector.broadcast %14 : vector<1x5xf32> to vector<2x5xf32>
    %539 = arith.addf %537, %538 : vector<2x5xf32>
    %540 = vector.extract_strided_slice %539 {offsets = [0, 0], sizes = [2, 4], strides = [1, 1]} : vector<2x5xf32> to vector<2x4xf32>
    %cst_159 = arith.constant 8.800000e+01 : f32
    %541 = vector.broadcast %cst_159 : f32 to vector<2x4xf32>
    %542 = arith.minimumf %540, %541 : vector<2x4xf32>
    %cst_160 = arith.constant dense<0xFF800000> : vector<2xf32>
    %543 = vector.multi_reduction <maximumf>, %542, %cst_160 [1] : vector<2x4xf32> to vector<2xf32>
    %544 = vector.shape_cast %543 : vector<2xf32> to vector<2x1xf32>
    %545 = vector.broadcast %544 : vector<2x1xf32> to vector<2x4xf32>
    %546 = arith.subf %542, %545 : vector<2x4xf32>
    %547 = math.exp %546 : vector<2x4xf32>
    %cst_161 = arith.constant dense<0.000000e+00> : vector<2xf32>
    %548 = vector.multi_reduction <add>, %547, %cst_161 [1] : vector<2x4xf32> to vector<2xf32>
    %549 = vector.shape_cast %548 : vector<2xf32> to vector<2x1xf32>
    %550 = vector.broadcast %549 : vector<2x1xf32> to vector<2x4xf32>
    %551 = arith.divf %547, %550 : vector<2x4xf32>
    %552 = vector.extract_strided_slice %539 {offsets = [0, 4], sizes = [2, 1], strides = [1, 1]} : vector<2x5xf32> to vector<2x1xf32>
    %cst_162 = arith.constant 5.000000e-01 : f32
    %553 = vector.broadcast %cst_162 : f32 to vector<2x1xf32>
    %554 = arith.mulf %553, %552 : vector<2x1xf32>
    %555 = math.tanh %554 : vector<2x1xf32>
    %cst_163 = arith.constant 1.000000e+00 : f32
    %556 = vector.broadcast %cst_163 : f32 to vector<2x1xf32>
    %557 = arith.addf %556, %555 : vector<2x1xf32>
    %cst_164 = arith.constant 5.000000e-01 : f32
    %558 = vector.broadcast %cst_164 : f32 to vector<2x1xf32>
    %559 = arith.mulf %558, %557 : vector<2x1xf32>
    %c2 = arith.constant 2 : index
    %c0_165 = arith.constant 0 : index
    %560 = vector.load %arg23[%c2, %c0_165] : memref<16x4xf32, #tpu.memory_space<vmem>>, vector<2x4xf32>
    %cst_166 = arith.constant 1.000000e+00 : f32
    %561 = vector.broadcast %cst_166 : f32 to vector<2x1xf32>
    %562 = arith.subf %561, %559 : vector<2x1xf32>
    %563 = vector.broadcast %562 : vector<2x1xf32> to vector<2x4xf32>
    %564 = arith.mulf %551, %563 : vector<2x4xf32>
    %565 = vector.broadcast %559 : vector<2x1xf32> to vector<2x4xf32>
    %566 = arith.mulf %560, %565 : vector<2x4xf32>
    %567 = arith.addf %564, %566 : vector<2x4xf32>
    %c2_167 = arith.constant 2 : index
    %c0_168 = arith.constant 0 : index
    %568 = vector.load %arg23[%c2_167, %c0_168] : memref<16x4xf32, #tpu.memory_space<vmem>>, vector<2x4xf32>
    tpu.vector_store %arg23[%c2_167, %c0_168], %567 {strides = array<i32>} : memref<16x4xf32, #tpu.memory_space<vmem>>, vector<2x4xf32>,
    %cst_169 = arith.constant dense<0.000000e+00> : vector<2x5xf32>
    %569 = tpu.matmul %379, %12, %cst_169 {dimension_numbers = #tpu.dot_dimension_numbers<[1], [0], [0], [1], [0, 0, 1, 1], [], []>} : vector<2x16xf32>, vector<16x5xf32>, vector<2x5xf32> -> vector<2x5xf32>
    %570 = vector.broadcast %14 : vector<1x5xf32> to vector<2x5xf32>
    %571 = arith.addf %569, %570 : vector<2x5xf32>
    %572 = vector.extract_strided_slice %571 {offsets = [0, 0], sizes = [2, 4], strides = [1, 1]} : vector<2x5xf32> to vector<2x4xf32>
    %cst_170 = arith.constant 8.800000e+01 : f32
    %573 = vector.broadcast %cst_170 : f32 to vector<2x4xf32>
    %574 = arith.minimumf %572, %573 : vector<2x4xf32>
    %cst_171 = arith.constant dense<0xFF800000> : vector<2xf32>
    %575 = vector.multi_reduction <maximumf>, %574, %cst_171 [1] : vector<2x4xf32> to vector<2xf32>
    %576 = vector.shape_cast %575 : vector<2xf32> to vector<2x1xf32>
    %577 = vector.broadcast %576 : vector<2x1xf32> to vector<2x4xf32>
    %578 = arith.subf %574, %577 : vector<2x4xf32>
    %579 = math.exp %578 : vector<2x4xf32>
    %cst_172 = arith.constant dense<0.000000e+00> : vector<2xf32>
    %580 = vector.multi_reduction <add>, %579, %cst_172 [1] : vector<2x4xf32> to vector<2xf32>
    %581 = vector.shape_cast %580 : vector<2xf32> to vector<2x1xf32>
    %582 = vector.broadcast %581 : vector<2x1xf32> to vector<2x4xf32>
    %583 = arith.divf %579, %582 : vector<2x4xf32>
    %584 = vector.extract_strided_slice %571 {offsets = [0, 4], sizes = [2, 1], strides = [1, 1]} : vector<2x5xf32> to vector<2x1xf32>
    %cst_173 = arith.constant 5.000000e-01 : f32
    %585 = vector.broadcast %cst_173 : f32 to vector<2x1xf32>
    %586 = arith.mulf %585, %584 : vector<2x1xf32>
    %587 = math.tanh %586 : vector<2x1xf32>
    %cst_174 = arith.constant 1.000000e+00 : f32
    %588 = vector.broadcast %cst_174 : f32 to vector<2x1xf32>
    %589 = arith.addf %588, %587 : vector<2x1xf32>
    %cst_175 = arith.constant 5.000000e-01 : f32
    %590 = vector.broadcast %cst_175 : f32 to vector<2x1xf32>
    %591 = arith.mulf %590, %589 : vector<2x1xf32>
    %c4 = arith.constant 4 : index
    %c0_176 = arith.constant 0 : index
    %592 = vector.load %arg23[%c4, %c0_176] : memref<16x4xf32, #tpu.memory_space<vmem>>, vector<2x4xf32>
    %cst_177 = arith.constant 1.000000e+00 : f32
    %593 = vector.broadcast %cst_177 : f32 to vector<2x1xf32>
    %594 = arith.subf %593, %591 : vector<2x1xf32>
    %595 = vector.broadcast %594 : vector<2x1xf32> to vector<2x4xf32>
    %596 = arith.mulf %583, %595 : vector<2x4xf32>
    %597 = vector.broadcast %591 : vector<2x1xf32> to vector<2x4xf32>
    %598 = arith.mulf %592, %597 : vector<2x4xf32>
    %599 = arith.addf %596, %598 : vector<2x4xf32>
    %c4_178 = arith.constant 4 : index
    %c0_179 = arith.constant 0 : index
    %600 = vector.load %arg23[%c4_178, %c0_179] : memref<16x4xf32, #tpu.memory_space<vmem>>, vector<2x4xf32>
    tpu.vector_store %arg23[%c4_178, %c0_179], %599 {strides = array<i32>} : memref<16x4xf32, #tpu.memory_space<vmem>>, vector<2x4xf32>,
    %cst_180 = arith.constant dense<0.000000e+00> : vector<2x5xf32>
    %601 = tpu.matmul %404, %12, %cst_180 {dimension_numbers = #tpu.dot_dimension_numbers<[1], [0], [0], [1], [0, 0, 1, 1], [], []>} : vector<2x16xf32>, vector<16x5xf32>, vector<2x5xf32> -> vector<2x5xf32>
    %602 = vector.broadcast %14 : vector<1x5xf32> to vector<2x5xf32>
    %603 = arith.addf %601, %602 : vector<2x5xf32>
    %604 = vector.extract_strided_slice %603 {offsets = [0, 0], sizes = [2, 4], strides = [1, 1]} : vector<2x5xf32> to vector<2x4xf32>
    %cst_181 = arith.constant 8.800000e+01 : f32
    %605 = vector.broadcast %cst_181 : f32 to vector<2x4xf32>
    %606 = arith.minimumf %604, %605 : vector<2x4xf32>
    %cst_182 = arith.constant dense<0xFF800000> : vector<2xf32>
    %607 = vector.multi_reduction <maximumf>, %606, %cst_182 [1] : vector<2x4xf32> to vector<2xf32>
    %608 = vector.shape_cast %607 : vector<2xf32> to vector<2x1xf32>
    %609 = vector.broadcast %608 : vector<2x1xf32> to vector<2x4xf32>
    %610 = arith.subf %606, %609 : vector<2x4xf32>
    %611 = math.exp %610 : vector<2x4xf32>
    %cst_183 = arith.constant dense<0.000000e+00> : vector<2xf32>
    %612 = vector.multi_reduction <add>, %611, %cst_183 [1] : vector<2x4xf32> to vector<2xf32>
    %613 = vector.shape_cast %612 : vector<2xf32> to vector<2x1xf32>
    %614 = vector.broadcast %613 : vector<2x1xf32> to vector<2x4xf32>
    %615 = arith.divf %611, %614 : vector<2x4xf32>
    %616 = vector.extract_strided_slice %603 {offsets = [0, 4], sizes = [2, 1], strides = [1, 1]} : vector<2x5xf32> to vector<2x1xf32>
    %cst_184 = arith.constant 5.000000e-01 : f32
    %617 = vector.broadcast %cst_184 : f32 to vector<2x1xf32>
    %618 = arith.mulf %617, %616 : vector<2x1xf32>
    %619 = math.tanh %618 : vector<2x1xf32>
    %cst_185 = arith.constant 1.000000e+00 : f32
    %620 = vector.broadcast %cst_185 : f32 to vector<2x1xf32>
    %621 = arith.addf %620, %619 : vector<2x1xf32>
    %cst_186 = arith.constant 5.000000e-01 : f32
    %622 = vector.broadcast %cst_186 : f32 to vector<2x1xf32>
    %623 = arith.mulf %622, %621 : vector<2x1xf32>
    %c6 = arith.constant 6 : index
    %c0_187 = arith.constant 0 : index
    %624 = vector.load %arg23[%c6, %c0_187] : memref<16x4xf32, #tpu.memory_space<vmem>>, vector<2x4xf32>
    %cst_188 = arith.constant 1.000000e+00 : f32
    %625 = vector.broadcast %cst_188 : f32 to vector<2x1xf32>
    %626 = arith.subf %625, %623 : vector<2x1xf32>
    %627 = vector.broadcast %626 : vector<2x1xf32> to vector<2x4xf32>
    %628 = arith.mulf %615, %627 : vector<2x4xf32>
    %629 = vector.broadcast %623 : vector<2x1xf32> to vector<2x4xf32>
    %630 = arith.mulf %624, %629 : vector<2x4xf32>
    %631 = arith.addf %628, %630 : vector<2x4xf32>
    %c6_189 = arith.constant 6 : index
    %c0_190 = arith.constant 0 : index
    %632 = vector.load %arg23[%c6_189, %c0_190] : memref<16x4xf32, #tpu.memory_space<vmem>>, vector<2x4xf32>
    tpu.vector_store %arg23[%c6_189, %c0_190], %631 {strides = array<i32>} : memref<16x4xf32, #tpu.memory_space<vmem>>, vector<2x4xf32>,
    %cst_191 = arith.constant dense<0.000000e+00> : vector<2x5xf32>
    %633 = tpu.matmul %429, %12, %cst_191 {dimension_numbers = #tpu.dot_dimension_numbers<[1], [0], [0], [1], [0, 0, 1, 1], [], []>} : vector<2x16xf32>, vector<16x5xf32>, vector<2x5xf32> -> vector<2x5xf32>
    %634 = vector.broadcast %14 : vector<1x5xf32> to vector<2x5xf32>
    %635 = arith.addf %633, %634 : vector<2x5xf32>
    %636 = vector.extract_strided_slice %635 {offsets = [0, 0], sizes = [2, 4], strides = [1, 1]} : vector<2x5xf32> to vector<2x4xf32>
    %cst_192 = arith.constant 8.800000e+01 : f32
    %637 = vector.broadcast %cst_192 : f32 to vector<2x4xf32>
    %638 = arith.minimumf %636, %637 : vector<2x4xf32>
    %cst_193 = arith.constant dense<0xFF800000> : vector<2xf32>
    %639 = vector.multi_reduction <maximumf>, %638, %cst_193 [1] : vector<2x4xf32> to vector<2xf32>
    %640 = vector.shape_cast %639 : vector<2xf32> to vector<2x1xf32>
    %641 = vector.broadcast %640 : vector<2x1xf32> to vector<2x4xf32>
    %642 = arith.subf %638, %641 : vector<2x4xf32>
    %643 = math.exp %642 : vector<2x4xf32>
    %cst_194 = arith.constant dense<0.000000e+00> : vector<2xf32>
    %644 = vector.multi_reduction <add>, %643, %cst_194 [1] : vector<2x4xf32> to vector<2xf32>
    %645 = vector.shape_cast %644 : vector<2xf32> to vector<2x1xf32>
    %646 = vector.broadcast %645 : vector<2x1xf32> to vector<2x4xf32>
    %647 = arith.divf %643, %646 : vector<2x4xf32>
    %648 = vector.extract_strided_slice %635 {offsets = [0, 4], sizes = [2, 1], strides = [1, 1]} : vector<2x5xf32> to vector<2x1xf32>
    %cst_195 = arith.constant 5.000000e-01 : f32
    %649 = vector.broadcast %cst_195 : f32 to vector<2x1xf32>
    %650 = arith.mulf %649, %648 : vector<2x1xf32>
    %651 = math.tanh %650 : vector<2x1xf32>
    %cst_196 = arith.constant 1.000000e+00 : f32
    %652 = vector.broadcast %cst_196 : f32 to vector<2x1xf32>
    %653 = arith.addf %652, %651 : vector<2x1xf32>
    %cst_197 = arith.constant 5.000000e-01 : f32
    %654 = vector.broadcast %cst_197 : f32 to vector<2x1xf32>
    %655 = arith.mulf %654, %653 : vector<2x1xf32>
    %c8 = arith.constant 8 : index
    %c0_198 = arith.constant 0 : index
    %656 = vector.load %arg23[%c8, %c0_198] : memref<16x4xf32, #tpu.memory_space<vmem>>, vector<2x4xf32>
    %cst_199 = arith.constant 1.000000e+00 : f32
    %657 = vector.broadcast %cst_199 : f32 to vector<2x1xf32>
    %658 = arith.subf %657, %655 : vector<2x1xf32>
    %659 = vector.broadcast %658 : vector<2x1xf32> to vector<2x4xf32>
    %660 = arith.mulf %647, %659 : vector<2x4xf32>
    %661 = vector.broadcast %655 : vector<2x1xf32> to vector<2x4xf32>
    %662 = arith.mulf %656, %661 : vector<2x4xf32>
    %663 = arith.addf %660, %662 : vector<2x4xf32>
    %c8_200 = arith.constant 8 : index
    %c0_201 = arith.constant 0 : index
    %664 = vector.load %arg23[%c8_200, %c0_201] : memref<16x4xf32, #tpu.memory_space<vmem>>, vector<2x4xf32>
    tpu.vector_store %arg23[%c8_200, %c0_201], %663 {strides = array<i32>} : memref<16x4xf32, #tpu.memory_space<vmem>>, vector<2x4xf32>,
    %cst_202 = arith.constant dense<0.000000e+00> : vector<2x5xf32>
    %665 = tpu.matmul %454, %12, %cst_202 {dimension_numbers = #tpu.dot_dimension_numbers<[1], [0], [0], [1], [0, 0, 1, 1], [], []>} : vector<2x16xf32>, vector<16x5xf32>, vector<2x5xf32> -> vector<2x5xf32>
    %666 = vector.broadcast %14 : vector<1x5xf32> to vector<2x5xf32>
    %667 = arith.addf %665, %666 : vector<2x5xf32>
    %668 = vector.extract_strided_slice %667 {offsets = [0, 0], sizes = [2, 4], strides = [1, 1]} : vector<2x5xf32> to vector<2x4xf32>
    %cst_203 = arith.constant 8.800000e+01 : f32
    %669 = vector.broadcast %cst_203 : f32 to vector<2x4xf32>
    %670 = arith.minimumf %668, %669 : vector<2x4xf32>
    %cst_204 = arith.constant dense<0xFF800000> : vector<2xf32>
    %671 = vector.multi_reduction <maximumf>, %670, %cst_204 [1] : vector<2x4xf32> to vector<2xf32>
    %672 = vector.shape_cast %671 : vector<2xf32> to vector<2x1xf32>
    %673 = vector.broadcast %672 : vector<2x1xf32> to vector<2x4xf32>
    %674 = arith.subf %670, %673 : vector<2x4xf32>
    %675 = math.exp %674 : vector<2x4xf32>
    %cst_205 = arith.constant dense<0.000000e+00> : vector<2xf32>
    %676 = vector.multi_reduction <add>, %675, %cst_205 [1] : vector<2x4xf32> to vector<2xf32>
    %677 = vector.shape_cast %676 : vector<2xf32> to vector<2x1xf32>
    %678 = vector.broadcast %677 : vector<2x1xf32> to vector<2x4xf32>
    %679 = arith.divf %675, %678 : vector<2x4xf32>
    %680 = vector.extract_strided_slice %667 {offsets = [0, 4], sizes = [2, 1], strides = [1, 1]} : vector<2x5xf32> to vector<2x1xf32>
    %cst_206 = arith.constant 5.000000e-01 : f32
    %681 = vector.broadcast %cst_206 : f32 to vector<2x1xf32>
    %682 = arith.mulf %681, %680 : vector<2x1xf32>
    %683 = math.tanh %682 : vector<2x1xf32>
    %cst_207 = arith.constant 1.000000e+00 : f32
    %684 = vector.broadcast %cst_207 : f32 to vector<2x1xf32>
    %685 = arith.addf %684, %683 : vector<2x1xf32>
    %cst_208 = arith.constant 5.000000e-01 : f32
    %686 = vector.broadcast %cst_208 : f32 to vector<2x1xf32>
    %687 = arith.mulf %686, %685 : vector<2x1xf32>
    %c10 = arith.constant 10 : index
    %c0_209 = arith.constant 0 : index
    %688 = vector.load %arg23[%c10, %c0_209] : memref<16x4xf32, #tpu.memory_space<vmem>>, vector<2x4xf32>
    %cst_210 = arith.constant 1.000000e+00 : f32
    %689 = vector.broadcast %cst_210 : f32 to vector<2x1xf32>
    %690 = arith.subf %689, %687 : vector<2x1xf32>
    %691 = vector.broadcast %690 : vector<2x1xf32> to vector<2x4xf32>
    %692 = arith.mulf %679, %691 : vector<2x4xf32>
    %693 = vector.broadcast %687 : vector<2x1xf32> to vector<2x4xf32>
    %694 = arith.mulf %688, %693 : vector<2x4xf32>
    %695 = arith.addf %692, %694 : vector<2x4xf32>
    %c10_211 = arith.constant 10 : index
    %c0_212 = arith.constant 0 : index
    %696 = vector.load %arg23[%c10_211, %c0_212] : memref<16x4xf32, #tpu.memory_space<vmem>>, vector<2x4xf32>
    tpu.vector_store %arg23[%c10_211, %c0_212], %695 {strides = array<i32>} : memref<16x4xf32, #tpu.memory_space<vmem>>, vector<2x4xf32>,
    %cst_213 = arith.constant dense<0.000000e+00> : vector<2x5xf32>
    %697 = tpu.matmul %479, %12, %cst_213 {dimension_numbers = #tpu.dot_dimension_numbers<[1], [0], [0], [1], [0, 0, 1, 1], [], []>} : vector<2x16xf32>, vector<16x5xf32>, vector<2x5xf32> -> vector<2x5xf32>
    %698 = vector.broadcast %14 : vector<1x5xf32> to vector<2x5xf32>
    %699 = arith.addf %697, %698 : vector<2x5xf32>
    %700 = vector.extract_strided_slice %699 {offsets = [0, 0], sizes = [2, 4], strides = [1, 1]} : vector<2x5xf32> to vector<2x4xf32>
    %cst_214 = arith.constant 8.800000e+01 : f32
    %701 = vector.broadcast %cst_214 : f32 to vector<2x4xf32>
    %702 = arith.minimumf %700, %701 : vector<2x4xf32>
    %cst_215 = arith.constant dense<0xFF800000> : vector<2xf32>
    %703 = vector.multi_reduction <maximumf>, %702, %cst_215 [1] : vector<2x4xf32> to vector<2xf32>
    %704 = vector.shape_cast %703 : vector<2xf32> to vector<2x1xf32>
    %705 = vector.broadcast %704 : vector<2x1xf32> to vector<2x4xf32>
    %706 = arith.subf %702, %705 : vector<2x4xf32>
    %707 = math.exp %706 : vector<2x4xf32>
    %cst_216 = arith.constant dense<0.000000e+00> : vector<2xf32>
    %708 = vector.multi_reduction <add>, %707, %cst_216 [1] : vector<2x4xf32> to vector<2xf32>
    %709 = vector.shape_cast %708 : vector<2xf32> to vector<2x1xf32>
    %710 = vector.broadcast %709 : vector<2x1xf32> to vector<2x4xf32>
    %711 = arith.divf %707, %710 : vector<2x4xf32>
    %712 = vector.extract_strided_slice %699 {offsets = [0, 4], sizes = [2, 1], strides = [1, 1]} : vector<2x5xf32> to vector<2x1xf32>
    %cst_217 = arith.constant 5.000000e-01 : f32
    %713 = vector.broadcast %cst_217 : f32 to vector<2x1xf32>
    %714 = arith.mulf %713, %712 : vector<2x1xf32>
    %715 = math.tanh %714 : vector<2x1xf32>
    %cst_218 = arith.constant 1.000000e+00 : f32
    %716 = vector.broadcast %cst_218 : f32 to vector<2x1xf32>
    %717 = arith.addf %716, %715 : vector<2x1xf32>
    %cst_219 = arith.constant 5.000000e-01 : f32
    %718 = vector.broadcast %cst_219 : f32 to vector<2x1xf32>
    %719 = arith.mulf %718, %717 : vector<2x1xf32>
    %c12 = arith.constant 12 : index
    %c0_220 = arith.constant 0 : index
    %720 = vector.load %arg23[%c12, %c0_220] : memref<16x4xf32, #tpu.memory_space<vmem>>, vector<2x4xf32>
    %cst_221 = arith.constant 1.000000e+00 : f32
    %721 = vector.broadcast %cst_221 : f32 to vector<2x1xf32>
    %722 = arith.subf %721, %719 : vector<2x1xf32>
    %723 = vector.broadcast %722 : vector<2x1xf32> to vector<2x4xf32>
    %724 = arith.mulf %711, %723 : vector<2x4xf32>
    %725 = vector.broadcast %719 : vector<2x1xf32> to vector<2x4xf32>
    %726 = arith.mulf %720, %725 : vector<2x4xf32>
    %727 = arith.addf %724, %726 : vector<2x4xf32>
    %c12_222 = arith.constant 12 : index
    %c0_223 = arith.constant 0 : index
    %728 = vector.load %arg23[%c12_222, %c0_223] : memref<16x4xf32, #tpu.memory_space<vmem>>, vector<2x4xf32>
    tpu.vector_store %arg23[%c12_222, %c0_223], %727 {strides = array<i32>} : memref<16x4xf32, #tpu.memory_space<vmem>>, vector<2x4xf32>,
    %cst_224 = arith.constant dense<0.000000e+00> : vector<2x5xf32>
    %729 = tpu.matmul %504, %12, %cst_224 {dimension_numbers = #tpu.dot_dimension_numbers<[1], [0], [0], [1], [0, 0, 1, 1], [], []>} : vector<2x16xf32>, vector<16x5xf32>, vector<2x5xf32> -> vector<2x5xf32>
    %730 = vector.broadcast %14 : vector<1x5xf32> to vector<2x5xf32>
    %731 = arith.addf %729, %730 : vector<2x5xf32>
    %732 = vector.extract_strided_slice %731 {offsets = [0, 0], sizes = [2, 4], strides = [1, 1]} : vector<2x5xf32> to vector<2x4xf32>
    %cst_225 = arith.constant 8.800000e+01 : f32
    %733 = vector.broadcast %cst_225 : f32 to vector<2x4xf32>
    %734 = arith.minimumf %732, %733 : vector<2x4xf32>
    %cst_226 = arith.constant dense<0xFF800000> : vector<2xf32>
    %735 = vector.multi_reduction <maximumf>, %734, %cst_226 [1] : vector<2x4xf32> to vector<2xf32>
    %736 = vector.shape_cast %735 : vector<2xf32> to vector<2x1xf32>
    %737 = vector.broadcast %736 : vector<2x1xf32> to vector<2x4xf32>
    %738 = arith.subf %734, %737 : vector<2x4xf32>
    %739 = math.exp %738 : vector<2x4xf32>
    %cst_227 = arith.constant dense<0.000000e+00> : vector<2xf32>
    %740 = vector.multi_reduction <add>, %739, %cst_227 [1] : vector<2x4xf32> to vector<2xf32>
    %741 = vector.shape_cast %740 : vector<2xf32> to vector<2x1xf32>
    %742 = vector.broadcast %741 : vector<2x1xf32> to vector<2x4xf32>
    %743 = arith.divf %739, %742 : vector<2x4xf32>
    %744 = vector.extract_strided_slice %731 {offsets = [0, 4], sizes = [2, 1], strides = [1, 1]} : vector<2x5xf32> to vector<2x1xf32>
    %cst_228 = arith.constant 5.000000e-01 : f32
    %745 = vector.broadcast %cst_228 : f32 to vector<2x1xf32>
    %746 = arith.mulf %745, %744 : vector<2x1xf32>
    %747 = math.tanh %746 : vector<2x1xf32>
    %cst_229 = arith.constant 1.000000e+00 : f32
    %748 = vector.broadcast %cst_229 : f32 to vector<2x1xf32>
    %749 = arith.addf %748, %747 : vector<2x1xf32>
    %cst_230 = arith.constant 5.000000e-01 : f32
    %750 = vector.broadcast %cst_230 : f32 to vector<2x1xf32>
    %751 = arith.mulf %750, %749 : vector<2x1xf32>
    %c14 = arith.constant 14 : index
    %c0_231 = arith.constant 0 : index
    %752 = vector.load %arg23[%c14, %c0_231] : memref<16x4xf32, #tpu.memory_space<vmem>>, vector<2x4xf32>
    %cst_232 = arith.constant 1.000000e+00 : f32
    %753 = vector.broadcast %cst_232 : f32 to vector<2x1xf32>
    %754 = arith.subf %753, %751 : vector<2x1xf32>
    %755 = vector.broadcast %754 : vector<2x1xf32> to vector<2x4xf32>
    %756 = arith.mulf %743, %755 : vector<2x4xf32>
    %757 = vector.broadcast %751 : vector<2x1xf32> to vector<2x4xf32>
    %758 = arith.mulf %752, %757 : vector<2x4xf32>
    %759 = arith.addf %756, %758 : vector<2x4xf32>
    %c14_233 = arith.constant 14 : index
    %c0_234 = arith.constant 0 : index
    %760 = vector.load %arg23[%c14_233, %c0_234] : memref<16x4xf32, #tpu.memory_space<vmem>>, vector<2x4xf32>
    tpu.vector_store %arg23[%c14_233, %c0_234], %759 {strides = array<i32>} : memref<16x4xf32, #tpu.memory_space<vmem>>, vector<2x4xf32>,
    %c0_235 = arith.constant 0 : index
    %c0_236 = arith.constant 0 : index
    %c0_237 = arith.constant 0 : index
    %761 = vector.load %arg24[%c0_235, %c0_236, %c0_237] : memref<2x2x16xf32, #tpu.memory_space<vmem>>, vector<1x2x16xf32>
    %762 = vector.shape_cast %761 : vector<1x2x16xf32> to vector<2x16xf32>
    %763 = vector.shape_cast %280 : vector<2x16xf32> to vector<1x2x16xf32>
    tpu.vector_store %arg24[%c0_235, %c0_236, %c0_237], %763 {strides = array<i32>} : memref<2x2x16xf32, #tpu.memory_space<vmem>>, vector<1x2x16xf32>,
    %c1_238 = arith.constant 1 : index
    %c0_239 = arith.constant 0 : index
    %c0_240 = arith.constant 0 : index
    %764 = vector.load %arg24[%c1_238, %c0_239, %c0_240] : memref<2x2x16xf32, #tpu.memory_space<vmem>>, vector<1x2x16xf32>
    %765 = vector.shape_cast %764 : vector<1x2x16xf32> to vector<2x16xf32>
    %766 = vector.shape_cast %504 : vector<2x16xf32> to vector<1x2x16xf32>
    tpu.vector_store %arg24[%c1_238, %c0_239, %c0_240], %766 {strides = array<i32>} : memref<2x2x16xf32, #tpu.memory_space<vmem>>, vector<1x2x16xf32>,
    %c1_i32_241 = arith.constant 1 : i32
    %767 = arith.cmpi eq, %arg0, %c1_i32_241 : i32
    %768 = arith.extui %767 : i1 to i32
    %c0_i32_242 = arith.constant 0 : i32
    %769 = arith.cmpi ne, %768, %c0_i32_242 : i32
    scf.if %769 {
      %c0_243 = arith.constant 0 : index
      %c0_244 = arith.constant 0 : index
      %770 = vector.load %arg23[%c0_243, %c0_244] : memref<16x4xf32, #tpu.memory_space<vmem>>, vector<16x4xf32>
      %c0_245 = arith.constant 0 : index
      %c0_246 = arith.constant 0 : index
      %771 = vector.load %arg21[%c0_245, %c0_246] : memref<16x4xf32, #tpu.memory_space<vmem>>, vector<16x4xf32>
      tpu.vector_store %arg21[%c0_245, %c0_246], %770 {strides = array<i32>} : memref<16x4xf32, #tpu.memory_space<vmem>>, vector<16x4xf32>,
      %c0_247 = arith.constant 0 : index
      %c0_248 = arith.constant 0 : index
      %c0_249 = arith.constant 0 : index
      %772 = vector.load %arg24[%c0_247, %c0_248, %c0_249] : memref<2x2x16xf32, #tpu.memory_space<vmem>>, vector<2x2x16xf32>
      %c0_250 = arith.constant 0 : index
      %c0_251 = arith.constant 0 : index
      %c0_252 = arith.constant 0 : index
      %773 = vector.load %arg22[%c0_250, %c0_251, %c0_252] : memref<2x2x16xf32, #tpu.memory_space<vmem>>, vector<2x2x16xf32>
      tpu.vector_store %arg22[%c0_250, %c0_251, %c0_252], %772 {strides = array<i32>} : memref<2x2x16xf32, #tpu.memory_space<vmem>>, vector<2x2x16xf32>,
    } else {
    }
    return
  }
  func.func @transform_0(%arg0: i32) -> (i32, i32) {
    %c0_i32 = arith.constant 0 : i32
    %c0_i32_0 = arith.constant 0 : i32
    %c0_i32_1 = arith.constant 0 : i32
    return %c0_i32, %c0_i32_0 : i32, i32
  }
  func.func @transform_1(%arg0: i32) -> (i32, i32) {
    %c0_i32 = arith.constant 0 : i32
    %c0_i32_0 = arith.constant 0 : i32
    %c0_i32_1 = arith.constant 0 : i32
    return %c0_i32, %c0_i32_0 : i32, i32
  }
  func.func @transform_2(%arg0: i32) -> (i32, i32) {
    %c0_i32 = arith.constant 0 : i32
    %c0_i32_0 = arith.constant 0 : i32
    %c0_i32_1 = arith.constant 0 : i32
    return %c0_i32, %c0_i32_0 : i32, i32
  }
  func.func @transform_3(%arg0: i32) -> (i32, i32) {
    %c0_i32 = arith.constant 0 : i32
    %c0_i32_0 = arith.constant 0 : i32
    %c0_i32_1 = arith.constant 0 : i32
    return %c0_i32, %c0_i32_0 : i32, i32
  }
  func.func @transform_4(%arg0: i32) -> (i32, i32) {
    %c0_i32 = arith.constant 0 : i32
    %c0_i32_0 = arith.constant 0 : i32
    %c0_i32_1 = arith.constant 0 : i32
    return %c0_i32, %c0_i32_0 : i32, i32
  }
  func.func @transform_5(%arg0: i32) -> (i32, i32) {
    %c0_i32 = arith.constant 0 : i32
    %c0_i32_0 = arith.constant 0 : i32
    %c0_i32_1 = arith.constant 0 : i32
    return %c0_i32, %c0_i32_0 : i32, i32
  }
  func.func @transform_6(%arg0: i32) -> (i32, i32) {
    %c0_i32 = arith.constant 0 : i32
    %c0_i32_0 = arith.constant 0 : i32
    %c0_i32_1 = arith.constant 0 : i32
    return %c0_i32, %c0_i32_0 : i32, i32
  }
  func.func @transform_7(%arg0: i32) -> (i32, i32) {
    %c0_i32 = arith.constant 0 : i32
    %c0_i32_0 = arith.constant 0 : i32
    %c0_i32_1 = arith.constant 0 : i32
    return %c0_i32, %c0_i32_0 : i32, i32
  }
  func.func @transform_8(%arg0: i32) -> (i32, i32, i32) {
    %c0_i32 = arith.constant 0 : i32
    %c0_i32_0 = arith.constant 0 : i32
    %c0_i32_1 = arith.constant 0 : i32
    %c0_i32_2 = arith.constant 0 : i32
    return %c0_i32, %c0_i32_0, %c0_i32_1 : i32, i32, i32
  }
  func.func @transform_9(%arg0: i32) -> (i32, i32) {
    %c0_i32 = arith.constant 0 : i32
    %c0_i32_0 = arith.constant 0 : i32
    %c0_i32_1 = arith.constant 0 : i32
    return %c0_i32, %c0_i32_0 : i32, i32
  }
  func.func @transform_10(%arg0: i32) -> (i32, i32, i32) {
    %c0_i32 = arith.constant 0 : i32
    %c0_i32_0 = arith.constant 0 : i32
    %c0_i32_1 = arith.constant 0 : i32
    return %arg0, %c0_i32, %c0_i32_0 : i32, i32, i32
  }
  func.func @transform_11(%arg0: i32) -> (i32, i32, i32) {
    %c0_i32 = arith.constant 0 : i32
    %c0_i32_0 = arith.constant 0 : i32
    %c0_i32_1 = arith.constant 0 : i32
    return %arg0, %c0_i32, %c0_i32_0 : i32, i32, i32
  }
  func.func @transform_12(%arg0: i32) -> (i32, i32, i32) {
    %c0_i32 = arith.constant 0 : i32
    %c0_i32_0 = arith.constant 0 : i32
    %c0_i32_1 = arith.constant 0 : i32
    return %arg0, %c0_i32, %c0_i32_0 : i32, i32, i32
  }
  func.func @transform_13(%arg0: i32) -> (i32, i32, i32) {
    %c0_i32 = arith.constant 0 : i32
    %c0_i32_0 = arith.constant 0 : i32
    %c0_i32_1 = arith.constant 0 : i32
    return %arg0, %c0_i32, %c0_i32_0 : i32, i32, i32
  }
  func.func @transform_14(%arg0: i32) -> (i32, i32, i32) {
    %c0_i32 = arith.constant 0 : i32
    %c0_i32_0 = arith.constant 0 : i32
    %c0_i32_1 = arith.constant 0 : i32
    return %arg0, %c0_i32, %c0_i32_0 : i32, i32, i32
  }
  func.func @transform_15(%arg0: i32) -> (i32, i32, i32) {
    %c0_i32 = arith.constant 0 : i32
    %c0_i32_0 = arith.constant 0 : i32
    %c0_i32_1 = arith.constant 0 : i32
    return %arg0, %c0_i32, %c0_i32_0 : i32, i32, i32
  }
  func.func @transform_16(%arg0: i32) -> (i32, i32, i32) {
    %c0_i32 = arith.constant 0 : i32
    %c0_i32_0 = arith.constant 0 : i32
    %c0_i32_1 = arith.constant 0 : i32
    return %arg0, %c0_i32, %c0_i32_0 : i32, i32, i32
  }
  func.func @transform_17(%arg0: i32) -> (i32, i32, i32) {
    %c0_i32 = arith.constant 0 : i32
    %c0_i32_0 = arith.constant 0 : i32
    %c0_i32_1 = arith.constant 0 : i32
    return %arg0, %c0_i32, %c0_i32_0 : i32, i32, i32
  }
  func.func @transform_18(%arg0: i32) -> (i32, i32, i32) {
    %c0_i32 = arith.constant 0 : i32
    %c0_i32_0 = arith.constant 0 : i32
    %c0_i32_1 = arith.constant 0 : i32
    return %arg0, %c0_i32, %c0_i32_0 : i32, i32, i32
  }
  func.func @transform_19(%arg0: i32) -> (i32, i32, i32) {
    %c0_i32 = arith.constant 0 : i32
    %c0_i32_0 = arith.constant 0 : i32
    %c0_i32_1 = arith.constant 0 : i32
    return %arg0, %c0_i32, %c0_i32_0 : i32, i32, i32
  }
  func.func @transform_20(%arg0: i32) -> (i32, i32) {
    %c0_i32 = arith.constant 0 : i32
    %c0_i32_0 = arith.constant 0 : i32
    %c0_i32_1 = arith.constant 0 : i32
    return %c0_i32, %c0_i32_0 : i32, i32
  }
  func.func @transform_21(%arg0: i32) -> (i32, i32, i32) {
    %c0_i32 = arith.constant 0 : i32
    %c0_i32_0 = arith.constant 0 : i32
    %c0_i32_1 = arith.constant 0 : i32
    %c0_i32_2 = arith.constant 0 : i32
    return %c0_i32, %c0_i32_0, %c0_i32_1 : i32, i32, i32
  }
}

</mosaic_0001>

<bundles_post_ra>
// kernel: tpu_custom_call.1
= control target key start
LH: loop header
LB: loop body
LE: loop exit
PB: predicated region body
PF: predicated region fallthrough
CT: control target
= control target key end

     0   :  { %s5899_s0 = inlined_call_operand.vmem [shape: f32[4,2], index: 0, kind: input, shape index: {}]   ;;  %s5900_s1 = inlined_call_operand.vmem [shape: f32[16,1], index: 1, kind: input, shape index: {}]   ;;  %s5901_s2 = inlined_call_operand.vmem [shape: f32[16,1], index: 2, kind: input, shape index: {}]   ;;  %s5902_s3 = inlined_call_operand.vmem [shape: f32[16,1], index: 3, kind: input, shape index: {}]   ;;  %s5903_s4 = inlined_call_operand.vmem [shape: f32[16,4], index: 4, kind: input, shape index: {}]   ;;  %s5904_s5 = inlined_call_operand.vmem [shape: f32[16,4], index: 5, kind: input, shape index: {}]   ;;  %s5905_s6 = inlined_call_operand.vmem [shape: f32[32,16], index: 6, kind: input, shape index: {}]   ;;  %s5906_s7 = inlined_call_operand.vmem [shape: f32[16,4], index: 7, kind: input, shape index: {}]   ;;  %s5907_s8 = inlined_call_operand.vmem [shape: f32[2,2,16], index: 8, kind: input, shape index: {}]   ;;  %s5908_s9 = inlined_call_operand.<no memory space> [shape: f32[1,1], index: 9, kind: input, shape index: {}]   ;;  %s5909_s10 = inlined_call_operand.vmem [shape: f32[2,16,5], index: 10, kind: input, shape index: {}]   ;;  %s5910_s11 = inlined_call_operand.vmem [shape: f32[2,1,5], index: 11, kind: input, shape index: {}]   ;;  %s5911_s12 = inlined_call_operand.vmem [shape: f32[2,4,48], index: 12, kind: input, shape index: {}]   ;;  %s5912_s13 = inlined_call_operand.vmem [shape: f32[2,16,48], index: 13, kind: input, shape index: {}]   ;;  %s5913_s14 = inlined_call_operand.vmem [shape: f32[2,1,48], index: 14, kind: input, shape index: {}]   ;;  %s5914_s15 = inlined_call_operand.vmem [shape: f32[2,1,48], index: 15, kind: input, shape index: {}]   ;;  %s5915_s16 = inlined_call_operand.vmem [shape: f32[2,16,48], index: 16, kind: input, shape index: {}]   ;;  %s5916_s17 = inlined_call_operand.vmem [shape: f32[2,16,48], index: 17, kind: input, shape index: {}]   ;;  %s5917_s18 = inlined_call_operand.vmem [shape: f32[2,1,48], index: 18, kind: input, shape index: {}]   ;;  %s5918_s19 = inlined_call_operand.vmem [shape: f32[2,1,48], index: 19, kind: input, shape index: {}]   ;;  %s5919_s20 = inlined_call_operand.vmem [shape: f32[16,4], index: 20, kind: output, shape index: {0}]   ;;  %s5920_s21 = inlined_call_operand.hbm [shape: f32[2,2,16], index: 21, kind: output, shape index: {1}]  }
   0x1   :  { %5929 = sst [smem:[#allocation9_spill]] %s5899_s0 }
   0x2   :  { %5930 = sst [smem:[#allocation10_spill]] %s5900_s1 }
   0x3   :  { %5931 = sst [smem:[#allocation11_spill]] %s5901_s2 }
   0x4   :  { %5932 = sst [smem:[#allocation12_spill]] %s5902_s3 }
   0x5   :  { %5933 = sst [smem:[#allocation13_spill]] %s5903_s4 }
   0x6   :  { %5934 = sst [smem:[#allocation14_spill]] %s5904_s5 }
   0x7   :  { %5935 = sst [smem:[#allocation15_spill]] %s5909_s10 }
   0x8   :  { %5936 = sst [smem:[#allocation16_spill]] %s5910_s11 }
   0x9   :  { %5937 = sst [smem:[#allocation17_spill]] %s5911_s12 }
   0xa   :  { %5938 = sst [smem:[#allocation18_spill]] %s5919_s20 }
   0xb   :  { %5939 = sst [smem:[#allocation19_spill]] %s5920_s21 }
   0xc   :  { %27 = sst [smem:[#allocation4]] %s5908_s9 }
   0xd   :  { %28 = vsyncpa [#allocation6], 0  ;;  %s5220_s26 = smov 0  }
   0xe LB: > { %5940 = sst [smem:[#allocation8_spill]] %s5092_s26  ;;  %s5226_s27 = sadd.s32 4294967295, %s5092_s26   ;;  %s5092_s26 = sphi %s5220_s26, %s34_s26  }
   0xf   : > { %p4386_p0 = scmp.ge.s32.totalorder %s5092_s26, 1  ;;  %p661_p1 = scmp.lt.s32.totalorder %s5092_s26, 3 }
  0x11   : > { %p662_p2 = pnand %p4386_p0, %p661_p1 }
  0x12   : > { %p750_p3 = scmp.lt.s32.totalorder (!%p662_p2), %s5226_s27, 1  ;;  %s5942_s10 = sld [smem:[#allocation15_spill]] (!%p662_p2) }
  0x13   : > { %665 = sbr.rel (%p662_p2) target bundleno = 11769 (0x2df9), region = 100  ;;  %s5943_s12 = sld [smem:[#allocation17_spill]] (!%p662_p2) }
  0x14   : > { %p4396_p4 = scmp.ne.s32.totalorder (!%p662_p2), %s5226_s27, 0 }
  0x1a   : > { %s5232_s9 = scalar_select %p750_p3, %s5226_s27, 1 }
  0x1b   : > { %792 = sbr.rel (%p4396_p4) target bundleno = 34 (0x22), region = 104  ;;  %v793_v0 = vld [vmem:[%s5906_s7] sm:$0xff] (!%p4396_p4)  ;;  %vm795_vm0 = vcmask (!%p4396_p4), 31744   ;;  %v794_v1 = vld [vmem:[%s5906_s7 + $0x8] sm:$0xff] (!%p4396_p4)  ;;  %vm800_vm1 = vcmask (!%p4396_p4), 123904  }
  0x1c   : > { %s4450_s3 = sshll.u32 %s5232_s9, 4  ;;  %s4389_s22 = sshll.u32 %s5232_s9, 2  ;;  %v798_v2 = vld [vmem:[%s5907_s8] sm:$0x3] (!%p4396_p4)  ;;  %796 = vst.msk [vmem:[#allocation2] sm:$0xff] (!%p4396_p4), %vm795_vm0, %v793_v0  ;;  %797 = vst.msk [vmem:[#allocation2 + $0x8] sm:$0xff] (!%p4396_p4), %vm795_vm0, %v794_v1 }
  0x1d   : > { %s5242_s5 = scalar_lea.vmem %s5942_s10, %s4450_s3  ;;  %s5248_s24 = scalar_lea.vmem %s5943_s12, %s4389_s22  ;;  %801 = vst.msk [vmem:[#allocation3] sm:$0x3] (!%p4396_p4), %vm800_vm1, %v798_v2  ;;  %v799_v3 = vld [vmem:[%s5907_s8 + $0x2] sm:$0x3] (!%p4396_p4) }
  0x1e   : > { %s5253_s26 = scalar_lea.vmem %s5912_s13, %s4450_s3  ;;  %s772_s4 = scalar_lea.vmem %s5914_s15, %s5232_s9  ;;  %802 = vst.msk [vmem:[#allocation3 + $0x2] sm:$0x3] (!%p4396_p4), %vm800_vm1, %v799_v3 }
  0x1f   : > { %s5266_s11 = scalar_lea.vmem %s5915_s16, %s4450_s3  ;;  %s5271_s1 = scalar_lea.vmem %s5916_s17, %s4450_s3 }
  0x20   : > { %s785_s12 = scalar_lea.vmem %s5917_s18, %s5232_s9  ;;  %s788_s28 = scalar_lea.vmem %s5918_s19, %s5232_s9 }
  0x22 PF: > { %s5944_s21 = sld [smem:[#allocation9_spill]]  ;;  %vm845_vm2 = vcmask 1043456   ;;  %vm838_vm3 = vcmask 31744   ;;  %v5094_v7 = vmov 0   ;;  %s5945_s29 = sld [smem:[#allocation12_spill]]  ;;  %v815_v14 = vld [vmem:[%s5905_s6] sm:$0xff]  ;;  %v924_v15 = vlaneseq }
  0x23   : > { %v833_v5 = vld [vmem:[#allocation2] sm:$0xff]  ;;  %v834_v6 = vld [vmem:[#allocation2 + $0x8] sm:$0xff]  ;;  %4933 = vset.pattern.permute.xlu0 %v5094_v7  ;;  %s5095_s30 = smov 1   ;;  %vm945_vm4 = vcmask 130048   ;;  %v5096_v18 = vmov 0.0   ;;  %v817_v27 = vld [vmem:[%s5905_s6 + $0x10] sm:$0xff]  ;;  %s5950_s23 = scalar_lea.vmem %s5913_s14, %s5232_s9 }
  0x24   : > { %4564 = vmatprep.mubr.msk.f32.mxu0 %vm838_vm3, %v833_v5  ;;  %4571 = vmatprep.mubr.msk.f32.mxu1 %vm945_vm4, %v815_v14  ;;  %v925_v16 = vand.u32 127, %v924_v15  ;;  %v816_v26 = vld [vmem:[%s5905_s6 + $0x8] sm:$0xff]  ;;  %v818_v28 = vld [vmem:[%s5905_s6 + $0x18] sm:$0xff]  ;;  %v5097_v29 = vmov 1   ;;  %s803_s3 = sld [smem:[#allocation4]]  ;;  %s5946_s2 = sld [smem:[#allocation11_spill]] }
  0x25   : > { %4934 = vset.pattern.permute.xlu1 %v5097_v29  ;;  %s5947_s10 = sld [smem:[#allocation10_spill]]  ;;  %v822_v57 = vld [vmem:[%s5248_s24] sm:$0xf]  ;;  %v824_v59 = vld [vmem:[%s5253_s26 + $0x8] sm:$0xff]  ;;  %v5098_v61 = vmov 0.0|0.0   ;;  %vm5099_vm6 = vmmov 0  }
  0x26   : > { %vm926_vm5 = vcmp.eq.s32.totalorder %v925_v16, 1  ;;  %v823_v58 = vld [vmem:[%s5253_s26] sm:$0xff]  ;;  %s5949_s0 = sld [smem:[#allocation14_spill]]  ;;  %v835_v16 = vld [vmem:[#allocation3] sm:$0x3]  ;;  %s5103_s22 = smov 112  }
  0x27   : > { %v4400_v19 = vsel %vm926_vm5, 1.0, %v5096_v18  ;;  %v5344_v60 = vpack.c.bf16 %v824_v59, %v823_v58  ;;  %s5951_s24 = sld [smem:[#allocation16_spill]]  ;;  %vm3465_vm7 = vcmask 25600   ;;  %vm4222_vm8 = vcmask 123904   ;;  %p4445_p5 = scmp.ne.s32.totalorder %s5226_s27, 1 }
  0x28   : > { %v804_v4 = vld [vmem:[%s5944_s21] sm:$0xf]  ;;  %v808_v9 = vld [vmem:[%s5945_s29 + $0x8] sm:$0xff]  ;;  %s5100_s21 = smov 96   ;;  %vm4219_vm9 = vcmask 130054   ;;  %s5953_s20 = sld [smem:[#allocation18_spill]] (!%p4445_p5) }
  0x29   : > { %4562 = vmatprep.subr.msk.mxu0 %vm845_vm2, %v804_v4  ;;  %v807_v8 = vld [vmem:[%s5945_s29] sm:$0xff] }
  0x2a   : > { %4563 = vmatpush3.msk.msra.mxu0 %vm845_vm2, %v804_v4  ;;  %1052 = vrot.lane.b32.xlu1 %v807_v8, %s5095_s30  ;;  %v806_v31 = vld [vmem:[%s5946_s2 + $0x8] sm:$0xff]  ;;  %v805_v32 = vld [vmem:[%s5946_s2] sm:$0xff]  ;;  %v1047_v40 = vstv %s803_s3  ;;  %s5948_s3 = sld [smem:[#allocation13_spill]] }
  0x2b   : > { %4565 = vmatmul.mubr.msk.f32.vlgmr.msra.gmra.mrb[0].mxu0 %vm838_vm3, %v834_v6  ;;  %v813_v47 = vld [vmem:[%s5947_s10] sm:$0xff]  ;;  %v814_v49 = vld [vmem:[%s5947_s10 + $0x8] sm:$0xff]  ;;  %4577 = vmatprep.subr.msk.mxu0 %vm845_vm2, %v822_v57 }
  0x2c   : > { %4578 = vmatpush3.msk.msra.mxu0 %vm845_vm2, %v822_v57  ;;  %v812_v3 = vld [vmem:[%s5949_s0 + $0x8] sm:$0xff] }
  0x2d   : > { %4810 = vmatprep.subr.bf16.mxu0 %v5098_v61 }
  0x2e   : > { %1054 = vrot.lane.b32.xlu1 %v808_v9, %s5095_s30  ;;  %s5102_s30 = smov 16  }
  0x30   : > { %v809_v0 = vld [vmem:[%s5948_s3] sm:$0xff]  ;;  %v810_v1 = vld [vmem:[%s5948_s3 + $0x8] sm:$0xff] }
  0x9c   : > { %v1053_v30 = vpop.permute.xlu1 %1052 }
  0xa0   : > { %v1055_v38 = vpop.permute.xlu1 %1054 }
  0xfe   : > { %v4566_v10 = vpop.f32.mrb[0].mxu0 }
  0xff   : > { %v915_v11 = vpop.f32.mrb[1].mxu0  ;;  %v930_v13 = vmul.f32 %v4566_v10, %v4566_v10  ;;  %v1044_v33 = vmul.f32 %v4566_v10, %v806_v31 }
 0x100   : > { %v929_v12 = vmul.f32 %v915_v11, %v915_v11  ;;  %v1043_v35 = vmul.f32 %v915_v11, %v805_v32 }
 0x102   : > { %933 = vperm.xlu0 %4933, %v929_v12  }
 0x106   : > { %938 = vperm.xlu0 %4933, %v930_v13  }
 0x10a   : > { %4936 = vset.pattern.permute.xlu0 %v5097_v29 }
 0x181   : > { %v934_v17 = vpop.permute.xlu0 %933 }
 0x182   : > { %v941_v20 = vmul.f32 %v4400_v19, %v934_v17  ;;  %v4405_v17 = vld [vmem:[%s5950_s23] ss:$0 sm:$0xff]  ;;  %s5952_s23 = scalar_lea.vmem %s5951_s24, %s5232_s9 }
 0x184   : > { %v943_v24 = vsub.f32 %v915_v11, %v941_v20 }
 0x185   : > { %v939_v21 = vpop.permute.xlu0 %938 }
 0x186   : > { %v942_v22 = vmul.f32 %v4400_v19, %v939_v21  ;;  %v1058_v46 = vmul.f32 %v1053_v30, %v943_v24 }
 0x188   : > { %v944_v23 = vsub.f32 %v4566_v10, %v942_v22  ;;  %v5387_v22 = vld [vmem:[%s772_s4] ss:$0 sm:$0xff]  ;;  %s5101_s4 = smov 32  }
 0x18a   : > { %v4806_v25 = vpack.c.bf16 %v944_v23, %v943_v24  ;;  %v1059_v42 = vmul.f32 %v1055_v38, %v944_v23 }
 0x18c   : > { %4807 = vmatprep.subr.bf16.mxu1 %v4806_v25 }
 0x18d   : > { %4809 = vmatpush3.bf16.msra.mxu1 %v4806_v25 }
 0x18e   : > { %4813 = vmatprep.subr.bf16.mxu1 %v5098_v61 }
 0x190   : > { %4572 = vmatmul.mubr.msk.f32.vlgmr.msra.gmra.mrb[0].mxu1 %vm945_vm4, %v816_v26 }
 0x191   : > { %4574 = vmatprep.mubr.msk.f32.mxu1 %vm945_vm4, %v817_v27  ;;  %4815 = vmatpush3.bf16.msra.mxu1 %v5344_v60 }
 0x192   : > { %4819 = vmatprep.subr.bf16.mxu1 %v5098_v61 }
 0x194   : > { %4575 = vmatmul.mubr.msk.f32.gmra.mrb[2].mxu1 %vm945_vm4, %v818_v28 }
 0x195   : > { %4593 = vmatprep.mubr.msk.f32.mxu1 %vm5099_vm6, %v5096_v18 }
 0x263   : > { %v4573_v34 = vpop.f32.mrb[0].mxu1 }
 0x264   : > { %v1046_v36 = vsub.f32 %v4573_v34, %v1044_v33  ;;  %v1024_v37 = vpop.f32.mrb[1].mxu1 }
 0x265   : > { %v1045_v39 = vsub.f32 %v1024_v37, %v1043_v35 }
 0x266   : > { %v1063_v54 = vsub.f32 %v814_v49, %v1046_v36 }
 0x267   : > { %v4576_v41 = vpop.f32.mrb[2].mxu1  ;;  %v1062_v52 = vsub.f32 %v813_v47, %v1045_v39 }
 0x268   : > { %v1049_v43 = vadd.f32 %v4576_v41, %v1047_v40  ;;  %v1034_v44 = vpop.f32.mrb[3].mxu1  ;;  %v1065_v56 = vmul.f32 2.0, %v1063_v54 }
 0x269   : > { %v1048_v45 = vadd.f32 %v1047_v40, %v1034_v44  ;;  %v1064_v55 = vmul.f32 2.0, %v1062_v52 }
 0x26a   : > { %v1061_v48 = vsub.f32 %v1049_v43, %v1059_v42 }
 0x26b   : > { %v1060_v50 = vsub.f32 %v1048_v45, %v1058_v46 }
 0x26c   : > { %v1081_v51 = vmul.f32 2.0, %v1061_v48 }
 0x26d   : > { %v1080_v53 = vmul.f32 2.0, %v1060_v50 }
 0x26e   : > { %1089 = vperm.xlu1 %4934, %v1081_v51  }
 0x26f   : > { %1084 = vperm.xlu0 %4936, %v1080_v53  }
 0x272   : > { %4935 = vset.pattern.permute.xlu1 %v5094_v7 }
 0x273   : > { %1068 = vperm.xlu1 %4935, %v1064_v55   ;;  %4937 = vset.pattern.permute.xlu0 %v5094_v7  ;;  %v811_v7 = vld [vmem:[%s5949_s0] sm:$0xff] }
 0x274   : > { %1073 = vperm.xlu0 %4937, %v1065_v56  }
 0x2ed   : > { %v1090_v62 = vpop.permute.xlu1 %1089 }
 0x2ee   : > { %4940 = vrcp.f32 %v1090_v62  ;;  %v1085_v63 = vpop.permute.xlu0 %1084 }
 0x2ef   : > { %4942 = vrcp.f32 %v1085_v63 }
 0x2f2   : > { %v1069_v2 = vpop.permute.xlu1 %1068 }
 0x2f3   : > { %v1074_v4 = vpop.permute.xlu0 %1073  ;;  %v1076_v5 = vsub.f32 %v1069_v2, %v809_v0 }
 0x2f4   : > { %v1077_v6 = vsub.f32 %v1074_v4, %v810_v1 }
 0x2f5   : > { %v1078_v10 = vmul.f32 %v1076_v5, %v811_v7 }
 0x2f6   : > { %v1079_v8 = vmul.f32 %v1077_v6, %v812_v3 }
 0x2f8   : > { %v4941_v9 = vpop.eup %4940 }
 0x2f9   : > { %v4943_v11 = vpop.eup %4942  ;;  %v1095_v12 = vmul.f32 %v4941_v9, %v1079_v8 }
 0x2fa   : > { %v1093_v13 = vmul.f32 %v4943_v11, %v1078_v10 }
 0x2fb   : > { %v1097_v15 = vmin.f32 %v1095_v12, 88.0 }
 0x2fc   : > { %v1096_v14 = vmin.f32 %v1093_v13, 88.0 }
 0x2fe   : > { %4579 = vmatprep.mubr.msk.f32.mxu0 %vm838_vm3, %v1096_v14 }
 0x2ff   : > { %4580 = vmatmul.mubr.msk.f32.vlgmr.msra.gmra.mrb[2].mxu0 %vm838_vm3, %v1097_v15 }
 0x300   : > { %4812 = vmatpush3.bf16.msra.mxu0 %v5344_v60  ;;  %4586 = vmatprep.mubr.msk.f32.mxu0 %vm5099_vm6, %v5096_v18 }
 0x301   : > { %4816 = vmatprep.subr.bf16.mxu0 %v5098_v61 }
 0x303   : > { %4587 = vmatmul.mubr.msk.f32.vlgmr.msra.gmra.mrb[4].mxu0 %vm945_vm4, %v835_v16 }
 0x304   : > { %4818 = vmatpush3.bf16.msra.mxu0 %v5344_v60  ;;  %4600 = vmatprep.mubr.msk.f32.mxu0 %vm5099_vm6, %v5096_v18 }
 0x305   : > { %4822 = vmatprep.subr.bf16.mxu0 %v5098_v61 }
 0x3d2   : > { %v4581_v19 = vpop.f32.mrb[2].mxu0 }
 0x3d3   : > { %v5380_v20 = vadd.f32 %v4581_v19, %v4405_v17  ;;  %v1179_v21 = vpop.f32.mrb[3].mxu0 }
 0x3d4   : > { %v5391_v26 = vadd.f32 %v4405_v17, %v1179_v21 }
 0x3d6   : > { %v1263_v23 = vpop.f32.mrb[4].mxu0 }
 0x3d7   : > { %v1264_v24 = vadd.f32 %v5387_v22, %v1263_v23  ;;  %v4588_v25 = vpop.f32.mrb[5].mxu0 }
 0x3d9   : > { %1273 = vrot.lane.b32.xlu1 %v1264_v24, %s5100_s21  ;;  %v1267_v27 = vadd.f32 %v1264_v24, %v5391_v26 }
 0x3db   : > { %v1268_v28 = vmul.f32 0.5, %v1267_v27 }
 0x3dd   : > { %4944 = vtanh.f32 %v1268_v28 }
 0x3e7   : > { %v4945_v29 = vpop.eup %4944 }
 0x3e8   : > { %v1270_v30 = vadd.f32 1.0, %v4945_v29 }
 0x3ea   : > { %v1271_v31 = vmul.f32 0.5, %v1270_v30 }
 0x3ec   : > { %v1283_v38 = vsub.f32 1.0, %v1271_v31 }
 0x44b   : > { %v1274_v32 = vpop.permute.xlu1 %1273 }
 0x44c   : > { %v1276_v33 = vmul.f32 %v1274_v32, %v1271_v31 }
 0x44e   : > { %1278 = vrot.lane.b32.xlu1 %v1276_v33, %s5101_s4 }
 0x452   : > { %1289 = vrot.lane.b32.xlu1 %v835_v16, %s5102_s30 }
 0x4c0   : > { %v1279_v34 = vpop.permute.xlu1 %1278 }
 0x4c1   : > { %v1281_v35 = vadd.f32 %v1279_v34, %v5391_v26 }
 0x4c3   : > { %4946 = vtanh.f32 %v1281_v35 }
 0x4c4   : > { %v1290_v37 = vpop.permute.xlu1 %1289 }
 0x4c5   : > { %v1292_v40 = vmul.f32 %v1290_v37, %v1271_v31 }
 0x4cd   : > { %v4947_v36 = vpop.eup %4946 }
 0x4ce   : > { %1285 = vrot.lane.b32.xlu0 %v4947_v36, %s5103_s22 }
 0x540   : > { %v1286_v39 = vpop.permute.xlu0 %1285 }
 0x541   : > { %v1288_v41 = vmul.f32 %v1286_v39, %v1283_v38 }
 0x543   : > { %v1293_v42 = vadd.f32 %v1292_v40, %v1288_v41 }
 0x545   : > { %1295 = vrot.lane.b32.xlu0 %v1293_v42, %s5103_s22  ;;  %v1393_v58 = vrot.slane %v1293_v42, 6 }
 0x5b7   : > { %v5399_v43 = vpop.permute.xlu0 %1295 }
 0x5b8   : > { %4594 = vmatmul.mubr.msk.f32.vlgmr.msra.gmra.mrb[4].mxu1 %vm945_vm4, %v5399_v43 }
 0x5b9   : > { %4821 = vmatpush3.bf16.msra.mxu1 %v5344_v60  ;;  %4607 = vmatprep.mubr.msk.f32.mxu1 %vm5099_vm6, %v5096_v18 }
 0x5ba   : > { %4825 = vmatprep.subr.bf16.mxu1 %v5098_v61 }
 0x68b   : > { %v1365_v44 = vpop.f32.mrb[4].mxu1 }
 0x68c   : > { %v1366_v45 = vadd.f32 %v5387_v22, %v1365_v44  ;;  %v4595_v46 = vpop.f32.mrb[5].mxu1 }
 0x68e   : > { %v1370_v47 = vrot.slane %v1366_v45, 6 }
 0x690   : > { %1377 = vrot.lane.b32.xlu1 %v1370_v47, %s5100_s21  ;;  %v1372_v48 = vadd.f32 %v1370_v47, %v5391_v26 }
 0x692   : > { %v1373_v49 = vmul.f32 0.5, %v1372_v48 }
 0x694   : > { %4948 = vtanh.f32 %v1373_v49 }
 0x69e   : > { %v4949_v50 = vpop.eup %4948 }
 0x69f   : > { %v1375_v51 = vadd.f32 1.0, %v4949_v50 }
 0x6a1   : > { %v1376_v52 = vmul.f32 0.5, %v1375_v51 }
 0x6a3   : > { %v1387_v59 = vsub.f32 1.0, %v1376_v52  ;;  %v1395_v0 = vmul.f32 %v1393_v58, %v1376_v52 }
 0x702   : > { %v1378_v53 = vpop.permute.xlu1 %1377 }
 0x703   : > { %v1380_v54 = vmul.f32 %v1378_v53, %v1376_v52 }
 0x705   : > { %1382 = vrot.lane.b32.xlu0 %v1380_v54, %s5101_s4 }
 0x777   : > { %v1383_v55 = vpop.permute.xlu0 %1382 }
 0x778   : > { %v1385_v56 = vadd.f32 %v1383_v55, %v5391_v26 }
 0x77a   : > { %4950 = vtanh.f32 %v1385_v56 }
 0x784   : > { %v4951_v57 = vpop.eup %4950 }
 0x785   : > { %1389 = vrot.lane.b32.xlu1 %v4951_v57, %s5103_s22 }
 0x7f7   : > { %v1390_v62 = vpop.permute.xlu1 %1389 }
 0x7f8   : > { %v1392_v63 = vmul.f32 %v1390_v62, %v1387_v59 }
 0x7fa   : > { %v1396_v1 = vadd.f32 %v1395_v0, %v1392_v63 }
 0x7fc   : > { %v1398_v2 = vrot.slane %v1396_v1, 2  ;;  %v1497_v19 = vrot.slane %v1396_v1, 6 }
 0x7fe   : > { %1399 = vrot.lane.b32.xlu0 %v1398_v2, %s5103_s22 }
 0x870   : > { %v5414_v3 = vpop.permute.xlu0 %1399 }
 0x871   : > { %4601 = vmatmul.mubr.msk.f32.vlgmr.msra.gmra.mrb[6].mxu0 %vm945_vm4, %v5414_v3 }
 0x872   : > { %4824 = vmatpush3.bf16.msra.mxu0 %v5344_v60  ;;  %4614 = vmatprep.mubr.msk.f32.mxu0 %vm5099_vm6, %v5096_v18 }
 0x873   : > { %4828 = vmatprep.subr.bf16.mxu0 %v5098_v61 }
 0x944   : > { %v1469_v4 = vpop.f32.mrb[6].mxu0 }
 0x945   : > { %v1470_v5 = vadd.f32 %v5387_v22, %v1469_v4  ;;  %v4602_v6 = vpop.f32.mrb[7].mxu0 }
 0x947   : > { %v1474_v7 = vrot.slane %v1470_v5, 4 }
 0x949   : > { %1481 = vrot.lane.b32.xlu1 %v1474_v7, %s5100_s21  ;;  %v1476_v8 = vadd.f32 %v1474_v7, %v5391_v26 }
 0x94b   : > { %v1477_v9 = vmul.f32 0.5, %v1476_v8 }
 0x94d   : > { %4952 = vtanh.f32 %v1477_v9 }
 0x957   : > { %v4953_v10 = vpop.eup %4952 }
 0x958   : > { %v1479_v11 = vadd.f32 1.0, %v4953_v10 }
 0x95a   : > { %v1480_v12 = vmul.f32 0.5, %v1479_v11 }
 0x95c   : > { %v1491_v21 = vsub.f32 1.0, %v1480_v12  ;;  %v1499_v24 = vmul.f32 %v1497_v19, %v1480_v12 }
 0x9bb   : > { %v1482_v13 = vpop.permute.xlu1 %1481 }
 0x9bc   : > { %v1484_v14 = vmul.f32 %v1482_v13, %v1480_v12 }
 0x9be   : > { %1486 = vrot.lane.b32.xlu0 %v1484_v14, %s5101_s4 }
 0xa30   : > { %v1487_v15 = vpop.permute.xlu0 %1486 }
 0xa31   : > { %v1489_v16 = vadd.f32 %v1487_v15, %v5391_v26 }
 0xa33   : > { %4954 = vtanh.f32 %v1489_v16 }
 0xa3d   : > { %v4955_v17 = vpop.eup %4954 }
 0xa3e   : > { %1493 = vrot.lane.b32.xlu1 %v4955_v17, %s5103_s22 }
 0xab0   : > { %v1494_v23 = vpop.permute.xlu1 %1493 }
 0xab1   : > { %v1496_v25 = vmul.f32 %v1494_v23, %v1491_v21 }
 0xab3   : > { %v1500_v27 = vadd.f32 %v1499_v24, %v1496_v25 }
 0xab5   : > { %v1502_v28 = vrot.slane %v1500_v27, 4  ;;  %v1601_v45 = vrot.slane %v1500_v27, 6 }
 0xab7   : > { %1503 = vrot.lane.b32.xlu0 %v1502_v28, %s5103_s22 }
 0xb29   : > { %v5429_v29 = vpop.permute.xlu0 %1503 }
 0xb2a   : > { %4608 = vmatmul.mubr.msk.f32.vlgmr.msra.gmra.mrb[6].mxu1 %vm945_vm4, %v5429_v29 }
 0xb2b   : > { %4827 = vmatpush3.bf16.msra.mxu1 %v5344_v60  ;;  %4621 = vmatprep.mubr.msk.f32.mxu1 %vm5099_vm6, %v5096_v18 }
 0xb2c   : > { %4831 = vmatprep.subr.bf16.mxu1 %v5098_v61 }
 0xbfd   : > { %v1573_v30 = vpop.f32.mrb[6].mxu1 }
 0xbfe   : > { %v1574_v31 = vadd.f32 %v5387_v22, %v1573_v30  ;;  %v4609_v32 = vpop.f32.mrb[7].mxu1 }
 0xc00   : > { %v1578_v33 = vrot.slane %v1574_v31, 2 }
 0xc02   : > { %1585 = vrot.lane.b32.xlu1 %v1578_v33, %s5100_s21  ;;  %v1580_v34 = vadd.f32 %v1578_v33, %v5391_v26 }
 0xc04   : > { %v1581_v35 = vmul.f32 0.5, %v1580_v34 }
 0xc06   : > { %4956 = vtanh.f32 %v1581_v35  ;;  %v827_v35 = vld [vmem:[%s5266_s11] sm:$0xff] }
 0xc10   : > { %v4957_v36 = vpop.eup %4956 }
 0xc11   : > { %v1583_v37 = vadd.f32 1.0, %v4957_v36  ;;  %v828_v36 = vld [vmem:[%s5266_s11 + $0x8] sm:$0xff] }
 0xc13   : > { %v1584_v38 = vmul.f32 0.5, %v1583_v37  ;;  %v5473_v37 = vpack.c.bf16 %v828_v36, %v827_v35 }
 0xc15   : > { %v1595_v46 = vsub.f32 1.0, %v1584_v38  ;;  %v1603_v48 = vmul.f32 %v1601_v45, %v1584_v38 }
 0xc74   : > { %v1586_v39 = vpop.permute.xlu1 %1585 }
 0xc75   : > { %v1588_v40 = vmul.f32 %v1586_v39, %v1584_v38 }
 0xc77   : > { %1590 = vrot.lane.b32.xlu0 %v1588_v40, %s5101_s4 }
 0xce9   : > { %v1591_v41 = vpop.permute.xlu0 %1590 }
 0xcea   : > { %v1593_v42 = vadd.f32 %v1591_v41, %v5391_v26 }
 0xcec   : > { %4958 = vtanh.f32 %v1593_v42 }
 0xcf6   : > { %v4959_v44 = vpop.eup %4958 }
 0xcf7   : > { %1597 = vrot.lane.b32.xlu1 %v4959_v44, %s5103_s22 }
 0xd69   : > { %v1598_v47 = vpop.permute.xlu1 %1597 }
 0xd6a   : > { %v1600_v49 = vmul.f32 %v1598_v47, %v1595_v46 }
 0xd6c   : > { %v1604_v50 = vadd.f32 %v1603_v48, %v1600_v49 }
 0xd6e   : > { %v1606_v51 = vrot.slane %v1604_v50, 6 }
 0xd70   : > { %1607 = vrot.lane.b32.xlu0 %v1606_v51, %s5103_s22 }
 0xde2   : > { %v5444_v52 = vpop.permute.xlu0 %1607 }
 0xde3   : > { %4615 = vmatmul.mubr.msk.f32.vlgmr.msra.gmra.mrb[8].mxu0 %vm945_vm4, %v5444_v52 }
 0xde4   : > { %4830 = vmatpush3.bf16.msra.mxu0 %v5344_v60  ;;  %4628 = vmatprep.mubr.msk.f32.mxu0 %vm5099_vm6, %v5096_v18 }
 0xde5   : > { %4834 = vmatprep.subr.bf16.mxu0 %v5098_v61 }
 0xeb6   : > { %v1677_v26 = vpop.f32.mrb[8].mxu0 }
 0xeb7   : > { %v1678_v53 = vadd.f32 %v5387_v22, %v1677_v26  ;;  %v4616_v54 = vpop.f32.mrb[9].mxu0 }
 0xeb9   : > { %1687 = vrot.lane.b32.xlu1 %v1678_v53, %s5100_s21  ;;  %v1681_v55 = vadd.f32 %v1678_v53, %v5380_v20 }
 0xebb   : > { %v1682_v56 = vmul.f32 0.5, %v1681_v55 }
 0xebd   : > { %4960 = vtanh.f32 %v1682_v56 }
 0xec7   : > { %v4961_v57 = vpop.eup %4960 }
 0xec8   : > { %v1684_v58 = vadd.f32 1.0, %v4961_v57 }
 0xeca   : > { %v1685_v59 = vmul.f32 0.5, %v1684_v58 }
 0xecc   : > { %v1697_v4 = vsub.f32 1.0, %v1685_v59  ;;  %v1704_v6 = vmul.f32 %v1685_v59, %v1606_v51 }
 0xf2b   : > { %v1688_v62 = vpop.permute.xlu1 %1687 }
 0xf2c   : > { %v1690_v63 = vmul.f32 %v1688_v62, %v1685_v59 }
 0xf2e   : > { %1692 = vrot.lane.b32.xlu0 %v1690_v63, %s5101_s4 }
 0xfa0   : > { %v1693_v0 = vpop.permute.xlu0 %1692 }
 0xfa1   : > { %v1695_v1 = vadd.f32 %v1693_v0, %v5380_v20 }
 0xfa3   : > { %4962 = vtanh.f32 %v1695_v1 }
 0xfad   : > { %v4963_v2 = vpop.eup %4962 }
 0xfae   : > { %1699 = vrot.lane.b32.xlu1 %v4963_v2, %s5103_s22 }
0x1020   : > { %v1700_v5 = vpop.permute.xlu1 %1699 }
0x1021   : > { %v1702_v7 = vmul.f32 %v1700_v5, %v1697_v4  ;;  %v829_v4 = vld [vmem:[%s5271_s1] sm:$0xff]  ;;  %v830_v5 = vld [vmem:[%s5271_s1 + $0x8] sm:$0xff] }
0x1023   : > { %v1705_v8 = vadd.f32 %v1704_v6, %v1702_v7  ;;  %v5518_v6 = vpack.c.bf16 %v830_v5, %v829_v4 }
0x1025   : > { %1707 = vrot.lane.b32.xlu0 %v1705_v8, %s5103_s22  ;;  %v1805_v27 = vrot.slane %v1705_v8, 6  ;;  %v5524_v8 = vld [vmem:[#allocation3 + $0x2] sm:$0x3] }
0x1097   : > { %v1708_v9 = vpop.permute.xlu0 %1707 }
0x1098   : > { %4622 = vmatmul.mubr.msk.f32.vlgmr.msra.gmra.mrb[8].mxu1 %vm945_vm4, %v1708_v9 }
0x1099   : > { %4833 = vmatpush3.bf16.msra.mxu1 %v5344_v60  ;;  %4635 = vmatprep.mubr.msk.f32.mxu1 %vm5099_vm6, %v5096_v18 }
0x109a   : > { %4837 = vmatprep.subr.bf16.mxu1 %v5098_v61 }
0x116b   : > { %v1777_v10 = vpop.f32.mrb[8].mxu1 }
0x116c   : > { %v1778_v11 = vadd.f32 %v5387_v22, %v1777_v10  ;;  %v4623_v12 = vpop.f32.mrb[9].mxu1 }
0x116d   : > { %v5564_v12 = vld [vmem:[%s788_s28] ss:$0 sm:$0xff] }
0x116e   : > { %v1782_v13 = vrot.slane %v1778_v11, 6 }
0x1170   : > { %1789 = vrot.lane.b32.xlu1 %v1782_v13, %s5100_s21  ;;  %v1784_v14 = vadd.f32 %v1782_v13, %v5380_v20 }
0x1172   : > { %v1785_v15 = vmul.f32 0.5, %v1784_v14 }
0x1174   : > { %4964 = vtanh.f32 %v1785_v15 }
0x117e   : > { %v4965_v16 = vpop.eup %4964 }
0x117f   : > { %v1787_v17 = vadd.f32 1.0, %v4965_v16 }
0x1181   : > { %v1788_v19 = vmul.f32 0.5, %v1787_v17 }
0x1183   : > { %v1799_v28 = vsub.f32 1.0, %v1788_v19  ;;  %v1807_v32 = vmul.f32 %v1805_v27, %v1788_v19 }
0x11e2   : > { %v1790_v60 = vpop.permute.xlu1 %1789 }
0x11e3   : > { %v1792_v21 = vmul.f32 %v1790_v60, %v1788_v19 }
0x11e5   : > { %1794 = vrot.lane.b32.xlu0 %v1792_v21, %s5101_s4 }
0x1257   : > { %v1795_v23 = vpop.permute.xlu0 %1794 }
0x1258   : > { %v1797_v24 = vadd.f32 %v1795_v23, %v5380_v20 }
0x125a   : > { %4966 = vtanh.f32 %v1797_v24  ;;  %v5580_v24 = vld [vmem:[%s785_s12] ss:$0 sm:$0xff] }
0x1264   : > { %v4967_v25 = vpop.eup %4966 }
0x1265   : > { %1801 = vrot.lane.b32.xlu1 %v4967_v25, %s5103_s22 }
0x12d7   : > { %v1802_v30 = vpop.permute.xlu1 %1801 }
0x12d8   : > { %v1804_v31 = vmul.f32 %v1802_v30, %v1799_v28 }
0x12da   : > { %v1808_v33 = vadd.f32 %v1807_v32, %v1804_v31 }
0x12dc   : > { %v1810_v34 = vrot.slane %v1808_v33, 2  ;;  %v1909_v58 = vrot.slane %v1808_v33, 6 }
0x12de   : > { %1811 = vrot.lane.b32.xlu0 %v1810_v34, %s5103_s22 }
0x1350   : > { %v5475_v38 = vpop.permute.xlu0 %1811 }
0x1351   : > { %4629 = vmatmul.mubr.msk.f32.vlgmr.msra.gmra.mrb[10].mxu0 %vm945_vm4, %v5475_v38 }
0x1352   : > { %4836 = vmatpush3.bf16.msra.mxu0 %v5473_v37  ;;  %4642 = vmatprep.mubr.msk.f32.mxu0 %vm5099_vm6, %v5096_v18 }
0x1353   : > { %4840 = vmatprep.subr.bf16.mxu0 %v5098_v61 }
0x1355   : > { %4643 = vmatmul.mubr.msk.f32.vlgmr.msra.gmra.mrb[12].mxu0 %vm945_vm4, %v5399_v43 }
0x1356   : > { %4842 = vmatpush3.bf16.msra.mxu0 %v5473_v37  ;;  %4656 = vmatprep.mubr.msk.f32.mxu0 %vm5099_vm6, %v5096_v18 }
0x1357   : > { %4846 = vmatprep.subr.bf16.mxu0 %v5098_v61 }
0x1359   : > { %4657 = vmatmul.mubr.msk.f32.vlgmr.msra.gmra.mrb[14].mxu0 %vm945_vm4, %v5429_v29 }
0x135a   : > { %4848 = vmatpush3.bf16.msra.mxu0 %v5473_v37  ;;  %4670 = vmatprep.mubr.msk.f32.mxu0 %vm5099_vm6, %v5096_v18 }
0x135b   : > { %4852 = vmatprep.subr.bf16.mxu0 %v5098_v61 }
0x135d   : > { %4671 = vmatmul.mubr.msk.f32.vlgmr.msra.gmra.mrb[16].mxu0 %vm945_vm4, %v1708_v9 }
0x135e   : > { %4854 = vmatpush3.bf16.msra.mxu0 %v5473_v37  ;;  %4684 = vmatprep.mubr.msk.f32.mxu0 %vm5099_vm6, %v5096_v18 }
0x135f   : > { %4858 = vmatprep.subr.bf16.mxu0 %v5098_v61 }
0x1424   : > { %v1881_v43 = vpop.f32.mrb[10].mxu0 }
0x1425   : > { %v1882_v39 = vadd.f32 %v5387_v22, %v1881_v43  ;;  %v4630_v29 = vpop.f32.mrb[11].mxu0 }
0x1427   : > { %v1886_v40 = vrot.slane %v1882_v39, 4 }
0x1428   : > { %v5501_v41 = vpop.f32.mrb[12].mxu0 }
0x1429   : > { %1893 = vrot.lane.b32.xlu1 %v1886_v40, %s5100_s21  ;;  %v4644_v42 = vpop.f32.mrb[13].mxu0  ;;  %v1888_v48 = vadd.f32 %v1886_v40, %v5380_v20  ;;  %v2090_v25 = vadd.f32 %v5580_v24, %v5501_v41 }
0x142b   : > { %v1889_v49 = vmul.f32 0.5, %v1888_v48 }
0x142c   : > { %v5504_v44 = vpop.f32.mrb[14].mxu0 }
0x142d   : > { %v4658_v45 = vpop.f32.mrb[15].mxu0  ;;  %4968 = vtanh.f32 %v1889_v49 }
0x1430   : > { %v5506_v46 = vpop.f32.mrb[16].mxu0 }
0x1431   : > { %v4672_v47 = vpop.f32.mrb[17].mxu0 }
0x1437   : > { %v4969_v50 = vpop.eup %4968 }
0x1438   : > { %v1891_v51 = vadd.f32 1.0, %v4969_v50 }
0x143a   : > { %v1892_v26 = vmul.f32 0.5, %v1891_v51 }
0x143c   : > { %v1903_v59 = vsub.f32 1.0, %v1892_v26  ;;  %v1911_v63 = vmul.f32 %v1909_v58, %v1892_v26 }
0x149b   : > { %v1894_v53 = vpop.permute.xlu1 %1893 }
0x149c   : > { %v1896_v54 = vmul.f32 %v1894_v53, %v1892_v26 }
0x149e   : > { %1898 = vrot.lane.b32.xlu0 %v1896_v54, %s5101_s4 }
0x1510   : > { %v1899_v55 = vpop.permute.xlu0 %1898 }
0x1511   : > { %v1901_v56 = vadd.f32 %v1899_v55, %v5380_v20 }
0x1513   : > { %4970 = vtanh.f32 %v1901_v56 }
0x151d   : > { %v4971_v57 = vpop.eup %4970 }
0x151e   : > { %1905 = vrot.lane.b32.xlu1 %v4971_v57, %s5103_s22 }
0x1590   : > { %v1906_v62 = vpop.permute.xlu1 %1905 }
0x1591   : > { %v1908_v0 = vmul.f32 %v1906_v62, %v1903_v59 }
0x1593   : > { %v5512_v1 = vadd.f32 %v1911_v63, %v1908_v0 }
0x1595   : > { %v1914_v2 = vrot.slane %v5512_v1, 4  ;;  %v2013_v49 = vrot.slane %v5512_v1, 6 }
0x1597   : > { %1915 = vrot.lane.b32.xlu0 %v1914_v2, %s5103_s22 }
0x1609   : > { %v1916_v7 = vpop.permute.xlu0 %1915 }
0x160a   : > { %4636 = vmatmul.mubr.msk.f32.vlgmr.msra.gmra.mrb[10].mxu1 %vm945_vm4, %v1916_v7  ;;  %4685 = vmatmul.mubr.msk.f32.vlgmr.msra.gmra.mrb[18].mxu0 %vm945_vm4, %v1916_v7 }
0x160b   : > { %4839 = vmatpush3.bf16.msra.mxu1 %v5473_v37  ;;  %4860 = vmatpush3.bf16.msra.mxu0 %v5518_v6 }
0x160c   : > { %4649 = vmatprep.mubr.msk.f32.mxu1 %vm5099_vm6, %v5096_v18  ;;  %4698 = vmatprep.mubr.msk.f32.mxu0 %vm5099_vm6, %v5096_v18 }
0x160d   : > { %4843 = vmatprep.subr.bf16.mxu1 %v5098_v61  ;;  %4864 = vmatprep.subr.bf16.mxu0 %v5098_v61 }
0x160e   : > { %4650 = vmatmul.mubr.msk.f32.vlgmr.msra.gmra.mrb[12].mxu1 %vm945_vm4, %v5414_v3  ;;  %4699 = vmatmul.mubr.msk.f32.vlgmr.msra.gmra.mrb[20].mxu0 %vm945_vm4, %v5524_v8 }
0x160f   : > { %4845 = vmatpush3.bf16.msra.mxu1 %v5473_v37  ;;  %4663 = vmatprep.mubr.msk.f32.mxu1 %vm5099_vm6, %v5096_v18 }
0x1610   : > { %4849 = vmatprep.subr.bf16.mxu1 %v5098_v61  ;;  %4866 = vmatpush3.bf16.msra.mxu0 %v5518_v6 }
0x1611   : > { %4712 = vmatprep.mubr.msk.f32.mxu0 %vm5099_vm6, %v5096_v18  ;;  %4870 = vmatprep.subr.bf16.mxu0 %v5098_v61 }
0x1612   : > { %4664 = vmatmul.mubr.msk.f32.vlgmr.msra.gmra.mrb[14].mxu1 %vm945_vm4, %v5444_v52 }
0x1613   : > { %4851 = vmatpush3.bf16.msra.mxu1 %v5473_v37  ;;  %4677 = vmatprep.mubr.msk.f32.mxu1 %vm5099_vm6, %v5096_v18 }
0x1614   : > { %4855 = vmatprep.subr.bf16.mxu1 %v5098_v61 }
0x1616   : > { %4678 = vmatmul.mubr.msk.f32.vlgmr.msra.gmra.mrb[16].mxu1 %vm945_vm4, %v5475_v38 }
0x1617   : > { %4857 = vmatpush3.bf16.msra.mxu1 %v5473_v37  ;;  %4691 = vmatprep.mubr.msk.f32.mxu1 %vm5099_vm6, %v5096_v18 }
0x1618   : > { %4861 = vmatprep.subr.bf16.mxu1 %v5098_v61 }
0x16dd   : > { %v1985_v3 = vpop.f32.mrb[10].mxu1  ;;  %v5556_v9 = vpop.f32.mrb[18].mxu0 }
0x16de   : > { %v1986_v52 = vadd.f32 %v5387_v22, %v1985_v3  ;;  %v4637_v10 = vpop.f32.mrb[11].mxu1  ;;  %v4686_v11 = vpop.f32.mrb[19].mxu0 }
0x16e0   : > { %v1990_v13 = vrot.slane %v1986_v52, 2 }
0x16e1   : > { %v5566_v14 = vpop.f32.mrb[12].mxu1  ;;  %v2664_v15 = vpop.f32.mrb[20].mxu0 }
0x16e2   : > { %v2665_v16 = vadd.f32 %v5564_v12, %v2664_v15  ;;  %1997 = vrot.lane.b32.xlu1 %v1990_v13, %s5100_s21  ;;  %v4651_v17 = vpop.f32.mrb[13].mxu1  ;;  %v4700_v19 = vpop.f32.mrb[21].mxu0  ;;  %v1992_v27 = vadd.f32 %v1990_v13, %v5380_v20 }
0x16e4   : > { %2674 = vrot.lane.b32.xlu0 %v2665_v16, %s5100_s21  ;;  %v2668_v28 = vadd.f32 %v2665_v16, %v2090_v25  ;;  %v1993_v30 = vmul.f32 0.5, %v1992_v27 }
0x16e5   : > { %v5571_v22 = vpop.f32.mrb[14].mxu1 }
0x16e6   : > { %v4665_v60 = vpop.f32.mrb[15].mxu1  ;;  %v2669_v31 = vmul.f32 0.5, %v2668_v28  ;;  %4972 = vtanh.f32 %v1993_v30 }
0x16e8   : > { %4974 = vtanh.f32 %v2669_v31 }
0x16e9   : > { %v5573_v21 = vpop.f32.mrb[16].mxu1 }
0x16ea   : > { %v4679_v23 = vpop.f32.mrb[17].mxu1 }
0x16f0   : > { %v4973_v32 = vpop.eup %4972 }
0x16f1   : > { %v1995_v34 = vadd.f32 1.0, %v4973_v32 }
0x16f2   : > { %v4975_v33 = vpop.eup %4974 }
0x16f3   : > { %v2671_v35 = vadd.f32 1.0, %v4975_v33  ;;  %v1996_v36 = vmul.f32 0.5, %v1995_v34  ;;  %v2230_v34 = vadd.f32 %v5580_v24, %v5504_v44 }
0x16f5   : > { %v2672_v43 = vmul.f32 0.5, %v2671_v35  ;;  %v2007_v50 = vsub.f32 1.0, %v1996_v36  ;;  %v2015_v26 = vmul.f32 %v2013_v49, %v1996_v36 }
0x16f7   : > { %v2684_v55 = vsub.f32 1.0, %v2672_v43 }
0x1754   : > { %v1998_v37 = vpop.permute.xlu1 %1997 }
0x1755   : > { %v2000_v38 = vmul.f32 %v1998_v37, %v1996_v36 }
0x1756   : > { %v2675_v39 = vpop.permute.xlu0 %2674 }
0x1757   : > { %v2677_v29 = vmul.f32 %v2675_v39, %v2672_v43  ;;  %2002 = vrot.lane.b32.xlu1 %v2000_v38, %s5101_s4 }
0x1759   : > { %2679 = vrot.lane.b32.xlu0 %v2677_v29, %s5101_s4 }
0x17c9   : > { %v2003_v40 = vpop.permute.xlu1 %2002 }
0x17ca   : > { %v2005_v41 = vadd.f32 %v2003_v40, %v5380_v20 }
0x17cb   : > { %v2680_v42 = vpop.permute.xlu0 %2679 }
0x17cc   : > { %4976 = vtanh.f32 %v2005_v41  ;;  %v2682_v45 = vadd.f32 %v2680_v42, %v2090_v25 }
0x17ce   : > { %4978 = vtanh.f32 %v2682_v45 }
0x17d6   : > { %v4977_v47 = vpop.eup %4976 }
0x17d7   : > { %2009 = vrot.lane.b32.xlu1 %v4977_v47, %s5103_s22 }
0x17d8   : > { %v4979_v48 = vpop.eup %4978 }
0x17d9   : > { %2686 = vrot.lane.b32.xlu0 %v4979_v48, %s5103_s22 }
0x17db   : > { %2690 = vrot.lane.b32.xlu1 %v5524_v8, %s5102_s30  ;;  %v2160_v8 = vadd.f32 %v5580_v24, %v5566_v14 }
0x1849   : > { %v2010_v51 = vpop.permute.xlu1 %2009 }
0x184a   : > { %v2012_v53 = vmul.f32 %v2010_v51, %v2007_v50 }
0x184b   : > { %v2687_v20 = vpop.permute.xlu0 %2686 }
0x184c   : > { %v5593_v54 = vadd.f32 %v2015_v26, %v2012_v53  ;;  %v2689_v57 = vmul.f32 %v2687_v20, %v2684_v55  ;;  %v2300_v20 = vadd.f32 %v5580_v24, %v5571_v22 }
0x184d   : > { %v2691_v56 = vpop.permute.xlu1 %2690 }
0x184e   : > { %v2693_v58 = vmul.f32 %v2691_v56, %v2672_v43  ;;  %v2514_v59 = vrot.slane %v5593_v54, 6 }
0x1850   : > { %v2694_v62 = vadd.f32 %v2693_v58, %v2689_v57  ;;  %2515 = vrot.lane.b32.xlu0 %v2514_v59, %s5103_s22 }
0x1852   : > { %2696 = vrot.lane.b32.xlu1 %v2694_v62, %s5103_s22 }
0x18c2   : > { %v2516_v63 = vpop.permute.xlu0 %2515 }
0x18c3   : > { %4692 = vmatmul.mubr.msk.f32.vlgmr.msra.gmra.mrb[18].mxu1 %vm945_vm4, %v2516_v63 }
0x18c4   : > { %4863 = vmatpush3.bf16.msra.mxu1 %v5518_v6  ;;  %4705 = vmatprep.mubr.msk.f32.mxu1 %vm5099_vm6, %v5096_v18  ;;  %v5603_v0 = vpop.permute.xlu1 %2696 }
0x18c5   : > { %4867 = vmatprep.subr.bf16.mxu1 %v5098_v61 }
0x18c7   : > { %4706 = vmatmul.mubr.msk.f32.vlgmr.msra.gmra.mrb[20].mxu1 %vm945_vm4, %v5603_v0 }
0x18c8   : > { %4869 = vmatpush3.bf16.msra.mxu1 %v5518_v6  ;;  %4719 = vmatprep.mubr.msk.f32.mxu1 %vm5099_vm6, %v5096_v18 }
0x18c9   : > { %4873 = vmatprep.subr.bf16.mxu1 %v5098_v61 }
0x1996   : > { %v5611_v1 = vpop.f32.mrb[18].mxu1 }
0x1997   : > { %v4693_v2 = vpop.f32.mrb[19].mxu1 }
0x199a   : > { %v2766_v4 = vpop.f32.mrb[20].mxu1 }
0x199b   : > { %v2767_v5 = vadd.f32 %v5564_v12, %v2766_v4  ;;  %v4707_v7 = vpop.f32.mrb[21].mxu1 }
0x199d   : > { %2776 = vrot.lane.b32.xlu0 %v2767_v5, %s5100_s21  ;;  %v2770_v3 = vadd.f32 %v2767_v5, %v2160_v8 }
0x199f   : > { %v2771_v52 = vmul.f32 0.5, %v2770_v3 }
0x19a1   : > { %4980 = vtanh.f32 %v2771_v52 }
0x19ab   : > { %v4981_v10 = vpop.eup %4980 }
0x19ac   : > { %v2773_v11 = vadd.f32 1.0, %v4981_v10 }
0x19ae   : > { %v2774_v13 = vmul.f32 0.5, %v2773_v11 }
0x19b0   : > { %v2786_v23 = vsub.f32 1.0, %v2774_v13  ;;  %v2792_v27 = vmul.f32 %v2774_v13, %v2694_v62 }
0x1a0f   : > { %v2777_v15 = vpop.permute.xlu0 %2776 }
0x1a10   : > { %v2779_v16 = vmul.f32 %v2777_v15, %v2774_v13 }
0x1a12   : > { %2781 = vrot.lane.b32.xlu1 %v2779_v16, %s5101_s4  ;;  %v2370_v16 = vadd.f32 %v5580_v24, %v5506_v46 }
0x1a84   : > { %v2782_v17 = vpop.permute.xlu1 %2781 }
0x1a85   : > { %v2784_v19 = vadd.f32 %v2782_v17, %v2160_v8 }
0x1a87   : > { %4982 = vtanh.f32 %v2784_v19 }
0x1a91   : > { %v4983_v60 = vpop.eup %4982 }
0x1a92   : > { %2788 = vrot.lane.b32.xlu0 %v4983_v60, %s5103_s22 }
0x1b04   : > { %v2789_v25 = vpop.permute.xlu0 %2788 }
0x1b05   : > { %v2791_v14 = vmul.f32 %v2789_v25, %v2786_v23 }
0x1b07   : > { %v2793_v28 = vadd.f32 %v2792_v27, %v2791_v14 }
0x1b09   : > { %2795 = vrot.lane.b32.xlu1 %v2793_v28, %s5103_s22 }
0x1b7b   : > { %v5620_v30 = vpop.permute.xlu1 %2795 }
0x1b7c   : > { %4713 = vmatmul.mubr.msk.f32.vlgmr.msra.gmra.mrb[22].mxu0 %vm945_vm4, %v5620_v30 }
0x1b7d   : > { %4872 = vmatpush3.bf16.msra.mxu0 %v5518_v6  ;;  %4726 = vmatprep.mubr.msk.f32.mxu0 %vm5099_vm6, %v5096_v18 }
0x1b7e   : > { %4876 = vmatprep.subr.bf16.mxu0 %v5098_v61 }
0x1c4f   : > { %v2865_v31 = vpop.f32.mrb[22].mxu0 }
0x1c50   : > { %v2866_v32 = vadd.f32 %v5564_v12, %v2865_v31  ;;  %v4714_v33 = vpop.f32.mrb[23].mxu0 }
0x1c52   : > { %2875 = vrot.lane.b32.xlu0 %v2866_v32, %s5100_s21  ;;  %v2869_v35 = vadd.f32 %v2866_v32, %v2230_v34 }
0x1c54   : > { %v2870_v36 = vmul.f32 0.5, %v2869_v35 }
0x1c56   : > { %4984 = vtanh.f32 %v2870_v36 }
0x1c60   : > { %v4985_v37 = vpop.eup %4984 }
0x1c61   : > { %v2872_v38 = vadd.f32 1.0, %v4985_v37 }
0x1c63   : > { %v2873_v43 = vmul.f32 0.5, %v2872_v38 }
0x1c65   : > { %v2885_v45 = vsub.f32 1.0, %v2873_v43  ;;  %v2891_v48 = vmul.f32 %v2873_v43, %v2793_v28 }
0x1cc4   : > { %v2876_v39 = vpop.permute.xlu0 %2875 }
0x1cc5   : > { %v2878_v29 = vmul.f32 %v2876_v39, %v2873_v43 }
0x1cc7   : > { %2880 = vrot.lane.b32.xlu1 %v2878_v29, %s5101_s4  ;;  %v2440_v29 = vadd.f32 %v5580_v24, %v5573_v21 }
0x1d39   : > { %v2881_v40 = vpop.permute.xlu1 %2880 }
0x1d3a   : > { %v2883_v41 = vadd.f32 %v2881_v40, %v2230_v34 }
0x1d3c   : > { %4986 = vtanh.f32 %v2883_v41 }
0x1d46   : > { %v4987_v42 = vpop.eup %4986 }
0x1d47   : > { %2887 = vrot.lane.b32.xlu0 %v4987_v42, %s5103_s22 }
0x1db9   : > { %v2888_v47 = vpop.permute.xlu0 %2887 }
0x1dba   : > { %v2890_v44 = vmul.f32 %v2888_v47, %v2885_v45 }
0x1dbc   : > { %v2892_v49 = vadd.f32 %v2891_v48, %v2890_v44 }
0x1dbe   : > { %2894 = vrot.lane.b32.xlu1 %v2892_v49, %s5103_s22 }
0x1e30   : > { %v5635_v50 = vpop.permute.xlu1 %2894 }
0x1e31   : > { %4720 = vmatmul.mubr.msk.f32.vlgmr.msra.gmra.mrb[22].mxu1 %vm945_vm4, %v5635_v50 }
0x1e32   : > { %4875 = vmatpush3.bf16.msra.mxu1 %v5518_v6  ;;  %4733 = vmatprep.mubr.msk.f32.mxu1 %vm5099_vm6, %v5096_v18 }
0x1e33   : > { %4879 = vmatprep.subr.bf16.mxu1 %v5098_v61 }
0x1f04   : > { %v2964_v51 = vpop.f32.mrb[22].mxu1 }
0x1f05   : > { %v2965_v26 = vadd.f32 %v5564_v12, %v2964_v51  ;;  %v4721_v53 = vpop.f32.mrb[23].mxu1 }
0x1f07   : > { %2974 = vrot.lane.b32.xlu0 %v2965_v26, %s5100_s21  ;;  %v2968_v55 = vadd.f32 %v2965_v26, %v2300_v20 }
0x1f09   : > { %v2969_v56 = vmul.f32 0.5, %v2968_v55 }
0x1f0b   : > { %4988 = vtanh.f32 %v2969_v56  ;;  %v819_v56 = vld [vmem:[%s5242_s5] sm:$0xff] }
0x1f15   : > { %v4989_v57 = vpop.eup %4988 }
0x1f16   : > { %v2971_v58 = vadd.f32 1.0, %v4989_v57  ;;  %v820_v57 = vld [vmem:[%s5242_s5 + $0x8] sm:$0xff] }
0x1f18   : > { %v2972_v59 = vmul.f32 0.5, %v2971_v58  ;;  %v5679_v58 = vpack.c.bf16 %v820_v57, %v819_v56 }
0x1f1a   : > { %v2984_v7 = vsub.f32 1.0, %v2972_v59  ;;  %v2990_v3 = vmul.f32 %v2972_v59, %v2892_v49 }
0x1f79   : > { %v2975_v62 = vpop.permute.xlu0 %2974 }
0x1f7a   : > { %v2977_v63 = vmul.f32 %v2975_v62, %v2972_v59 }
0x1f7c   : > { %2979 = vrot.lane.b32.xlu1 %v2977_v63, %s5101_s4 }
0x1fee   : > { %v2980_v2 = vpop.permute.xlu1 %2979 }
0x1fef   : > { %v2982_v4 = vadd.f32 %v2980_v2, %v2300_v20 }
0x1ff1   : > { %4990 = vtanh.f32 %v2982_v4 }
0x1ffb   : > { %v4991_v5 = vpop.eup %4990 }
0x1ffc   : > { %2986 = vrot.lane.b32.xlu0 %v4991_v5, %s5103_s22 }
0x206e   : > { %v2987_v8 = vpop.permute.xlu0 %2986 }
0x206f   : > { %v2989_v22 = vmul.f32 %v2987_v8, %v2984_v7 }
0x2071   : > { %v2991_v52 = vadd.f32 %v2990_v3, %v2989_v22  ;;  %v2510_v3 = vadd.f32 %v5580_v24, %v5556_v9 }
0x2073   : > { %2993 = vrot.lane.b32.xlu1 %v2991_v52, %s5103_s22 }
0x20e5   : > { %v5650_v10 = vpop.permute.xlu1 %2993 }
0x20e6   : > { %4727 = vmatmul.mubr.msk.f32.vlgmr.msra.gmra.mrb[24].mxu0 %vm945_vm4, %v5650_v10 }
0x20e7   : > { %4878 = vmatpush3.bf16.msra.mxu0 %v5518_v6  ;;  %4740 = vmatprep.mubr.msk.f32.mxu0 %vm5099_vm6, %v5096_v18 }
0x20e8   : > { %4882 = vmatprep.subr.bf16.mxu0 %v5098_v61 }
0x21b9   : > { %v3063_v11 = vpop.f32.mrb[24].mxu0 }
0x21ba   : > { %v3064_v13 = vadd.f32 %v5564_v12, %v3063_v11  ;;  %v4728_v15 = vpop.f32.mrb[25].mxu0 }
0x21bc   : > { %3073 = vrot.lane.b32.xlu0 %v3064_v13, %s5100_s21  ;;  %v3067_v17 = vadd.f32 %v3064_v13, %v2370_v16 }
0x21be   : > { %v3068_v19 = vmul.f32 0.5, %v3067_v17 }
0x21c0   : > { %4992 = vtanh.f32 %v3068_v19 }
0x21ca   : > { %v4993_v60 = vpop.eup %4992 }
0x21cb   : > { %v3070_v23 = vadd.f32 1.0, %v4993_v60 }
0x21cd   : > { %v3071_v25 = vmul.f32 0.5, %v3070_v23 }
0x21cf   : > { %v3083_v33 = vsub.f32 1.0, %v3071_v25  ;;  %v3089_v35 = vmul.f32 %v3071_v25, %v2991_v52 }
0x222e   : > { %v3074_v27 = vpop.permute.xlu0 %3073 }
0x222f   : > { %v3076_v14 = vmul.f32 %v3074_v27, %v3071_v25 }
0x2231   : > { %3078 = vrot.lane.b32.xlu1 %v3076_v14, %s5101_s4 }
0x22a3   : > { %v3079_v28 = vpop.permute.xlu1 %3078 }
0x22a4   : > { %v3081_v31 = vadd.f32 %v3079_v28, %v2370_v16 }
0x22a6   : > { %4994 = vtanh.f32 %v3081_v31 }
0x22b0   : > { %v4995_v32 = vpop.eup %4994 }
0x22b1   : > { %3085 = vrot.lane.b32.xlu0 %v4995_v32, %s5103_s22 }
0x2323   : > { %v3086_v34 = vpop.permute.xlu0 %3085 }
0x2324   : > { %v3088_v46 = vmul.f32 %v3086_v34, %v3083_v33 }
0x2326   : > { %v3090_v36 = vadd.f32 %v3089_v35, %v3088_v46 }
0x2328   : > { %3092 = vrot.lane.b32.xlu1 %v3090_v36, %s5103_s22 }
0x239a   : > { %v3093_v37 = vpop.permute.xlu1 %3092 }
0x239b   : > { %4734 = vmatmul.mubr.msk.f32.vlgmr.msra.gmra.mrb[24].mxu1 %vm945_vm4, %v3093_v37 }
0x239c   : > { %4881 = vmatpush3.bf16.msra.mxu1 %v5518_v6  ;;  %4747 = vmatprep.mubr.msk.f32.mxu1 %vm5099_vm6, %v5096_v18 }
0x239d   : > { %4885 = vmatprep.subr.bf16.mxu1 %v5098_v61 }
0x246e   : > { %v3162_v38 = vpop.f32.mrb[24].mxu1 }
0x246f   : > { %v3163_v43 = vadd.f32 %v5564_v12, %v3162_v38  ;;  %v4735_v39 = vpop.f32.mrb[25].mxu1 }
0x2471   : > { %3172 = vrot.lane.b32.xlu0 %v3163_v43, %s5100_s21  ;;  %v3166_v40 = vadd.f32 %v3163_v43, %v2440_v29  ;;  %v2586_v43 = vadd.f32 %v5580_v24, %v5611_v1  ;;  %v5750_v24 = vld [vmem:[%s5952_s23] ss:$0 sm:$0xff] }
0x2473   : > { %v3167_v41 = vmul.f32 0.5, %v3166_v40 }
0x2475   : > { %4996 = vtanh.f32 %v3167_v41 }
0x247f   : > { %v4997_v42 = vpop.eup %4996 }
0x2480   : > { %v3169_v45 = vadd.f32 1.0, %v4997_v42 }
0x2482   : > { %v3170_v6 = vmul.f32 0.5, %v3169_v45 }
0x2484   : > { %v3182_v26 = vsub.f32 1.0, %v3170_v6  ;;  %v3188_v53 = vmul.f32 %v3170_v6, %v3090_v36 }
0x24e3   : > { %v3173_v47 = vpop.permute.xlu0 %3172 }
0x24e4   : > { %v3175_v48 = vmul.f32 %v3173_v47, %v3170_v6 }
0x24e6   : > { %3177 = vrot.lane.b32.xlu1 %v3175_v48, %s5101_s4 }
0x2558   : > { %v3178_v44 = vpop.permute.xlu1 %3177 }
0x2559   : > { %v3180_v49 = vadd.f32 %v3178_v44, %v2440_v29 }
0x255b   : > { %4998 = vtanh.f32 %v3180_v49 }
0x2565   : > { %v4999_v51 = vpop.eup %4998 }
0x2566   : > { %3184 = vrot.lane.b32.xlu0 %v4999_v51, %s5103_s22 }
0x25d8   : > { %v3185_v21 = vpop.permute.xlu0 %3184 }
0x25d9   : > { %v3187_v20 = vmul.f32 %v3185_v21, %v3182_v26 }
0x25db   : > { %v3189_v55 = vadd.f32 %v3188_v53, %v3187_v20 }
0x25dd   : > { %3191 = vrot.lane.b32.xlu1 %v3189_v55, %s5103_s22 }
0x264f   : > { %v3192_v59 = vpop.permute.xlu1 %3191 }
0x2650   : > { %4741 = vmatmul.mubr.msk.f32.vlgmr.msra.gmra.mrb[26].mxu0 %vm945_vm4, %v3192_v59 }
0x2651   : > { %4884 = vmatpush3.bf16.msra.mxu0 %v5679_v58  ;;  %4754 = vmatprep.mubr.msk.f32.mxu0 %vm5099_vm6, %v5096_v18 }
0x2652   : > { %4888 = vmatprep.subr.bf16.mxu0 %v5098_v61 }
0x2654   : > { %4755 = vmatmul.mubr.msk.f32.vlgmr.msra.gmra.mrb[28].mxu0 %vm945_vm4, %v5603_v0 }
0x2655   : > { %4890 = vmatpush3.bf16.msra.mxu0 %v5679_v58  ;;  %4768 = vmatprep.mubr.msk.f32.mxu0 %vm5099_vm6, %v5096_v18 }
0x2656   : > { %4894 = vmatprep.subr.bf16.mxu0 %v5098_v61 }
0x2658   : > { %4769 = vmatmul.mubr.msk.f32.vlgmr.msra.gmra.mrb[30].mxu0 %vm945_vm4, %v5635_v50 }
0x2659   : > { %4896 = vmatpush3.bf16.msra.mxu0 %v5679_v58  ;;  %4782 = vmatprep.mubr.msk.f32.mxu0 %vm5099_vm6, %v5096_v18 }
0x265a   : > { %4900 = vmatprep.subr.bf16.mxu0 %v5098_v61 }
0x265c   : > { %4783 = vmatmul.mubr.msk.f32.vlgmr.msra.gmra.mrb[32].mxu0 %vm945_vm4, %v3093_v37 }
0x265d   : > { %4902 = vmatpush3.bf16.msra.mxu0 %v5679_v58  ;;  %4796 = vmatprep.mubr.msk.f32.mxu0 %vm5099_vm6, %v5096_v18 }
0x2723   : > { %v3261_v0 = vpop.f32.mrb[26].mxu0 }
0x2724   : > { %v3262_v62 = vadd.f32 %v5564_v12, %v3261_v0  ;;  %v4742_v63 = vpop.f32.mrb[27].mxu0 }
0x2726   : > { %3271 = vrot.lane.b32.xlu0 %v3262_v62, %s5100_s21  ;;  %v3265_v22 = vadd.f32 %v3262_v62, %v2510_v3 }
0x2727   : > { %v5704_v50 = vpop.f32.mrb[28].mxu0 }
0x2728   : > { %v4756_v2 = vpop.f32.mrb[29].mxu0  ;;  %v3266_v52 = vmul.f32 0.5, %v3265_v22  ;;  %v5754_v1 = vadd.f32 %v5750_v24, %v5704_v50 }
0x272a   : > { %5000 = vtanh.f32 %v3266_v52  ;;  %v3464_v48 = vmin.f32 %v5754_v1, 88.0 }
0x272b   : > { %v5706_v4 = vpop.f32.mrb[30].mxu0 }
0x272c   : > { %v4770_v5 = vpop.f32.mrb[31].mxu0  ;;  %v3466_v44 = vsel %vm3465_vm7, %v3464_v48, -inf }
0x272f   : > { %v5708_v7 = vpop.f32.mrb[32].mxu0 }
0x2730   : > { %v4784_v8 = vpop.f32.mrb[33].mxu0  ;;  %v5778_v5 = vadd.f32 %v5750_v24, %v5708_v7 }
0x2732   : > { %v3873_v52 = vmin.f32 %v5778_v5, 88.0 }
0x2734   : > { %v5001_v11 = vpop.eup %5000 }
0x2735   : > { %v3268_v13 = vadd.f32 1.0, %v5001_v11  ;;  %v3874_v11 = vsel %vm3465_vm7, %v3873_v52, -inf }
0x2737   : > { %v3269_v15 = vmul.f32 0.5, %v3268_v13 }
0x2739   : > { %v3281_v25 = vsub.f32 1.0, %v3269_v15  ;;  %v3287_v14 = vmul.f32 %v3269_v15, %v3189_v55 }
0x2798   : > { %v3272_v16 = vpop.permute.xlu0 %3271 }
0x2799   : > { %v3274_v17 = vmul.f32 %v3272_v16, %v3269_v15  ;;  %v5104_v16 = vmov 4  }
0x279a   : > { %4939 = vset.pattern.permute.xlu0 %v5104_v16  ;;  %4938 = vset.pattern.permute.xlu1 %v5104_v16 }
0x279b   : > { %3276 = vrot.lane.b32.xlu1 %v3274_v17, %s5101_s4 }
0x280d   : > { %v3277_v19 = vpop.permute.xlu1 %3276 }
0x280e   : > { %v3279_v60 = vadd.f32 %v3277_v19, %v2510_v3 }
0x2810   : > { %5002 = vtanh.f32 %v3279_v60 }
0x281a   : > { %v5003_v23 = vpop.eup %5002 }
0x281b   : > { %3283 = vrot.lane.b32.xlu0 %v5003_v23, %s5103_s22 }
0x288d   : > { %v3284_v27 = vpop.permute.xlu0 %3283 }
0x288e   : > { %v3286_v9 = vmul.f32 %v3284_v27, %v3281_v25 }
0x2890   : > { %v3288_v28 = vadd.f32 %v3287_v14, %v3286_v9 }
0x2892   : > { %3290 = vrot.lane.b32.xlu1 %v3288_v28, %s5103_s22 }
0x2904   : > { %v3291_v31 = vpop.permute.xlu1 %3290 }
0x2905   : > { %4748 = vmatmul.mubr.msk.f32.vlgmr.msra.gmra.mrb[26].mxu1 %vm945_vm4, %v3291_v31  ;;  %4797 = vmatmul.mubr.msk.f32.vlgmr.msra.gmra.mrb[34].mxu0 %vm945_vm4, %v3291_v31 }
0x2906   : > { %4887 = vmatpush3.bf16.msra.mxu1 %v5679_v58  ;;  %4761 = vmatprep.mubr.msk.f32.mxu1 %vm5099_vm6, %v5096_v18 }
0x2907   : > { %4891 = vmatprep.subr.bf16.mxu1 %v5098_v61 }
0x2909   : > { %4762 = vmatmul.mubr.msk.f32.vlgmr.msra.gmra.mrb[28].mxu1 %vm945_vm4, %v5620_v30 }
0x290a   : > { %4893 = vmatpush3.bf16.msra.mxu1 %v5679_v58  ;;  %4775 = vmatprep.mubr.msk.f32.mxu1 %vm5099_vm6, %v5096_v18 }
0x290b   : > { %4897 = vmatprep.subr.bf16.mxu1 %v5098_v61 }
0x290d   : > { %4776 = vmatmul.mubr.msk.f32.vlgmr.msra.gmra.mrb[30].mxu1 %vm945_vm4, %v5650_v10 }
0x290e   : > { %4899 = vmatpush3.bf16.msra.mxu1 %v5679_v58  ;;  %4789 = vmatprep.mubr.msk.f32.mxu1 %vm5099_vm6, %v5096_v18 }
0x290f   : > { %4903 = vmatprep.subr.bf16.mxu1 %v5098_v61 }
0x2911   : > { %4790 = vmatmul.mubr.msk.f32.vlgmr.msra.gmra.mrb[32].mxu1 %vm945_vm4, %v3192_v59  ;;  %v5766_v59 = vadd.f32 %v5750_v24, %v5706_v4 }
0x2912   : > { %4905 = vmatpush3.bf16.msra.mxu1 %v5679_v58  ;;  %4803 = vmatprep.mubr.msk.f32.mxu1 %vm5099_vm6, %v5096_v18 }
0x2913   : > { %v3669_v2 = vmin.f32 %v5766_v59, 88.0 }
0x2915   : > { %v3670_v4 = vsel %vm3465_vm7, %v3669_v2, -inf }
0x29d8   : > { %v3360_v30 = vpop.f32.mrb[26].mxu1  ;;  %v4073_v32 = vpop.f32.mrb[34].mxu0 }
0x29d9   : > { %v3361_v33 = vadd.f32 %v5564_v12, %v3360_v30  ;;  %v4749_v34 = vpop.f32.mrb[27].mxu1  ;;  %v4798_v10 = vpop.f32.mrb[35].mxu0  ;;  %v5783_v3 = vadd.f32 %v5750_v24, %v4073_v32 }
0x29db   : > { %3370 = vrot.lane.b32.xlu0 %v3361_v33, %s5100_s21  ;;  %v3364_v18 = vadd.f32 %v3361_v33, %v2586_v43  ;;  %v4077_v13 = vmin.f32 %v5783_v3, 88.0 }
0x29dc   : > { %v3563_v35 = vpop.f32.mrb[28].mxu1 }
0x29dd   : > { %v4763_v46 = vpop.f32.mrb[29].mxu1  ;;  %v3365_v39 = vmul.f32 0.5, %v3364_v18  ;;  %v5760_v57 = vadd.f32 %v5750_v24, %v3563_v35  ;;  %v4078_v7 = vsel %vm3465_vm7, %v4077_v13, -inf }
0x29df   : > { %5004 = vtanh.f32 %v3365_v39  ;;  %v3567_v62 = vmin.f32 %v5760_v57, 88.0 }
0x29e0   : > { %v3767_v36 = vpop.f32.mrb[30].mxu1 }
0x29e1   : > { %v4777_v37 = vpop.f32.mrb[31].mxu1  ;;  %v5772_v63 = vadd.f32 %v5750_v24, %v3767_v36  ;;  %v3568_v50 = vsel %vm3465_vm7, %v3567_v62, -inf }
0x29e3   : > { %v3771_v8 = vmin.f32 %v5772_v63, 88.0 }
0x29e4   : > { %v5739_v61 = vpop.f32.mrb[32].mxu1 }
0x29e5   : > { %v4791_v38 = vpop.f32.mrb[33].mxu1  ;;  %v3772_v22 = vsel %vm3465_vm7, %v3771_v8, -inf }
0x29e6   : > { %v5802_v38 = vadd.f32 %v5750_v24, %v5739_v61 }
0x29e9   : > { %v5005_v29 = vpop.eup %5004 }
0x29ea   : > { %v3367_v12 = vadd.f32 1.0, %v5005_v29  ;;  %v3975_v29 = vmin.f32 %v5802_v38, 88.0 }
0x29ec   : > { %v3368_v40 = vmul.f32 0.5, %v3367_v12  ;;  %v3976_v61 = vsel %vm3465_vm7, %v3975_v29, -inf }
0x29ee   : > { %v3380_v49 = vsub.f32 1.0, %v3368_v40  ;;  %v3386_v26 = vmul.f32 %v3368_v40, %v3288_v28 }
0x2a4d   : > { %v3371_v41 = vpop.permute.xlu0 %3370 }
0x2a4e   : > { %v3373_v42 = vmul.f32 %v3371_v41, %v3368_v40  ;;  %v3477_v40 = vmul.f32 0.5, %v5754_v1 }
0x2a50   : > { %3375 = vrot.lane.b32.xlu1 %v3373_v42, %s5101_s4 }
0x2ac2   : > { %v3376_v45 = vpop.permute.xlu1 %3375 }
0x2ac3   : > { %v3378_v6 = vadd.f32 %v3376_v45, %v2586_v43 }
0x2ac5   : > { %5006 = vtanh.f32 %v3378_v6  ;;  %v3579_v6 = vmul.f32 0.5, %v5760_v57 }
0x2acf   : > { %v5007_v47 = vpop.eup %5006 }
0x2ad0   : > { %3382 = vrot.lane.b32.xlu0 %v5007_v47, %s5103_s22  ;;  %v3681_v47 = vmul.f32 0.5, %v5766_v59 }
0x2aef   : > { %3467 = vmax.xlane.f32.xlu0 %v3466_v44 }
0x2b42   : > { %v3383_v51 = vpop.permute.xlu0 %3382 }
0x2b43   : > { %v3385_v21 = vmul.f32 %v3383_v51, %v3380_v49  ;;  %v3885_v49 = vmul.f32 0.5, %v5778_v5  ;;  %v3987_v51 = vmul.f32 0.5, %v5802_v38 }
0x2b45   : > { %v3387_v53 = vadd.f32 %v3386_v26, %v3385_v21 }
0x2b47   : > { %4110 = vrot.lane.b32.xlu1 %v3387_v53, %s5103_s22 }
0x2b7c   : > { %v3468_v20 = vpop.xlane.xlu0 %3467 }
0x2b7d   : > { %v3469_v55 = vsub.f32 %v3464_v48, %v3468_v20  ;;  %v3783_v48 = vmul.f32 0.5, %v5772_v63 }
0x2b7f   : > { %v3470_v56 = vmul.f32 1.442695, %v3469_v55 }
0x2b81   : > { %5008 = vpow2.f32 %v3470_v56 }
0x2b8b   : > { %v5762_v58 = vpop.eup %5008 }
0x2b8c   : > { %v3472_v0 = vsel %vm3465_vm7, %v5762_v58, 0.0 }
0x2b8d   : > { %3473 = vadd.xlane.f32.xlu1 %v3472_v0  ;;  %v4089_v0 = vmul.f32 0.5, %v5783_v3 }
0x2b91   : > { %3569 = vmax.xlane.f32.xlu1 %v3568_v50 }
0x2b95   : > { %3671 = vmax.xlane.f32.xlu1 %v3670_v4 }
0x2b99   : > { %3773 = vmax.xlane.f32.xlu1 %v3772_v22 }
0x2b9d   : > { %3875 = vmax.xlane.f32.xlu1 %v3874_v11 }
0x2ba1   : > { %4079 = vmax.xlane.f32.xlu1 %v4078_v7 }
0x2bb9   : > { %v4111_v15 = vpop.permute.xlu1 %4110 }
0x2bba   : > { %4223 = vst.msk [vmem:[#allocation3 + $0x2] sm:$0x3] %vm4222_vm8, %v4111_v15  ;;  %4804 = vmatmul.mubr.msk.f32.vlgmr.msra.gmra.mrb[34].mxu1 %vm945_vm4, %v4111_v15 }
0x2c1a   : > { %v5792_v17 = vpop.xlane.xlu1 %3473 }
0x2c1e   : > { %v3570_v19 = vpop.xlane.xlu1 %3569 }
0x2c1f   : > { %v3571_v60 = vsub.f32 %v3567_v62, %v3570_v19 }
0x2c21   : > { %v3572_v23 = vmul.f32 1.442695, %v3571_v60 }
0x2c22   : > { %v3672_v25 = vpop.xlane.xlu1 %3671 }
0x2c23   : > { %5010 = vpow2.f32 %v3572_v23  ;;  %v3673_v27 = vsub.f32 %v3669_v2, %v3672_v25 }
0x2c25   : > { %v3674_v14 = vmul.f32 1.442695, %v3673_v27 }
0x2c26   : > { %v3774_v9 = vpop.xlane.xlu1 %3773 }
0x2c27   : > { %5012 = vpow2.f32 %v3674_v14  ;;  %v3775_v28 = vsub.f32 %v3771_v8, %v3774_v9 }
0x2c29   : > { %v3776_v31 = vmul.f32 1.442695, %v3775_v28 }
0x2c2a   : > { %v3876_v30 = vpop.xlane.xlu1 %3875 }
0x2c2b   : > { %5014 = vpow2.f32 %v3776_v31  ;;  %v3877_v32 = vsub.f32 %v3873_v52, %v3876_v30 }
0x2c2d   : > { %v5794_v33 = vpop.eup %5010  ;;  %v3878_v34 = vmul.f32 1.442695, %v3877_v32 }
0x2c2e   : > { %v4080_v10 = vpop.xlane.xlu1 %4079  ;;  %v3574_v35 = vsel %vm3465_vm7, %v5794_v33, 0.0 }
0x2c2f   : > { %5016 = vpow2.f32 %v3878_v34  ;;  %v4081_v46 = vsub.f32 %v4077_v13, %v4080_v10  ;;  %3575 = vadd.xlane.f32.xlu0 %v3574_v35 }
0x2c31   : > { %v5798_v36 = vpop.eup %5012  ;;  %v4082_v37 = vmul.f32 1.442695, %v4081_v46 }
0x2c32   : > { %v3676_v43 = vsel %vm3465_vm7, %v5798_v36, 0.0 }
0x2c33   : > { %5018 = vpow2.f32 %v4082_v37  ;;  %3677 = vadd.xlane.f32.xlu0 %v3676_v43 }
0x2c34   : > { %5020 = vtanh.f32 %v3477_v40 }
0x2c35   : > { %v5806_v18 = vpop.eup %5014  ;;  %5022 = vtanh.f32 %v3579_v6 }
0x2c36   : > { %v3778_v39 = vsel %vm3465_vm7, %v5806_v18, 0.0  ;;  %5024 = vtanh.f32 %v3681_v47 }
0x2c37   : > { %3779 = vadd.xlane.f32.xlu0 %v3778_v39  ;;  %5026 = vtanh.f32 %v3783_v48 }
0x2c38   : > { %5028 = vtanh.f32 %v3885_v49 }
0x2c39   : > { %v5811_v12 = vpop.eup %5016  ;;  %5030 = vtanh.f32 %v3987_v51 }
0x2c3a   : > { %v3880_v41 = vsel %vm3465_vm7, %v5811_v12, 0.0  ;;  %5032 = vtanh.f32 %v4089_v0 }
0x2c3b   : > { %3977 = vmax.xlane.f32.xlu0 %v3976_v61  ;;  %3881 = vadd.xlane.f32.xlu1 %v3880_v41 }
0x2c3d   : > { %v5819_v42 = vpop.eup %5018 }
0x2c3e   : > { %v4084_v45 = vsel %vm3465_vm7, %v5819_v42, 0.0  ;;  %v5021_v1 = vpop.eup %5020 }
0x2c3f   : > { %4085 = vadd.xlane.f32.xlu0 %v4084_v45  ;;  %v3479_v44 = vadd.f32 1.0, %v5021_v1  ;;  %v5023_v21 = vpop.eup %5022 }
0x2c40   : > { %v3581_v20 = vadd.f32 1.0, %v5023_v21  ;;  %v5025_v55 = vpop.eup %5024 }
0x2c41   : > { %v3480_v26 = vmul.f32 0.5, %v3479_v44  ;;  %v3683_v57 = vadd.f32 1.0, %v5025_v55  ;;  %v5027_v59 = vpop.eup %5026 }
0x2c42   : > { %v3582_v56 = vmul.f32 0.5, %v3581_v20  ;;  %v5029_v62 = vpop.eup %5028  ;;  %v3785_v50 = vadd.f32 1.0, %v5027_v59  ;;  %v3481_v20 = vld [vmem:[#allocation2] sm:$0x3] }
0x2c43   : > { %v3482_v53 = vsub.f32 1.0, %v3480_v26  ;;  %v3684_v63 = vmul.f32 0.5, %v3683_v57  ;;  %v5031_v2 = vpop.eup %5030  ;;  %v3887_v8 = vadd.f32 1.0, %v5029_v62  ;;  %v3583_v62 = vld [vmem:[#allocation2 + $0x2] sm:$0x3] }
0x2c44   : > { %v3989_v5 = vadd.f32 1.0, %v5031_v2  ;;  %v3786_v4 = vmul.f32 0.5, %v3785_v50  ;;  %v5033_v13 = vpop.eup %5032  ;;  %v3584_v34 = vsub.f32 1.0, %v3582_v56 }
0x2c45   : > { %v3888_v22 = vmul.f32 0.5, %v3887_v8  ;;  %v4091_v7 = vadd.f32 1.0, %v5033_v13  ;;  %v3686_v10 = vsub.f32 1.0, %v3684_v63  ;;  %v3685_v8 = vld [vmem:[#allocation2 + $0x4] sm:$0x3] }
0x2c46   : > { %v3990_v52 = vmul.f32 0.5, %v3989_v5  ;;  %v3788_v35 = vsub.f32 1.0, %v3786_v4 }
0x2c47   : > { %v4092_v15 = vmul.f32 0.5, %v4091_v7  ;;  %v3890_v46 = vsub.f32 1.0, %v3888_v22 }
0x2c48   : > { %v3992_v11 = vsub.f32 1.0, %v3990_v52 }
0x2c49   : > { %v4094_v43 = vsub.f32 1.0, %v4092_v15 }
0x2c55   : > { %3485 = vperm.xlu0 %4939, %v3482_v53  }
0x2c59   : > { %3593 = vperm.xlu0 %4939, %v3582_v56  }
0x2c5d   : > { %3695 = vperm.xlu0 %4939, %v3684_v63  }
0x2c61   : > { %3797 = vperm.xlu0 %4939, %v3786_v4  }
0x2c65   : > { %3899 = vperm.xlu0 %4939, %v3888_v22  }
0x2c69   : > { %3995 = vperm.xlu0 %4939, %v3992_v11  }
0x2c6d   : > { %4001 = vperm.xlu0 %4939, %v3990_v52  }
0x2c71   : > { %4103 = vperm.xlu0 %4939, %v4092_v15  }
0x2c8d   : > { %v4180_v3 = vpop.f32.mrb[34].mxu1 }
0x2c8e   : > { %v4181_v16 = vadd.f32 %v5750_v24, %v4180_v3  ;;  %v4805_v19 = vpop.f32.mrb[35].mxu1 }
0x2c8f   : > { %v3787_v19 = vld [vmem:[#allocation2 + $0x6] sm:$0x3] }
0x2c90   : > { %v4184_v60 = vmin.f32 %v4181_v16, 88.0  ;;  %v4196_v24 = vmul.f32 0.5, %v4181_v16 }
0x2c92   : > { %v4185_v23 = vsel %vm3465_vm7, %v4184_v60, -inf }
0x2c93   : > { %4186 = vmax.xlane.f32.xlu1 %v4185_v23 }
0x2cbc   : > { %v3576_v25 = vpop.xlane.xlu0 %3575 }
0x2cc0   : > { %v3678_v27 = vpop.xlane.xlu0 %3677 }
0x2cc4   : > { %v3780_v14 = vpop.xlane.xlu0 %3779 }
0x2cc8   : > { %v3978_v9 = vpop.xlane.xlu0 %3977  ;;  %v3882_v40 = vpop.xlane.xlu1 %3881 }
0x2cc9   : > { %v3979_v28 = vsub.f32 %v3975_v29, %v3978_v9 }
0x2ccb   : > { %v3980_v31 = vmul.f32 1.442695, %v3979_v28 }
0x2ccc   : > { %v4086_v1 = vpop.xlane.xlu0 %4085 }
0x2ccd   : > { %5034 = vpow2.f32 %v3980_v31 }
0x2cce   : > { %5036 = vtanh.f32 %v4196_v24 }
0x2cd4   : > { %v3486_v48 = vpop.permute.xlu0 %3485 }
0x2cd7   : > { %v5833_v30 = vpop.eup %5034 }
0x2cd8   : > { %v3982_v32 = vsel %vm3465_vm7, %v5833_v30, 0.0  ;;  %v5037_v37 = vpop.eup %5036  ;;  %v3594_v44 = vpop.permute.xlu0 %3593 }
0x2cd9   : > { %3983 = vadd.xlane.f32.xlu1 %v3982_v32  ;;  %v4198_v38 = vadd.f32 1.0, %v5037_v37  ;;  %v3596_v5 = vmul.f32 %v3594_v44, %v3583_v62  ;;  %v3889_v32 = vld [vmem:[#allocation2 + $0x8] sm:$0x3] }
0x2cdb   : > { %v4199_v39 = vmul.f32 0.5, %v4198_v38 }
0x2cdc   : > { %v3696_v49 = vpop.permute.xlu0 %3695 }
0x2cdd   : > { %v4201_v29 = vsub.f32 1.0, %v4199_v39  ;;  %v3698_v16 = vmul.f32 %v3696_v49, %v3685_v8 }
0x2ce0   : > { %v3798_v51 = vpop.permute.xlu0 %3797 }
0x2ce1   : > { %v3800_v31 = vmul.f32 %v3798_v51, %v3787_v19 }
0x2cea   : > { %3491 = vperm.xlu1 %4938, %v3480_v26   ;;  %v3900_v26 = vpop.permute.xlu0 %3899 }
0x2cee   : > { %3587 = vperm.xlu1 %4938, %v3584_v34   ;;  %v3996_v59 = vpop.permute.xlu0 %3995 }
0x2cf2   : > { %3689 = vperm.xlu1 %4938, %v3686_v10   ;;  %v4002_v52 = vpop.permute.xlu0 %4001 }
0x2cf6   : > { %3791 = vperm.xlu1 %4938, %v3788_v35   ;;  %v3902_v35 = vmul.f32 %v3900_v26, %v3889_v32  ;;  %v4104_v37 = vpop.permute.xlu0 %4103 }
0x2cfa   : > { %3893 = vperm.xlu1 %4938, %v3890_v46  }
0x2cfe   : > { %4097 = vperm.xlu1 %4938, %v4094_v43  }
0x2d02   : > { %4210 = vperm.xlu1 %4938, %v4199_v39  }
0x2d06   : > { %4204 = vperm.xlu1 %4938, %v4201_v29  }
0x2d20   : > { %v4187_v61 = vpop.xlane.xlu1 %4186 }
0x2d21   : > { %v4188_v41 = vsub.f32 %v4184_v60, %v4187_v61 }
0x2d23   : > { %v4189_v45 = vmul.f32 1.442695, %v4188_v41 }
0x2d25   : > { %5038 = vpow2.f32 %v4189_v45 }
0x2d26   : > { %5040 = vrcp.f32 %v5792_v17 }
0x2d27   : > { %5042 = vrcp.f32 %v3576_v25 }
0x2d28   : > { %5044 = vrcp.f32 %v3678_v27 }
0x2d2f   : > { %v5837_v6 = vpop.eup %5038 }
0x2d30   : > { %v4191_v47 = vsel %vm3465_vm7, %v5837_v6, 0.0  ;;  %v5041_v21 = vpop.eup %5040 }
0x2d31   : > { %4192 = vadd.xlane.f32.xlu1 %v4191_v47  ;;  %v3476_v55 = vmul.f32 %v5041_v21, %v5762_v58  ;;  %v5043_v56 = vpop.eup %5042  ;;  %v3991_v58 = vld [vmem:[#allocation2 + $0xa] sm:$0x3] }
0x2d32   : > { %v3578_v17 = vmul.f32 %v5043_v56, %v5794_v33  ;;  %v5045_v50 = vpop.eup %5044  ;;  %v4004_v60 = vmul.f32 %v4002_v52, %v3991_v58 }
0x2d33   : > { %v3680_v13 = vmul.f32 %v5045_v50, %v5798_v36 }
0x2d42   : > { %4216 = vrot.lane.b32.xlu1 %v5593_v54, %s5103_s22  ;;  %v3488_v54 = vmul.f32 %v3486_v48, %v3476_v55  ;;  %v4200_v48 = vld [vmem:[#allocation2 + $0xe] sm:$0x3] }
0x2d66   : > { %v3984_v53 = vpop.xlane.xlu1 %3983 }
0x2d67   : > { %5046 = vrcp.f32 %v3984_v53 }
0x2d68   : > { %5048 = vrcp.f32 %v3780_v14 }
0x2d69   : > { %5050 = vrcp.f32 %v3882_v40 }
0x2d6a   : > { %v3492_v57 = vpop.permute.xlu1 %3491  ;;  %5052 = vrcp.f32 %v4086_v1 }
0x2d6b   : > { %v3494_v0 = vmul.f32 %v3492_v57, %v3481_v20 }
0x2d6d   : > { %v3495_v63 = vadd.f32 %v3494_v0, %v3488_v54 }
0x2d6e   : > { %v3588_v2 = vpop.permute.xlu1 %3587 }
0x2d6f   : > { %3496 = vst.msk [vmem:[#allocation2] sm:$0x3] %vm3465_vm7, %v3495_v63  ;;  %v3590_v4 = vmul.f32 %v3588_v2, %v3578_v17 }
0x2d71   : > { %v5047_v22 = vpop.eup %5046  ;;  %v3597_v11 = vadd.f32 %v3596_v5, %v3590_v4 }
0x2d72   : > { %v5049_v7 = vpop.eup %5048  ;;  %v3986_v15 = vmul.f32 %v5047_v22, %v5833_v30  ;;  %v3690_v3 = vpop.permute.xlu1 %3689 }
0x2d73   : > { %3598 = vst.msk [vmem:[#allocation2 + $0x2] sm:$0x3] %vm3465_vm7, %v3597_v11  ;;  %v3692_v33 = vmul.f32 %v3690_v3, %v3680_v13  ;;  %v3782_v27 = vmul.f32 %v5049_v7, %v5806_v18  ;;  %v5051_v14 = vpop.eup %5050  ;;  %v4093_v18 = vld [vmem:[#allocation2 + $0xc] sm:$0x3] }
0x2d74   : > { %v3998_v23 = vmul.f32 %v3996_v59, %v3986_v15  ;;  %v3884_v24 = vmul.f32 %v5051_v14, %v5811_v12  ;;  %v5053_v34 = vpop.eup %5052  ;;  %v4106_v29 = vmul.f32 %v4104_v37, %v4093_v18 }
0x2d75   : > { %v3699_v25 = vadd.f32 %v3698_v16, %v3692_v33  ;;  %v4088_v43 = vmul.f32 %v5053_v34, %v5819_v42 }
0x2d76   : > { %v4005_v9 = vadd.f32 %v4004_v60, %v3998_v23  ;;  %v3792_v28 = vpop.permute.xlu1 %3791 }
0x2d77   : > { %3700 = vst.msk [vmem:[#allocation2 + $0x4] sm:$0x3] %vm3465_vm7, %v3699_v25  ;;  %v3794_v36 = vmul.f32 %v3792_v28, %v3782_v27 }
0x2d78   : > { %4006 = vst.msk [vmem:[#allocation2 + $0xa] sm:$0x3] %vm3465_vm7, %v4005_v9 }
0x2d79   : > { %v3801_v30 = vadd.f32 %v3800_v31, %v3794_v36 }
0x2d7a   : > { %v3894_v10 = vpop.permute.xlu1 %3893 }
0x2d7b   : > { %3802 = vst.msk [vmem:[#allocation2 + $0x6] sm:$0x3] %vm3465_vm7, %v3801_v30  ;;  %v3896_v46 = vmul.f32 %v3894_v10, %v3884_v24 }
0x2d7d   : > { %v3903_v38 = vadd.f32 %v3902_v35, %v3896_v46 }
0x2d7e   : > { %v4098_v39 = vpop.permute.xlu1 %4097 }
0x2d7f   : > { %3904 = vst.msk [vmem:[#allocation2 + $0x8] sm:$0x3] %vm3465_vm7, %v3903_v38  ;;  %v4100_v40 = vmul.f32 %v4098_v39, %v4088_v43 }
0x2d81   : > { %v4107_v61 = vadd.f32 %v4106_v29, %v4100_v40 }
0x2d82   : > { %v4211_v12 = vpop.permute.xlu1 %4210  ;;  %v4228_v26 = vld [vmem:[#allocation2] sm:$0xff] (!%p4445_p5) }
0x2d83   : > { %4108 = vst.msk [vmem:[#allocation2 + $0xc] sm:$0x3] %vm3465_vm7, %v4107_v61  ;;  %v4213_v42 = vmul.f32 %v4211_v12, %v4200_v48 }
0x2d84   : > { %4230 = vst.msk [vmem:[%s5953_s20] sm:$0xff] (!%p4445_p5), %vm838_vm3, %v4228_v26 }
0x2d86   : > { %v4205_v41 = vpop.permute.xlu1 %4204 }
0x2dbe   : > { %v4193_v45 = vpop.xlane.xlu1 %4192 }
0x2dbf   : > { %5054 = vrcp.f32 %v4193_v45 }
0x2dc2   : > { %v4217_v47 = vpop.permute.xlu1 %4216 }
0x2dc3   : > { %4220 = vst.msk [vmem:[#allocation3 - $0x6] sm:$0xc0] %vm4219_vm9, %v4217_v47 }
0x2dc9   : > { %v5055_v1 = vpop.eup %5054 }
0x2dca   : > { %v4195_v44 = vmul.f32 %v5055_v1, %v5837_v6  ;;  %4227 = sbr.rel (%p4445_p5) target bundleno = 11737 (0x2dd9), region = 108  ;;  %v4232_v53 = vld [vmem:[#allocation3] sm:$0x3] (!%p4445_p5)  ;;  %v4233_v6 = vld [vmem:[#allocation3 + $0x2] sm:$0x3] (!%p4445_p5) }
0x2dcb   : > { %4234 = vst.msk [vmem:[#allocation5] sm:$0x3] (!%p4445_p5), %vm4222_vm8, %v4232_v53  ;;  %4235 = vst.msk [vmem:[#allocation5 + $0x2] sm:$0x3] (!%p4445_p5), %vm4222_vm8, %v4233_v6 }
0x2dcc   : > { %v4207_v49 = vmul.f32 %v4205_v41, %v4195_v44 }
0x2dce   : > { %v4214_v51 = vadd.f32 %v4213_v42, %v4207_v49 }
0x2dd0   : > { %4215 = vst.msk [vmem:[#allocation2 + $0xe] sm:$0x3] %vm3465_vm7, %v4214_v51 }
0x2dd7   : > { %v4229_v21 = vld [vmem:[#allocation2 + $0x8] sm:$0xff] }
0x2dd8   : > { %4231 = vst.msk [vmem:[%s5953_s20 + $0x8] sm:$0xff] %vm838_vm3, %v4229_v21 }
0x2dd9 PF: > { %p4910_p6 = scmp.eq.s32.totalorder %s5226_s27, 1  ;;  %s5105_s22 = smov [#allocation5]  }
0x2dda   : > { %s4245_s11 = sshll.u32 %s5105_s22, 4  ;;  %s4246_s11 = int_to_ptr.vmem [resolvable:$true] %s4245_s11 }
0x2ddb   : > { %s5056_s1 = scalar_lea.vmem %s4246_s11, 64  ;;  %p5063_p10 = scmp.lt.s32.totalorder %s4246_s11, %s4246_s11 }
0x2ddc   : > { %p5057_p7 = scmp.ne.s32.totalorder %s4246_s11, %s5056_s1  ;;  %p5064_p11 = scmp.lt.s32.totalorder %s5056_s1, %s5056_s1 }
0x2dde   : > { %p5058_p8 = pnand %p5057_p7, %p4910_p6  ;;  %p5065_p12 = por %p5064_p11, %p5063_p10 }
0x2de0   : > { %p5059_p9 = pneg %p5058_p8 }
0x2de2   : > { %p5066_p13 = pnand %p5065_p12, %p5059_p9 }
0x2de4   : > { %5069 = shalt.err (!%p5066_p13)
}
0x2de5   : > { %s5954_s12 = sld [smem:[#allocation19_spill]] }
0x2deb   : > { %s5070_s5 = scalar_lea.hbm %s5954_s12, 64 }
0x2dec   : > { %p5071_p0 = scmp.ne.s32.totalorder %s5954_s12, %s5070_s5  ;;  %p5076_p3 = scmp.lt.u32.totalorder %s5070_s5, %s5954_s12 }
0x2dee   : > { %p5072_p1 = pnand %p5071_p0, %p4910_p6 }
0x2df0   : > { %p5073_p2 = pneg %p5072_p1 }
0x2df2   : > { %p5078_p4 = pnand %p5076_p3, %p5073_p2 }
0x2df4   : > { %5081 = shalt.err (!%p5078_p4)
}
0x2df5   : > { %s5106_s21 = smov 2  }
0x2df6   : > { %4907 = dma.vmem_to_hbm [thread:$0]  (%p4910_p6), %s4246_s11, 64, %s5954_s12, [#allocation6], %s5101_s4, %s5101_s4, %s5106_s21  }
0x2df7   : > { %5087 = dma.done.wait (%p4910_p6), [#allocation6], 64  }
0x2df8   : > { %5089 = vsyncadd (%p4910_p6), [#allocation6], 4294967232 }
0x2df9 PF: > { %s5955_s1 = sld [smem:[#allocation8_spill]] }
0x2dff   : > { %s34_s26 = sadd.s32 1, %s5955_s1  }
0x2e00   : > { %p31_p5 = scmp.ge.s32.totalorder %s34_s26, 4  }
0x2e02   :  { %33 = sbr.rel (!%p31_p5) target bundleno = 14 (0xe), region = 171 }
0x2e09   :  { %4264 = vsyncpa [#allocation6], 1 }
0x2e0a   :  { %4266 = vsyncpa [#allocation6 + $0x1], 1 }

</bundles_post_ra>
